<compile_context>
chip_gen: v6e
topology: v6e:2x2x1
jax: 0.10.0
libtpu: 0.0.40
codegen_flags: <defaults>
</compile_context>

<pallas_src>
import math

import jax
import jax.numpy as jnp
from jax import lax
from jax.experimental import pallas as pl
from jax.experimental.pallas import tpu as pltpu


def _round_up(x, m):
    return ((x + m - 1) // m) * m


def _largest_divisor_leq(n, cap):
    # TODO(synk): for prime/awkward n this degrades toward chunk=1; a smarter
    # scheme would pad time per-direction, but correctness would get subtle.
    for c in range(min(cap, n), 0, -1):
        if n % c == 0:
            return c
    return 1


def _pad_gate_cols(w, H, Hp):
    """(..., 4H) -> (..., 4Hp); gate g is placed at columns [g*Hp, g*Hp+H)."""
    if H == Hp:
        return w
    pad = [(0, 0)] * (w.ndim - 1) + [(0, Hp - H)]
    parts = [jnp.pad(w[..., g * H:(g + 1) * H], pad) for g in range(4)]
    return jnp.concatenate(parts, axis=-1)


# ----------------------------------------------------------------------------
# Pallas kernel: one layer.  Grid = (direction, batch-tile, time-chunk).
# h/c state persists in scratch across the (last, "arbitrary") time-chunk axis.
# ----------------------------------------------------------------------------
def _bilstm_layer_kernel(x_ref, wih_ref, whh_ref, b_ref, out_ref,
                         xproj_scr, h_scr, c_scr):
    """
    x_ref:     (Tc, Bt, Din)   matmul dtype, time-major chunk
    wih_ref:   (Din, 4*Hp)     matmul dtype (direction dim squeezed)
    whh_ref:   (Hp, 4*Hp)      matmul dtype
    b_ref:     (1, 4*Hp)       f32 (b_ih + b_hh, gate-lane padded)
    out_ref:   (Tc, Bt, Hp)    out dtype; lane-block d of a (T, Bp, 2*Hp) output
    xproj_scr: (Tc, Bt, 4*Hp)  f32 scratch, hoisted x-projection (+bias)
    h_scr/c_scr: (Bt, Hp)      f32 scratch, recurrent state (persists over chunks)
    """
    Tc, Bt, Din = x_ref.shape
    Hp = whh_ref.shape[0]
    is_rev = pl.program_id(0) == 1

    # Zero initial state at the first time chunk of each (direction, batch-tile).
    @pl.when(pl.program_id(2) == 0)
    def _():
        h_scr[...] = jnp.zeros_like(h_scr)
        c_scr[...] = jnp.zeros_like(c_scr)

    wih = wih_ref[...]
    whh = whh_ref[...]
    bias = b_ref[...]                                   # (1, 4Hp) f32

    # Hoisted input projection for this chunk: one big MXU matmul, bias folded.
    x_all = x_ref[...].reshape(Tc * Bt, Din)
    proj = jnp.dot(x_all, wih, preferred_element_type=jnp.float32) + bias
    xproj_scr[...] = proj.reshape(Tc, Bt, 4 * Hp)

    def step(t, carry):
        # Forward walks t = 0..Tc-1 inside the chunk; reverse walks Tc-1..0
        # (and its chunks are delivered in reverse order by the index_map), so
        # hidden states are written back to their original time positions
        # (PyTorch bidirectional semantics).
        t_idx = jnp.where(is_rev, Tc - 1 - t, t)
        h_prev = h_scr[...]
        gates = xproj_scr[t_idx] + jnp.dot(
            h_prev.astype(whh.dtype), whh, preferred_element_type=jnp.float32)
        # PyTorch gate order: input, forget, cell(g), output; each gate is a
        # lane-aligned 128*k-wide slice (Hp is a multiple of 128).
        i_g = jax.nn.sigmoid(gates[:, 0 * Hp:1 * Hp])
        f_g = jax.nn.sigmoid(gates[:, 1 * Hp:2 * Hp])
        g_g = jnp.tanh(gates[:, 2 * Hp:3 * Hp])
        o_g = jax.nn.sigmoid(gates[:, 3 * Hp:4 * Hp])
        c_new = f_g * c_scr[...] + i_g * g_g
        h_new = o_g * jnp.tanh(c_new)
        c_scr[...] = c_new
        h_scr[...] = h_new
        out_ref[t_idx] = h_new.astype(out_ref.dtype)
        return carry

    # Partial unroll: enough LLO visibility to overlap MXU/EUP/VPU across
    # adjacent steps without program-size blowup at large Tc.
    unroll = True if Tc <= 8 else 8
    lax.fori_loop(0, Tc, step, 0, unroll=unroll)


def _bilstm_layer(x_tm, wih_s, whh_s, b_s, *, b_tile, t_chunk, out_dtype,
                  direction_core_parallel=False):
    """One bidirectional LSTM layer.

    x_tm:  (T, Bp, Din) matmul dtype, time-major, batch padded to b_tile mult.
    wih_s: (2, Din, 4*Hp)  per-direction, pre-transposed, gate-padded
    whh_s: (2, Hp, 4*Hp)
    b_s:   (2, 1, 4*Hp)    f32 (b_ih + b_hh), gate-padded
    returns (T, Bp, 2*Hp): forward hidden in lanes [0,Hp), reverse in [Hp,2Hp).
    """
    T, Bp, Din = x_tm.shape
    Hp = whh_s.shape[1]
    n_bt = Bp // b_tile
    n_tc = T // t_chunk

    in_bytes = jnp.dtype(x_tm.dtype).itemsize
    out_bytes = jnp.dtype(out_dtype).itemsize

    # VMEM budget derived from the actual tiles (double-buffered blocks +
    # resident scratch), capped at 56 MiB so it is valid on v5e/v6e (128 MiB)
    # and v7x (64 MiB) alike.
    est = (2 * (t_chunk * b_tile * Din * in_bytes
                + Din * 4 * Hp * in_bytes
                + Hp * 4 * Hp * in_bytes
                + 4 * Hp * 4
                + t_chunk * b_tile * Hp * out_bytes)
           + t_chunk * b_tile * 4 * Hp * 4
           + 2 * b_tile * Hp * 4)
    vmem_limit = int(min(max(2 * est, 32 * 1024 * 1024), 56 * 1024 * 1024))

    def x_map(d, bt, tc):
        # Reverse direction consumes time chunks back-to-front.
        c = (1 - d) * tc + d * (n_tc - 1 - tc)
        return (c, bt, 0)

    def out_map(d, bt, tc):
        c = (1 - d) * tc + d * (n_tc - 1 - tc)
        return (c, bt, d)          # direction d -> lane offset d*Hp

    flops = 2 * 2 * T * Bp * (Din * 4 * Hp + Hp * 4 * Hp)   # 2 dirs, MAC=2 flops
    transcendentals = 2 * 5 * T * Bp * Hp                   # 3 sigm + 2 tanh
    bytes_accessed = (T * Bp * Din * in_bytes
                      + T * Bp * 2 * Hp * out_bytes
                      + 2 * (Din * 4 * Hp + Hp * 4 * Hp) * in_bytes)

    d_sem = pltpu.CORE_PARALLEL if direction_core_parallel else "parallel"

    return pl.pallas_call(
        _bilstm_layer_kernel,
        out_shape=jax.ShapeDtypeStruct((T, Bp, 2 * Hp), out_dtype),
        grid=(2, n_bt, n_tc),
        in_specs=[
            pl.BlockSpec((t_chunk, b_tile, Din), x_map),
            pl.BlockSpec((None, Din, 4 * Hp), lambda d, bt, tc: (d, 0, 0)),
            pl.BlockSpec((None, Hp, 4 * Hp), lambda d, bt, tc: (d, 0, 0)),
            pl.BlockSpec((None, 1, 4 * Hp), lambda d, bt, tc: (d, 0, 0)),
        ],
        out_specs=pl.BlockSpec((t_chunk, b_tile, Hp), out_map),
        scratch_shapes=[
            pltpu.VMEM((t_chunk, b_tile, 4 * Hp), jnp.float32),  # x-projection
            pltpu.VMEM((b_tile, Hp), jnp.float32),               # h state
            pltpu.VMEM((b_tile, Hp), jnp.float32),               # c state
        ],
        compiler_params=pltpu.CompilerParams(
            dimension_semantics=(d_sem, "parallel", "arbitrary"),
            vmem_limit_bytes=vmem_limit,
        ),
        cost_estimate=pl.CostEstimate(
            flops=int(flops),
            transcendentals=int(transcendentals),
            bytes_accessed=int(bytes_accessed),
        ),
    )(x_tm, wih_s, whh_s, b_s)


# ----------------------------------------------------------------------------
# Parameter construction / preparation (done once, outside the forward pass).
# ----------------------------------------------------------------------------
def init_bilstm_params_raw(key, input_size, hidden_size, num_layers):
    """PyTorch-style LSTM init: uniform(-1/sqrt(H), 1/sqrt(H)), PyTorch layout."""
    k = 1.0 / math.sqrt(hidden_size)
    raw = {}
    for layer in range(num_layers):
        din = input_size if layer == 0 else 2 * hidden_size
        for d in range(2):
            key, k1, k2, k3, k4 = jax.random.split(key, 5)
            raw[(layer, d)] = (
                jax.random.uniform(k1, (4 * hidden_size, din), jnp.float32, -k, k),
                jax.random.uniform(k2, (4 * hidden_size, hidden_size), jnp.float32, -k, k),
                jax.random.uniform(k3, (4 * hidden_size,), jnp.float32, -k, k),
                jax.random.uniform(k4, (4 * hidden_size,), jnp.float32, -k, k),
            )
    return raw


def prepare_bilstm_params(raw, input_size, hidden_size, num_layers,
                          matmul_dtype=jnp.float32):
    """Pre-transpose, gate-pad to 128 lanes/gate, combine biases, stack dirs.

    For layers > 0, W_ih rows are scattered to the previous layer's padded
    (2*Hp) output layout so that layer's output is consumed directly (no
    wrapper-side slice+concat between layers).
    """
    H = hidden_size
    Hp = _round_up(H, 128)
    layers = []
    for layer in range(num_layers):
        wihs, whhs, bs = [], [], []
        for d in range(2):
            w_ih, w_hh, b_ih, b_hh = raw[(layer, d)]
            wih_t = jnp.asarray(w_ih, jnp.float32).T              # (Din_raw, 4H)
            if layer > 0:
                # Previous layer emits [fwd(0:H) | 0 | rev(0:H) | 0] of width 2Hp.
                scattered = jnp.zeros((2 * Hp, 4 * H), jnp.float32)
                scattered = scattered.at[0:H, :].set(wih_t[0:H, :])
                scattered = scattered.at[Hp:Hp + H, :].set(wih_t[H:2 * H, :])
                wih_t = scattered                                  # (2Hp, 4H)
            whh_t = jnp.asarray(w_hh, jnp.float32).T               # (H, 4H)
            whh_t = jnp.pad(whh_t, ((0, Hp - H), (0, 0)))          # (Hp, 4H)
            b = (jnp.asarray(b_ih, jnp.float32)
                 + jnp.asarray(b_hh, jnp.float32)).reshape(1, 4 * H)
            wih_g = _pad_gate_cols(wih_t, H, Hp)                   # (Din, 4Hp)
            whh_g = _pad_gate_cols(whh_t, H, Hp)                   # (Hp, 4Hp)
            b_g = _pad_gate_cols(b, H, Hp)                         # (1, 4Hp)
            if Hp > H:
                # Invariant keeping padded hidden lanes exactly zero through
                # the recurrence: padded W_hh rows and padded bias lanes are 0.
                assert bool(jnp.all(whh_g[H:, :] == 0.0))
                for g in range(4):
                    assert bool(jnp.all(b_g[:, g * Hp + H:(g + 1) * Hp] == 0.0))
            wihs.append(wih_g.astype(matmul_dtype))
            whhs.append(whh_g.astype(matmul_dtype))
            bs.append(b_g)                                         # bias stays f32
        layers.append((jnp.stack(wihs), jnp.stack(whhs), jnp.stack(bs)))
    return {"hidden_size": H, "Hp": Hp, "matmul_dtype": matmul_dtype,
            "layers": layers}


# ----------------------------------------------------------------------------
# Forward pass (equivalent of BiLSTM.forward): returns (B, T, 2*H).
# ----------------------------------------------------------------------------
def bilstm_forward(x, params, num_layers, *, b_tile_max=128, t_chunk_max=32,
                   direction_core_parallel=False):
    B, T, _ = x.shape
    H, Hp = params["hidden_size"], params["Hp"]
    mdt = params["matmul_dtype"]

    b_tile = min(_round_up(B, 8), _round_up(b_tile_max, 8))
    Bp = _round_up(B, b_tile)
    t_chunk = _largest_divisor_leq(T, max(1, t_chunk_max))

    # Time-major + batch pad (once, in JAX glue); cast to matmul dtype once.
    cur = jnp.transpose(x, (1, 0, 2)).astype(mdt)        # (T, B, Din)
    cur = jnp.pad(cur, ((0, 0), (0, Bp - B), (0, 0)))     # (T, Bp, Din)

    for layer in range(num_layers):
        wih_s, whh_s, b_s = params["layers"][layer]
        is_last = (layer == num_layers - 1)
        # Inter-layer activations stay in matmul dtype (halves HBM traffic and
        # VMEM blocks when bf16); final layer output is f32.
        out_dtype = jnp.float32 if is_last else mdt
        cur = _bilstm_layer(cur, wih_s, whh_s, b_s,
                            b_tile=b_tile, t_chunk=t_chunk, out_dtype=out_dtype,
                            direction_core_parallel=direction_core_parallel)
        # cur: (T, Bp, 2*Hp) — consumed directly by the next layer (row-padded
        # W_ih), no slice/concat pass between layers.

    # Single final pass: strip gate-lane + batch padding, back to batch-first.
    out = jnp.concatenate([cur[:, :B, :H], cur[:, :B, Hp:Hp + H]], axis=-1)
    return jnp.transpose(out, (1, 0, 2))                  # (B, T, 2H)


# ----------------------------------------------------------------------------
# Pure-JAX reference (PyTorch nn.LSTM semantics) for correctness checking.
# ----------------------------------------------------------------------------
def bilstm_reference(x, raw, hidden_size, num_layers):
    HI = jax.lax.Precision.HIGHEST
    B, T, _ = x.shape
    out = x.astype(jnp.float32)
    for layer in range(num_layers):
        dirs = []
        for d in range(2):
            w_ih, w_hh, b_ih, b_hh = raw[(layer, d)]
            b = b_ih + b_hh
            xs = out if d == 0 else jnp.flip(out, axis=1)
            h = jnp.zeros((B, hidden_size), jnp.float32)
            c = jnp.zeros((B, hidden_size), jnp.float32)
            hs = []
            for t in range(T):
                gates = (jnp.dot(xs[:, t, :], w_ih.T, precision=HI)
                         + jnp.dot(h, w_hh.T, precision=HI) + b)
                i, f, g, o = jnp.split(gates, 4, axis=-1)
                i = jax.nn.sigmoid(i); f = jax.nn.sigmoid(f)
                g = jnp.tanh(g); o = jax.nn.sigmoid(o)
                c = f * c + i * g
                h = o * jnp.tanh(c)
                hs.append(h)
            hseq = jnp.stack(hs, axis=1)
            if d == 1:
                hseq = jnp.flip(hseq, axis=1)
            dirs.append(hseq)
        out = jnp.concatenate(dirs, axis=-1)
    return out


if __name__ == "__main__":
    # Small shapes consistent with the module: batch=2, seq=8, input_size=16,
    # hidden_size=32, num_layers=2, bidirectional.
    batch, seq, input_size, hidden_size, num_layers = 2, 8, 16, 32, 2

    key = jax.random.PRNGKey(0)
    key, xkey = jax.random.split(key)
    x = jax.random.normal(xkey, (batch, seq, input_size), jnp.float32)

    raw = init_bilstm_params_raw(key, input_size, hidden_size, num_layers)
    ref = bilstm_reference(x, raw, hidden_size, num_layers)

    # --- f32 matmul path: tight tolerance vs. HIGHEST-precision reference. ---
    params_f32 = prepare_bilstm_params(raw, input_size, hidden_size, num_layers,
                                       matmul_dtype=jnp.float32)
    fwd_f32 = jax.jit(lambda inp: bilstm_forward(inp, params_f32, num_layers))
    out_f32 = jax.block_until_ready(fwd_f32(x))
    assert out_f32.shape == (batch, seq, 2 * hidden_size), out_f32.shape
    assert out_f32.dtype == jnp.float32
    err_f32 = float(jnp.max(jnp.abs(out_f32 - ref)))
    assert err_f32 < 1e-3, f"f32 max abs error vs reference: {err_f32}"

    # --- bf16 matmul-input path (recommended on v6e/v7x): accumulation and all
    #     gate math stay f32 in-kernel; bf16 error compounds through the
    #     recurrence so the tolerance is loosened. ---
    params_bf16 = prepare_bilstm_params(raw, input_size, hidden_size, num_layers,
                                        matmul_dtype=jnp.bfloat16)
    fwd_bf16 = jax.jit(lambda inp: bilstm_forward(inp, params_bf16, num_layers))
    out_bf16 = jax.block_until_ready(fwd_bf16(x))
    err_bf16 = float(jnp.max(jnp.abs(out_bf16 - ref)))
    assert err_bf16 < 1e-1, f"bf16 max abs error vs reference: {err_bf16}"

    print("KERNEL_OK")
</pallas_src>

<mosaic_0001>
module attributes {stable_mosaic.version = 11 : i64} {
  func.func @_bilstm_layer_kernel(%arg0: i32, %arg1: i32, %arg2: i32, %arg3: memref<8x8x256xf32, #tpu.memory_space<vmem>>, %arg4: memref<1x256x512xf32, #tpu.memory_space<vmem>>, %arg5: memref<1x128x512xf32, #tpu.memory_space<vmem>>, %arg6: memref<1x1x512xf32, #tpu.memory_space<vmem>>, %arg7: memref<8x8x128xf32, #tpu.memory_space<vmem>>, %arg8: memref<8x8x512xf32, #tpu.memory_space<vmem>>, %arg9: memref<8x128xf32, #tpu.memory_space<vmem>>, %arg10: memref<8x128xf32, #tpu.memory_space<vmem>>) attributes {dimension_semantics = [#tpu.dimension_semantics<parallel>, #tpu.dimension_semantics<parallel>, #tpu.dimension_semantics<arbitrary>], iteration_bounds = array<i64: 2, 1, 1>, scalar_prefetch = 0 : i64, scratch_operands = 3 : i64, tpu.core_type = #tpu.core_type<tc>, window_params = [{transform_indices = @transform_0, window_bounds = array<i64: 8, 8, 256>}, {transform_indices = @transform_1, window_bounds = array<i64: 1, 256, 512>}, {transform_indices = @transform_2, window_bounds = array<i64: 1, 128, 512>}, {transform_indices = @transform_3, window_bounds = array<i64: 1, 1, 512>}, {transform_indices = @transform_4, window_bounds = array<i64: 8, 8, 128>}]} {
    %c1_i32 = arith.constant 1 : i32
    %0 = arith.cmpi eq, %arg0, %c1_i32 : i32
    %c0_i32 = arith.constant 0 : i32
    %1 = arith.cmpi eq, %arg2, %c0_i32 : i32
    %2 = arith.extui %1 : i1 to i32
    %c0_i32_0 = arith.constant 0 : i32
    %3 = arith.cmpi ne, %2, %c0_i32_0 : i32
    scf.if %3 {
      %cst_153 = arith.constant 0.000000e+00 : f32
      %337 = vector.broadcast %cst_153 : f32 to vector<8x128xf32>
      %c0_154 = arith.constant 0 : index
      %c0_155 = arith.constant 0 : index
      %338 = vector.load %arg9[%c0_154, %c0_155] : memref<8x128xf32, #tpu.memory_space<vmem>>, vector<8x128xf32>
      tpu.vector_store %arg9[%c0_154, %c0_155], %337 {strides = array<i32>} : memref<8x128xf32, #tpu.memory_space<vmem>>, vector<8x128xf32>,
      %cst_156 = arith.constant 0.000000e+00 : f32
      %339 = vector.broadcast %cst_156 : f32 to vector<8x128xf32>
      %c0_157 = arith.constant 0 : index
      %c0_158 = arith.constant 0 : index
      %340 = vector.load %arg10[%c0_157, %c0_158] : memref<8x128xf32, #tpu.memory_space<vmem>>, vector<8x128xf32>
      tpu.vector_store %arg10[%c0_157, %c0_158], %339 {strides = array<i32>} : memref<8x128xf32, #tpu.memory_space<vmem>>, vector<8x128xf32>,
    } else {
    }
    %c0 = arith.constant 0 : index
    %c0_1 = arith.constant 0 : index
    %c0_2 = arith.constant 0 : index
    %4 = vector.load %arg4[%c0, %c0_1, %c0_2] : memref<1x256x512xf32, #tpu.memory_space<vmem>>, vector<1x256x512xf32>
    %5 = vector.shape_cast %4 : vector<1x256x512xf32> to vector<256x512xf32>
    %c0_3 = arith.constant 0 : index
    %c0_4 = arith.constant 0 : index
    %c0_5 = arith.constant 0 : index
    %6 = vector.load %arg5[%c0_3, %c0_4, %c0_5] : memref<1x128x512xf32, #tpu.memory_space<vmem>>, vector<1x128x512xf32>
    %7 = vector.shape_cast %6 : vector<1x128x512xf32> to vector<128x512xf32>
    %c0_6 = arith.constant 0 : index
    %c0_7 = arith.constant 0 : index
    %c0_8 = arith.constant 0 : index
    %8 = vector.load %arg6[%c0_6, %c0_7, %c0_8] : memref<1x1x512xf32, #tpu.memory_space<vmem>>, vector<1x1x512xf32>
    %9 = vector.shape_cast %8 : vector<1x1x512xf32> to vector<1x512xf32>
    %c0_9 = arith.constant 0 : index
    %c0_10 = arith.constant 0 : index
    %c0_11 = arith.constant 0 : index
    %10 = vector.load %arg3[%c0_9, %c0_10, %c0_11] : memref<8x8x256xf32, #tpu.memory_space<vmem>>, vector<8x8x256xf32>
    %11 = vector.shape_cast %10 : vector<8x8x256xf32> to vector<64x256xf32>
    %cst = arith.constant dense<0.000000e+00> : vector<64x512xf32>
    %12 = tpu.matmul %11, %5, %cst {dimension_numbers = #tpu.dot_dimension_numbers<[1], [0], [0], [1], [0, 0, 1, 1], [], []>} : vector<64x256xf32>, vector<256x512xf32>, vector<64x512xf32> -> vector<64x512xf32>
    %13 = vector.broadcast %9 : vector<1x512xf32> to vector<64x512xf32>
    %14 = arith.addf %12, %13 : vector<64x512xf32>
    %15 = vector.shape_cast %14 : vector<64x512xf32> to vector<8x8x512xf32>
    %c0_12 = arith.constant 0 : index
    %c0_13 = arith.constant 0 : index
    %c0_14 = arith.constant 0 : index
    %16 = vector.load %arg8[%c0_12, %c0_13, %c0_14] : memref<8x8x512xf32, #tpu.memory_space<vmem>>, vector<8x8x512xf32>
    tpu.vector_store %arg8[%c0_12, %c0_13, %c0_14], %15 {strides = array<i32>} : memref<8x8x512xf32, #tpu.memory_space<vmem>>, vector<8x8x512xf32>,
    %c0_i32_15 = arith.constant 0 : i32
    %c7_i32 = arith.constant 7 : i32
    %17 = arith.subi %c7_i32, %c0_i32_15 : i32
    %18 = arith.select %0, %17, %c0_i32_15 : i32
    %c0_16 = arith.constant 0 : index
    %c0_17 = arith.constant 0 : index
    %19 = vector.load %arg9[%c0_16, %c0_17] : memref<8x128xf32, #tpu.memory_space<vmem>>, vector<8x128xf32>
    %20 = arith.index_cast %18 : i32 to index
    %c0_18 = arith.constant 0 : index
    %c0_19 = arith.constant 0 : index
    %21 = vector.load %arg8[%20, %c0_18, %c0_19] : memref<8x8x512xf32, #tpu.memory_space<vmem>>, vector<1x8x512xf32>
    %22 = vector.shape_cast %21 : vector<1x8x512xf32> to vector<8x512xf32>
    %cst_20 = arith.constant dense<0.000000e+00> : vector<8x512xf32>
    %23 = tpu.matmul %19, %7, %cst_20 {dimension_numbers = #tpu.dot_dimension_numbers<[1], [0], [0], [1], [0, 0, 1, 1], [], []>} : vector<8x128xf32>, vector<128x512xf32>, vector<8x512xf32> -> vector<8x512xf32>
    %24 = arith.addf %22, %23 : vector<8x512xf32>
    %25 = vector.extract_strided_slice %24 {offsets = [0, 0], sizes = [8, 128], strides = [1, 1]} : vector<8x512xf32> to vector<8x128xf32>
    %26 = arith.negf %25 : vector<8x128xf32>
    %27 = math.exp %26 : vector<8x128xf32>
    %cst_21 = arith.constant 1.000000e+00 : f32
    %28 = vector.broadcast %cst_21 : f32 to vector<8x128xf32>
    %29 = arith.addf %28, %27 : vector<8x128xf32>
    %30 = arith.divf %28, %29 : vector<8x128xf32>
    %31 = vector.extract_strided_slice %24 {offsets = [0, 128], sizes = [8, 128], strides = [1, 1]} : vector<8x512xf32> to vector<8x128xf32>
    %32 = arith.negf %31 : vector<8x128xf32>
    %33 = math.exp %32 : vector<8x128xf32>
    %cst_22 = arith.constant 1.000000e+00 : f32
    %34 = vector.broadcast %cst_22 : f32 to vector<8x128xf32>
    %35 = arith.addf %34, %33 : vector<8x128xf32>
    %36 = arith.divf %34, %35 : vector<8x128xf32>
    %37 = vector.extract_strided_slice %24 {offsets = [0, 256], sizes = [8, 128], strides = [1, 1]} : vector<8x512xf32> to vector<8x128xf32>
    %38 = math.tanh %37 : vector<8x128xf32>
    %39 = vector.extract_strided_slice %24 {offsets = [0, 384], sizes = [8, 128], strides = [1, 1]} : vector<8x512xf32> to vector<8x128xf32>
    %40 = arith.negf %39 : vector<8x128xf32>
    %41 = math.exp %40 : vector<8x128xf32>
    %cst_23 = arith.constant 1.000000e+00 : f32
    %42 = vector.broadcast %cst_23 : f32 to vector<8x128xf32>
    %43 = arith.addf %42, %41 : vector<8x128xf32>
    %44 = arith.divf %42, %43 : vector<8x128xf32>
    %c0_24 = arith.constant 0 : index
    %c0_25 = arith.constant 0 : index
    %45 = vector.load %arg10[%c0_24, %c0_25] : memref<8x128xf32, #tpu.memory_space<vmem>>, vector<8x128xf32>
    %46 = arith.mulf %36, %45 : vector<8x128xf32>
    %47 = arith.mulf %30, %38 : vector<8x128xf32>
    %48 = arith.addf %46, %47 : vector<8x128xf32>
    %49 = math.tanh %48 : vector<8x128xf32>
    %50 = arith.mulf %44, %49 : vector<8x128xf32>
    %c0_26 = arith.constant 0 : index
    %c0_27 = arith.constant 0 : index
    %51 = vector.load %arg10[%c0_26, %c0_27] : memref<8x128xf32, #tpu.memory_space<vmem>>, vector<8x128xf32>
    tpu.vector_store %arg10[%c0_26, %c0_27], %48 {strides = array<i32>} : memref<8x128xf32, #tpu.memory_space<vmem>>, vector<8x128xf32>,
    %c0_28 = arith.constant 0 : index
    %c0_29 = arith.constant 0 : index
    %52 = vector.load %arg9[%c0_28, %c0_29] : memref<8x128xf32, #tpu.memory_space<vmem>>, vector<8x128xf32>
    tpu.vector_store %arg9[%c0_28, %c0_29], %50 {strides = array<i32>} : memref<8x128xf32, #tpu.memory_space<vmem>>, vector<8x128xf32>,
    %53 = arith.index_cast %18 : i32 to index
    %c0_30 = arith.constant 0 : index
    %c0_31 = arith.constant 0 : index
    %54 = vector.load %arg7[%53, %c0_30, %c0_31] : memref<8x8x128xf32, #tpu.memory_space<vmem>>, vector<1x8x128xf32>
    %55 = vector.shape_cast %54 : vector<1x8x128xf32> to vector<8x128xf32>
    %56 = vector.shape_cast %50 : vector<8x128xf32> to vector<1x8x128xf32>
    tpu.vector_store %arg7[%53, %c0_30, %c0_31], %56 {strides = array<i32>} : memref<8x8x128xf32, #tpu.memory_space<vmem>>, vector<1x8x128xf32>,
    %c1_i32_32 = arith.constant 1 : i32
    %c7_i32_33 = arith.constant 7 : i32
    %57 = arith.subi %c7_i32_33, %c1_i32_32 : i32
    %58 = arith.select %0, %57, %c1_i32_32 : i32
    %c0_34 = arith.constant 0 : index
    %c0_35 = arith.constant 0 : index
    %59 = vector.load %arg9[%c0_34, %c0_35] : memref<8x128xf32, #tpu.memory_space<vmem>>, vector<8x128xf32>
    %60 = arith.index_cast %58 : i32 to index
    %c0_36 = arith.constant 0 : index
    %c0_37 = arith.constant 0 : index
    %61 = vector.load %arg8[%60, %c0_36, %c0_37] : memref<8x8x512xf32, #tpu.memory_space<vmem>>, vector<1x8x512xf32>
    %62 = vector.shape_cast %61 : vector<1x8x512xf32> to vector<8x512xf32>
    %cst_38 = arith.constant dense<0.000000e+00> : vector<8x512xf32>
    %63 = tpu.matmul %59, %7, %cst_38 {dimension_numbers = #tpu.dot_dimension_numbers<[1], [0], [0], [1], [0, 0, 1, 1], [], []>} : vector<8x128xf32>, vector<128x512xf32>, vector<8x512xf32> -> vector<8x512xf32>
    %64 = arith.addf %62, %63 : vector<8x512xf32>
    %65 = vector.extract_strided_slice %64 {offsets = [0, 0], sizes = [8, 128], strides = [1, 1]} : vector<8x512xf32> to vector<8x128xf32>
    %66 = arith.negf %65 : vector<8x128xf32>
    %67 = math.exp %66 : vector<8x128xf32>
    %cst_39 = arith.constant 1.000000e+00 : f32
    %68 = vector.broadcast %cst_39 : f32 to vector<8x128xf32>
    %69 = arith.addf %68, %67 : vector<8x128xf32>
    %70 = arith.divf %68, %69 : vector<8x128xf32>
    %71 = vector.extract_strided_slice %64 {offsets = [0, 128], sizes = [8, 128], strides = [1, 1]} : vector<8x512xf32> to vector<8x128xf32>
    %72 = arith.negf %71 : vector<8x128xf32>
    %73 = math.exp %72 : vector<8x128xf32>
    %cst_40 = arith.constant 1.000000e+00 : f32
    %74 = vector.broadcast %cst_40 : f32 to vector<8x128xf32>
    %75 = arith.addf %74, %73 : vector<8x128xf32>
    %76 = arith.divf %74, %75 : vector<8x128xf32>
    %77 = vector.extract_strided_slice %64 {offsets = [0, 256], sizes = [8, 128], strides = [1, 1]} : vector<8x512xf32> to vector<8x128xf32>
    %78 = math.tanh %77 : vector<8x128xf32>
    %79 = vector.extract_strided_slice %64 {offsets = [0, 384], sizes = [8, 128], strides = [1, 1]} : vector<8x512xf32> to vector<8x128xf32>
    %80 = arith.negf %79 : vector<8x128xf32>
    %81 = math.exp %80 : vector<8x128xf32>
    %cst_41 = arith.constant 1.000000e+00 : f32
    %82 = vector.broadcast %cst_41 : f32 to vector<8x128xf32>
    %83 = arith.addf %82, %81 : vector<8x128xf32>
    %84 = arith.divf %82, %83 : vector<8x128xf32>
    %c0_42 = arith.constant 0 : index
    %c0_43 = arith.constant 0 : index
    %85 = vector.load %arg10[%c0_42, %c0_43] : memref<8x128xf32, #tpu.memory_space<vmem>>, vector<8x128xf32>
    %86 = arith.mulf %76, %85 : vector<8x128xf32>
    %87 = arith.mulf %70, %78 : vector<8x128xf32>
    %88 = arith.addf %86, %87 : vector<8x128xf32>
    %89 = math.tanh %88 : vector<8x128xf32>
    %90 = arith.mulf %84, %89 : vector<8x128xf32>
    %c0_44 = arith.constant 0 : index
    %c0_45 = arith.constant 0 : index
    %91 = vector.load %arg10[%c0_44, %c0_45] : memref<8x128xf32, #tpu.memory_space<vmem>>, vector<8x128xf32>
    tpu.vector_store %arg10[%c0_44, %c0_45], %88 {strides = array<i32>} : memref<8x128xf32, #tpu.memory_space<vmem>>, vector<8x128xf32>,
    %c0_46 = arith.constant 0 : index
    %c0_47 = arith.constant 0 : index
    %92 = vector.load %arg9[%c0_46, %c0_47] : memref<8x128xf32, #tpu.memory_space<vmem>>, vector<8x128xf32>
    tpu.vector_store %arg9[%c0_46, %c0_47], %90 {strides = array<i32>} : memref<8x128xf32, #tpu.memory_space<vmem>>, vector<8x128xf32>,
    %93 = arith.index_cast %58 : i32 to index
    %c0_48 = arith.constant 0 : index
    %c0_49 = arith.constant 0 : index
    %94 = vector.load %arg7[%93, %c0_48, %c0_49] : memref<8x8x128xf32, #tpu.memory_space<vmem>>, vector<1x8x128xf32>
    %95 = vector.shape_cast %94 : vector<1x8x128xf32> to vector<8x128xf32>
    %96 = vector.shape_cast %90 : vector<8x128xf32> to vector<1x8x128xf32>
    tpu.vector_store %arg7[%93, %c0_48, %c0_49], %96 {strides = array<i32>} : memref<8x8x128xf32, #tpu.memory_space<vmem>>, vector<1x8x128xf32>,
    %c2_i32 = arith.constant 2 : i32
    %c7_i32_50 = arith.constant 7 : i32
    %97 = arith.subi %c7_i32_50, %c2_i32 : i32
    %98 = arith.select %0, %97, %c2_i32 : i32
    %c0_51 = arith.constant 0 : index
    %c0_52 = arith.constant 0 : index
    %99 = vector.load %arg9[%c0_51, %c0_52] : memref<8x128xf32, #tpu.memory_space<vmem>>, vector<8x128xf32>
    %100 = arith.index_cast %98 : i32 to index
    %c0_53 = arith.constant 0 : index
    %c0_54 = arith.constant 0 : index
    %101 = vector.load %arg8[%100, %c0_53, %c0_54] : memref<8x8x512xf32, #tpu.memory_space<vmem>>, vector<1x8x512xf32>
    %102 = vector.shape_cast %101 : vector<1x8x512xf32> to vector<8x512xf32>
    %cst_55 = arith.constant dense<0.000000e+00> : vector<8x512xf32>
    %103 = tpu.matmul %99, %7, %cst_55 {dimension_numbers = #tpu.dot_dimension_numbers<[1], [0], [0], [1], [0, 0, 1, 1], [], []>} : vector<8x128xf32>, vector<128x512xf32>, vector<8x512xf32> -> vector<8x512xf32>
    %104 = arith.addf %102, %103 : vector<8x512xf32>
    %105 = vector.extract_strided_slice %104 {offsets = [0, 0], sizes = [8, 128], strides = [1, 1]} : vector<8x512xf32> to vector<8x128xf32>
    %106 = arith.negf %105 : vector<8x128xf32>
    %107 = math.exp %106 : vector<8x128xf32>
    %cst_56 = arith.constant 1.000000e+00 : f32
    %108 = vector.broadcast %cst_56 : f32 to vector<8x128xf32>
    %109 = arith.addf %108, %107 : vector<8x128xf32>
    %110 = arith.divf %108, %109 : vector<8x128xf32>
    %111 = vector.extract_strided_slice %104 {offsets = [0, 128], sizes = [8, 128], strides = [1, 1]} : vector<8x512xf32> to vector<8x128xf32>
    %112 = arith.negf %111 : vector<8x128xf32>
    %113 = math.exp %112 : vector<8x128xf32>
    %cst_57 = arith.constant 1.000000e+00 : f32
    %114 = vector.broadcast %cst_57 : f32 to vector<8x128xf32>
    %115 = arith.addf %114, %113 : vector<8x128xf32>
    %116 = arith.divf %114, %115 : vector<8x128xf32>
    %117 = vector.extract_strided_slice %104 {offsets = [0, 256], sizes = [8, 128], strides = [1, 1]} : vector<8x512xf32> to vector<8x128xf32>
    %118 = math.tanh %117 : vector<8x128xf32>
    %119 = vector.extract_strided_slice %104 {offsets = [0, 384], sizes = [8, 128], strides = [1, 1]} : vector<8x512xf32> to vector<8x128xf32>
    %120 = arith.negf %119 : vector<8x128xf32>
    %121 = math.exp %120 : vector<8x128xf32>
    %cst_58 = arith.constant 1.000000e+00 : f32
    %122 = vector.broadcast %cst_58 : f32 to vector<8x128xf32>
    %123 = arith.addf %122, %121 : vector<8x128xf32>
    %124 = arith.divf %122, %123 : vector<8x128xf32>
    %c0_59 = arith.constant 0 : index
    %c0_60 = arith.constant 0 : index
    %125 = vector.load %arg10[%c0_59, %c0_60] : memref<8x128xf32, #tpu.memory_space<vmem>>, vector<8x128xf32>
    %126 = arith.mulf %116, %125 : vector<8x128xf32>
    %127 = arith.mulf %110, %118 : vector<8x128xf32>
    %128 = arith.addf %126, %127 : vector<8x128xf32>
    %129 = math.tanh %128 : vector<8x128xf32>
    %130 = arith.mulf %124, %129 : vector<8x128xf32>
    %c0_61 = arith.constant 0 : index
    %c0_62 = arith.constant 0 : index
    %131 = vector.load %arg10[%c0_61, %c0_62] : memref<8x128xf32, #tpu.memory_space<vmem>>, vector<8x128xf32>
    tpu.vector_store %arg10[%c0_61, %c0_62], %128 {strides = array<i32>} : memref<8x128xf32, #tpu.memory_space<vmem>>, vector<8x128xf32>,
    %c0_63 = arith.constant 0 : index
    %c0_64 = arith.constant 0 : index
    %132 = vector.load %arg9[%c0_63, %c0_64] : memref<8x128xf32, #tpu.memory_space<vmem>>, vector<8x128xf32>
    tpu.vector_store %arg9[%c0_63, %c0_64], %130 {strides = array<i32>} : memref<8x128xf32, #tpu.memory_space<vmem>>, vector<8x128xf32>,
    %133 = arith.index_cast %98 : i32 to index
    %c0_65 = arith.constant 0 : index
    %c0_66 = arith.constant 0 : index
    %134 = vector.load %arg7[%133, %c0_65, %c0_66] : memref<8x8x128xf32, #tpu.memory_space<vmem>>, vector<1x8x128xf32>
    %135 = vector.shape_cast %134 : vector<1x8x128xf32> to vector<8x128xf32>
    %136 = vector.shape_cast %130 : vector<8x128xf32> to vector<1x8x128xf32>
    tpu.vector_store %arg7[%133, %c0_65, %c0_66], %136 {strides = array<i32>} : memref<8x8x128xf32, #tpu.memory_space<vmem>>, vector<1x8x128xf32>,
    %c3_i32 = arith.constant 3 : i32
    %c7_i32_67 = arith.constant 7 : i32
    %137 = arith.subi %c7_i32_67, %c3_i32 : i32
    %138 = arith.select %0, %137, %c3_i32 : i32
    %c0_68 = arith.constant 0 : index
    %c0_69 = arith.constant 0 : index
    %139 = vector.load %arg9[%c0_68, %c0_69] : memref<8x128xf32, #tpu.memory_space<vmem>>, vector<8x128xf32>
    %140 = arith.index_cast %138 : i32 to index
    %c0_70 = arith.constant 0 : index
    %c0_71 = arith.constant 0 : index
    %141 = vector.load %arg8[%140, %c0_70, %c0_71] : memref<8x8x512xf32, #tpu.memory_space<vmem>>, vector<1x8x512xf32>
    %142 = vector.shape_cast %141 : vector<1x8x512xf32> to vector<8x512xf32>
    %cst_72 = arith.constant dense<0.000000e+00> : vector<8x512xf32>
    %143 = tpu.matmul %139, %7, %cst_72 {dimension_numbers = #tpu.dot_dimension_numbers<[1], [0], [0], [1], [0, 0, 1, 1], [], []>} : vector<8x128xf32>, vector<128x512xf32>, vector<8x512xf32> -> vector<8x512xf32>
    %144 = arith.addf %142, %143 : vector<8x512xf32>
    %145 = vector.extract_strided_slice %144 {offsets = [0, 0], sizes = [8, 128], strides = [1, 1]} : vector<8x512xf32> to vector<8x128xf32>
    %146 = arith.negf %145 : vector<8x128xf32>
    %147 = math.exp %146 : vector<8x128xf32>
    %cst_73 = arith.constant 1.000000e+00 : f32
    %148 = vector.broadcast %cst_73 : f32 to vector<8x128xf32>
    %149 = arith.addf %148, %147 : vector<8x128xf32>
    %150 = arith.divf %148, %149 : vector<8x128xf32>
    %151 = vector.extract_strided_slice %144 {offsets = [0, 128], sizes = [8, 128], strides = [1, 1]} : vector<8x512xf32> to vector<8x128xf32>
    %152 = arith.negf %151 : vector<8x128xf32>
    %153 = math.exp %152 : vector<8x128xf32>
    %cst_74 = arith.constant 1.000000e+00 : f32
    %154 = vector.broadcast %cst_74 : f32 to vector<8x128xf32>
    %155 = arith.addf %154, %153 : vector<8x128xf32>
    %156 = arith.divf %154, %155 : vector<8x128xf32>
    %157 = vector.extract_strided_slice %144 {offsets = [0, 256], sizes = [8, 128], strides = [1, 1]} : vector<8x512xf32> to vector<8x128xf32>
    %158 = math.tanh %157 : vector<8x128xf32>
    %159 = vector.extract_strided_slice %144 {offsets = [0, 384], sizes = [8, 128], strides = [1, 1]} : vector<8x512xf32> to vector<8x128xf32>
    %160 = arith.negf %159 : vector<8x128xf32>
    %161 = math.exp %160 : vector<8x128xf32>
    %cst_75 = arith.constant 1.000000e+00 : f32
    %162 = vector.broadcast %cst_75 : f32 to vector<8x128xf32>
    %163 = arith.addf %162, %161 : vector<8x128xf32>
    %164 = arith.divf %162, %163 : vector<8x128xf32>
    %c0_76 = arith.constant 0 : index
    %c0_77 = arith.constant 0 : index
    %165 = vector.load %arg10[%c0_76, %c0_77] : memref<8x128xf32, #tpu.memory_space<vmem>>, vector<8x128xf32>
    %166 = arith.mulf %156, %165 : vector<8x128xf32>
    %167 = arith.mulf %150, %158 : vector<8x128xf32>
    %168 = arith.addf %166, %167 : vector<8x128xf32>
    %169 = math.tanh %168 : vector<8x128xf32>
    %170 = arith.mulf %164, %169 : vector<8x128xf32>
    %c0_78 = arith.constant 0 : index
    %c0_79 = arith.constant 0 : index
    %171 = vector.load %arg10[%c0_78, %c0_79] : memref<8x128xf32, #tpu.memory_space<vmem>>, vector<8x128xf32>
    tpu.vector_store %arg10[%c0_78, %c0_79], %168 {strides = array<i32>} : memref<8x128xf32, #tpu.memory_space<vmem>>, vector<8x128xf32>,
    %c0_80 = arith.constant 0 : index
    %c0_81 = arith.constant 0 : index
    %172 = vector.load %arg9[%c0_80, %c0_81] : memref<8x128xf32, #tpu.memory_space<vmem>>, vector<8x128xf32>
    tpu.vector_store %arg9[%c0_80, %c0_81], %170 {strides = array<i32>} : memref<8x128xf32, #tpu.memory_space<vmem>>, vector<8x128xf32>,
    %173 = arith.index_cast %138 : i32 to index
    %c0_82 = arith.constant 0 : index
    %c0_83 = arith.constant 0 : index
    %174 = vector.load %arg7[%173, %c0_82, %c0_83] : memref<8x8x128xf32, #tpu.memory_space<vmem>>, vector<1x8x128xf32>
    %175 = vector.shape_cast %174 : vector<1x8x128xf32> to vector<8x128xf32>
    %176 = vector.shape_cast %170 : vector<8x128xf32> to vector<1x8x128xf32>
    tpu.vector_store %arg7[%173, %c0_82, %c0_83], %176 {strides = array<i32>} : memref<8x8x128xf32, #tpu.memory_space<vmem>>, vector<1x8x128xf32>,
    %c4_i32 = arith.constant 4 : i32
    %c7_i32_84 = arith.constant 7 : i32
    %177 = arith.subi %c7_i32_84, %c4_i32 : i32
    %178 = arith.select %0, %177, %c4_i32 : i32
    %c0_85 = arith.constant 0 : index
    %c0_86 = arith.constant 0 : index
    %179 = vector.load %arg9[%c0_85, %c0_86] : memref<8x128xf32, #tpu.memory_space<vmem>>, vector<8x128xf32>
    %180 = arith.index_cast %178 : i32 to index
    %c0_87 = arith.constant 0 : index
    %c0_88 = arith.constant 0 : index
    %181 = vector.load %arg8[%180, %c0_87, %c0_88] : memref<8x8x512xf32, #tpu.memory_space<vmem>>, vector<1x8x512xf32>
    %182 = vector.shape_cast %181 : vector<1x8x512xf32> to vector<8x512xf32>
    %cst_89 = arith.constant dense<0.000000e+00> : vector<8x512xf32>
    %183 = tpu.matmul %179, %7, %cst_89 {dimension_numbers = #tpu.dot_dimension_numbers<[1], [0], [0], [1], [0, 0, 1, 1], [], []>} : vector<8x128xf32>, vector<128x512xf32>, vector<8x512xf32> -> vector<8x512xf32>
    %184 = arith.addf %182, %183 : vector<8x512xf32>
    %185 = vector.extract_strided_slice %184 {offsets = [0, 0], sizes = [8, 128], strides = [1, 1]} : vector<8x512xf32> to vector<8x128xf32>
    %186 = arith.negf %185 : vector<8x128xf32>
    %187 = math.exp %186 : vector<8x128xf32>
    %cst_90 = arith.constant 1.000000e+00 : f32
    %188 = vector.broadcast %cst_90 : f32 to vector<8x128xf32>
    %189 = arith.addf %188, %187 : vector<8x128xf32>
    %190 = arith.divf %188, %189 : vector<8x128xf32>
    %191 = vector.extract_strided_slice %184 {offsets = [0, 128], sizes = [8, 128], strides = [1, 1]} : vector<8x512xf32> to vector<8x128xf32>
    %192 = arith.negf %191 : vector<8x128xf32>
    %193 = math.exp %192 : vector<8x128xf32>
    %cst_91 = arith.constant 1.000000e+00 : f32
    %194 = vector.broadcast %cst_91 : f32 to vector<8x128xf32>
    %195 = arith.addf %194, %193 : vector<8x128xf32>
    %196 = arith.divf %194, %195 : vector<8x128xf32>
    %197 = vector.extract_strided_slice %184 {offsets = [0, 256], sizes = [8, 128], strides = [1, 1]} : vector<8x512xf32> to vector<8x128xf32>
    %198 = math.tanh %197 : vector<8x128xf32>
    %199 = vector.extract_strided_slice %184 {offsets = [0, 384], sizes = [8, 128], strides = [1, 1]} : vector<8x512xf32> to vector<8x128xf32>
    %200 = arith.negf %199 : vector<8x128xf32>
    %201 = math.exp %200 : vector<8x128xf32>
    %cst_92 = arith.constant 1.000000e+00 : f32
    %202 = vector.broadcast %cst_92 : f32 to vector<8x128xf32>
    %203 = arith.addf %202, %201 : vector<8x128xf32>
    %204 = arith.divf %202, %203 : vector<8x128xf32>
    %c0_93 = arith.constant 0 : index
    %c0_94 = arith.constant 0 : index
    %205 = vector.load %arg10[%c0_93, %c0_94] : memref<8x128xf32, #tpu.memory_space<vmem>>, vector<8x128xf32>
    %206 = arith.mulf %196, %205 : vector<8x128xf32>
    %207 = arith.mulf %190, %198 : vector<8x128xf32>
    %208 = arith.addf %206, %207 : vector<8x128xf32>
    %209 = math.tanh %208 : vector<8x128xf32>
    %210 = arith.mulf %204, %209 : vector<8x128xf32>
    %c0_95 = arith.constant 0 : index
    %c0_96 = arith.constant 0 : index
    %211 = vector.load %arg10[%c0_95, %c0_96] : memref<8x128xf32, #tpu.memory_space<vmem>>, vector<8x128xf32>
    tpu.vector_store %arg10[%c0_95, %c0_96], %208 {strides = array<i32>} : memref<8x128xf32, #tpu.memory_space<vmem>>, vector<8x128xf32>,
    %c0_97 = arith.constant 0 : index
    %c0_98 = arith.constant 0 : index
    %212 = vector.load %arg9[%c0_97, %c0_98] : memref<8x128xf32, #tpu.memory_space<vmem>>, vector<8x128xf32>
    tpu.vector_store %arg9[%c0_97, %c0_98], %210 {strides = array<i32>} : memref<8x128xf32, #tpu.memory_space<vmem>>, vector<8x128xf32>,
    %213 = arith.index_cast %178 : i32 to index
    %c0_99 = arith.constant 0 : index
    %c0_100 = arith.constant 0 : index
    %214 = vector.load %arg7[%213, %c0_99, %c0_100] : memref<8x8x128xf32, #tpu.memory_space<vmem>>, vector<1x8x128xf32>
    %215 = vector.shape_cast %214 : vector<1x8x128xf32> to vector<8x128xf32>
    %216 = vector.shape_cast %210 : vector<8x128xf32> to vector<1x8x128xf32>
    tpu.vector_store %arg7[%213, %c0_99, %c0_100], %216 {strides = array<i32>} : memref<8x8x128xf32, #tpu.memory_space<vmem>>, vector<1x8x128xf32>,
    %c5_i32 = arith.constant 5 : i32
    %c7_i32_101 = arith.constant 7 : i32
    %217 = arith.subi %c7_i32_101, %c5_i32 : i32
    %218 = arith.select %0, %217, %c5_i32 : i32
    %c0_102 = arith.constant 0 : index
    %c0_103 = arith.constant 0 : index
    %219 = vector.load %arg9[%c0_102, %c0_103] : memref<8x128xf32, #tpu.memory_space<vmem>>, vector<8x128xf32>
    %220 = arith.index_cast %218 : i32 to index
    %c0_104 = arith.constant 0 : index
    %c0_105 = arith.constant 0 : index
    %221 = vector.load %arg8[%220, %c0_104, %c0_105] : memref<8x8x512xf32, #tpu.memory_space<vmem>>, vector<1x8x512xf32>
    %222 = vector.shape_cast %221 : vector<1x8x512xf32> to vector<8x512xf32>
    %cst_106 = arith.constant dense<0.000000e+00> : vector<8x512xf32>
    %223 = tpu.matmul %219, %7, %cst_106 {dimension_numbers = #tpu.dot_dimension_numbers<[1], [0], [0], [1], [0, 0, 1, 1], [], []>} : vector<8x128xf32>, vector<128x512xf32>, vector<8x512xf32> -> vector<8x512xf32>
    %224 = arith.addf %222, %223 : vector<8x512xf32>
    %225 = vector.extract_strided_slice %224 {offsets = [0, 0], sizes = [8, 128], strides = [1, 1]} : vector<8x512xf32> to vector<8x128xf32>
    %226 = arith.negf %225 : vector<8x128xf32>
    %227 = math.exp %226 : vector<8x128xf32>
    %cst_107 = arith.constant 1.000000e+00 : f32
    %228 = vector.broadcast %cst_107 : f32 to vector<8x128xf32>
    %229 = arith.addf %228, %227 : vector<8x128xf32>
    %230 = arith.divf %228, %229 : vector<8x128xf32>
    %231 = vector.extract_strided_slice %224 {offsets = [0, 128], sizes = [8, 128], strides = [1, 1]} : vector<8x512xf32> to vector<8x128xf32>
    %232 = arith.negf %231 : vector<8x128xf32>
    %233 = math.exp %232 : vector<8x128xf32>
    %cst_108 = arith.constant 1.000000e+00 : f32
    %234 = vector.broadcast %cst_108 : f32 to vector<8x128xf32>
    %235 = arith.addf %234, %233 : vector<8x128xf32>
    %236 = arith.divf %234, %235 : vector<8x128xf32>
    %237 = vector.extract_strided_slice %224 {offsets = [0, 256], sizes = [8, 128], strides = [1, 1]} : vector<8x512xf32> to vector<8x128xf32>
    %238 = math.tanh %237 : vector<8x128xf32>
    %239 = vector.extract_strided_slice %224 {offsets = [0, 384], sizes = [8, 128], strides = [1, 1]} : vector<8x512xf32> to vector<8x128xf32>
    %240 = arith.negf %239 : vector<8x128xf32>
    %241 = math.exp %240 : vector<8x128xf32>
    %cst_109 = arith.constant 1.000000e+00 : f32
    %242 = vector.broadcast %cst_109 : f32 to vector<8x128xf32>
    %243 = arith.addf %242, %241 : vector<8x128xf32>
    %244 = arith.divf %242, %243 : vector<8x128xf32>
    %c0_110 = arith.constant 0 : index
    %c0_111 = arith.constant 0 : index
    %245 = vector.load %arg10[%c0_110, %c0_111] : memref<8x128xf32, #tpu.memory_space<vmem>>, vector<8x128xf32>
    %246 = arith.mulf %236, %245 : vector<8x128xf32>
    %247 = arith.mulf %230, %238 : vector<8x128xf32>
    %248 = arith.addf %246, %247 : vector<8x128xf32>
    %249 = math.tanh %248 : vector<8x128xf32>
    %250 = arith.mulf %244, %249 : vector<8x128xf32>
    %c0_112 = arith.constant 0 : index
    %c0_113 = arith.constant 0 : index
    %251 = vector.load %arg10[%c0_112, %c0_113] : memref<8x128xf32, #tpu.memory_space<vmem>>, vector<8x128xf32>
    tpu.vector_store %arg10[%c0_112, %c0_113], %248 {strides = array<i32>} : memref<8x128xf32, #tpu.memory_space<vmem>>, vector<8x128xf32>,
    %c0_114 = arith.constant 0 : index
    %c0_115 = arith.constant 0 : index
    %252 = vector.load %arg9[%c0_114, %c0_115] : memref<8x128xf32, #tpu.memory_space<vmem>>, vector<8x128xf32>
    tpu.vector_store %arg9[%c0_114, %c0_115], %250 {strides = array<i32>} : memref<8x128xf32, #tpu.memory_space<vmem>>, vector<8x128xf32>,
    %253 = arith.index_cast %218 : i32 to index
    %c0_116 = arith.constant 0 : index
    %c0_117 = arith.constant 0 : index
    %254 = vector.load %arg7[%253, %c0_116, %c0_117] : memref<8x8x128xf32, #tpu.memory_space<vmem>>, vector<1x8x128xf32>
    %255 = vector.shape_cast %254 : vector<1x8x128xf32> to vector<8x128xf32>
    %256 = vector.shape_cast %250 : vector<8x128xf32> to vector<1x8x128xf32>
    tpu.vector_store %arg7[%253, %c0_116, %c0_117], %256 {strides = array<i32>} : memref<8x8x128xf32, #tpu.memory_space<vmem>>, vector<1x8x128xf32>,
    %c6_i32 = arith.constant 6 : i32
    %c7_i32_118 = arith.constant 7 : i32
    %257 = arith.subi %c7_i32_118, %c6_i32 : i32
    %258 = arith.select %0, %257, %c6_i32 : i32
    %c0_119 = arith.constant 0 : index
    %c0_120 = arith.constant 0 : index
    %259 = vector.load %arg9[%c0_119, %c0_120] : memref<8x128xf32, #tpu.memory_space<vmem>>, vector<8x128xf32>
    %260 = arith.index_cast %258 : i32 to index
    %c0_121 = arith.constant 0 : index
    %c0_122 = arith.constant 0 : index
    %261 = vector.load %arg8[%260, %c0_121, %c0_122] : memref<8x8x512xf32, #tpu.memory_space<vmem>>, vector<1x8x512xf32>
    %262 = vector.shape_cast %261 : vector<1x8x512xf32> to vector<8x512xf32>
    %cst_123 = arith.constant dense<0.000000e+00> : vector<8x512xf32>
    %263 = tpu.matmul %259, %7, %cst_123 {dimension_numbers = #tpu.dot_dimension_numbers<[1], [0], [0], [1], [0, 0, 1, 1], [], []>} : vector<8x128xf32>, vector<128x512xf32>, vector<8x512xf32> -> vector<8x512xf32>
    %264 = arith.addf %262, %263 : vector<8x512xf32>
    %265 = vector.extract_strided_slice %264 {offsets = [0, 0], sizes = [8, 128], strides = [1, 1]} : vector<8x512xf32> to vector<8x128xf32>
    %266 = arith.negf %265 : vector<8x128xf32>
    %267 = math.exp %266 : vector<8x128xf32>
    %cst_124 = arith.constant 1.000000e+00 : f32
    %268 = vector.broadcast %cst_124 : f32 to vector<8x128xf32>
    %269 = arith.addf %268, %267 : vector<8x128xf32>
    %270 = arith.divf %268, %269 : vector<8x128xf32>
    %271 = vector.extract_strided_slice %264 {offsets = [0, 128], sizes = [8, 128], strides = [1, 1]} : vector<8x512xf32> to vector<8x128xf32>
    %272 = arith.negf %271 : vector<8x128xf32>
    %273 = math.exp %272 : vector<8x128xf32>
    %cst_125 = arith.constant 1.000000e+00 : f32
    %274 = vector.broadcast %cst_125 : f32 to vector<8x128xf32>
    %275 = arith.addf %274, %273 : vector<8x128xf32>
    %276 = arith.divf %274, %275 : vector<8x128xf32>
    %277 = vector.extract_strided_slice %264 {offsets = [0, 256], sizes = [8, 128], strides = [1, 1]} : vector<8x512xf32> to vector<8x128xf32>
    %278 = math.tanh %277 : vector<8x128xf32>
    %279 = vector.extract_strided_slice %264 {offsets = [0, 384], sizes = [8, 128], strides = [1, 1]} : vector<8x512xf32> to vector<8x128xf32>
    %280 = arith.negf %279 : vector<8x128xf32>
    %281 = math.exp %280 : vector<8x128xf32>
    %cst_126 = arith.constant 1.000000e+00 : f32
    %282 = vector.broadcast %cst_126 : f32 to vector<8x128xf32>
    %283 = arith.addf %282, %281 : vector<8x128xf32>
    %284 = arith.divf %282, %283 : vector<8x128xf32>
    %c0_127 = arith.constant 0 : index
    %c0_128 = arith.constant 0 : index
    %285 = vector.load %arg10[%c0_127, %c0_128] : memref<8x128xf32, #tpu.memory_space<vmem>>, vector<8x128xf32>
    %286 = arith.mulf %276, %285 : vector<8x128xf32>
    %287 = arith.mulf %270, %278 : vector<8x128xf32>
    %288 = arith.addf %286, %287 : vector<8x128xf32>
    %289 = math.tanh %288 : vector<8x128xf32>
    %290 = arith.mulf %284, %289 : vector<8x128xf32>
    %c0_129 = arith.constant 0 : index
    %c0_130 = arith.constant 0 : index
    %291 = vector.load %arg10[%c0_129, %c0_130] : memref<8x128xf32, #tpu.memory_space<vmem>>, vector<8x128xf32>
    tpu.vector_store %arg10[%c0_129, %c0_130], %288 {strides = array<i32>} : memref<8x128xf32, #tpu.memory_space<vmem>>, vector<8x128xf32>,
    %c0_131 = arith.constant 0 : index
    %c0_132 = arith.constant 0 : index
    %292 = vector.load %arg9[%c0_131, %c0_132] : memref<8x128xf32, #tpu.memory_space<vmem>>, vector<8x128xf32>
    tpu.vector_store %arg9[%c0_131, %c0_132], %290 {strides = array<i32>} : memref<8x128xf32, #tpu.memory_space<vmem>>, vector<8x128xf32>,
    %293 = arith.index_cast %258 : i32 to index
    %c0_133 = arith.constant 0 : index
    %c0_134 = arith.constant 0 : index
    %294 = vector.load %arg7[%293, %c0_133, %c0_134] : memref<8x8x128xf32, #tpu.memory_space<vmem>>, vector<1x8x128xf32>
    %295 = vector.shape_cast %294 : vector<1x8x128xf32> to vector<8x128xf32>
    %296 = vector.shape_cast %290 : vector<8x128xf32> to vector<1x8x128xf32>
    tpu.vector_store %arg7[%293, %c0_133, %c0_134], %296 {strides = array<i32>} : memref<8x8x128xf32, #tpu.memory_space<vmem>>, vector<1x8x128xf32>,
    %c7_i32_135 = arith.constant 7 : i32
    %c7_i32_136 = arith.constant 7 : i32
    %297 = arith.subi %c7_i32_136, %c7_i32_135 : i32
    %298 = arith.select %0, %297, %c7_i32_135 : i32
    %c0_137 = arith.constant 0 : index
    %c0_138 = arith.constant 0 : index
    %299 = vector.load %arg9[%c0_137, %c0_138] : memref<8x128xf32, #tpu.memory_space<vmem>>, vector<8x128xf32>
    %300 = arith.index_cast %298 : i32 to index
    %c0_139 = arith.constant 0 : index
    %c0_140 = arith.constant 0 : index
    %301 = vector.load %arg8[%300, %c0_139, %c0_140] : memref<8x8x512xf32, #tpu.memory_space<vmem>>, vector<1x8x512xf32>
    %302 = vector.shape_cast %301 : vector<1x8x512xf32> to vector<8x512xf32>
    %cst_141 = arith.constant dense<0.000000e+00> : vector<8x512xf32>
    %303 = tpu.matmul %299, %7, %cst_141 {dimension_numbers = #tpu.dot_dimension_numbers<[1], [0], [0], [1], [0, 0, 1, 1], [], []>} : vector<8x128xf32>, vector<128x512xf32>, vector<8x512xf32> -> vector<8x512xf32>
    %304 = arith.addf %302, %303 : vector<8x512xf32>
    %305 = vector.extract_strided_slice %304 {offsets = [0, 0], sizes = [8, 128], strides = [1, 1]} : vector<8x512xf32> to vector<8x128xf32>
    %306 = arith.negf %305 : vector<8x128xf32>
    %307 = math.exp %306 : vector<8x128xf32>
    %cst_142 = arith.constant 1.000000e+00 : f32
    %308 = vector.broadcast %cst_142 : f32 to vector<8x128xf32>
    %309 = arith.addf %308, %307 : vector<8x128xf32>
    %310 = arith.divf %308, %309 : vector<8x128xf32>
    %311 = vector.extract_strided_slice %304 {offsets = [0, 128], sizes = [8, 128], strides = [1, 1]} : vector<8x512xf32> to vector<8x128xf32>
    %312 = arith.negf %311 : vector<8x128xf32>
    %313 = math.exp %312 : vector<8x128xf32>
    %cst_143 = arith.constant 1.000000e+00 : f32
    %314 = vector.broadcast %cst_143 : f32 to vector<8x128xf32>
    %315 = arith.addf %314, %313 : vector<8x128xf32>
    %316 = arith.divf %314, %315 : vector<8x128xf32>
    %317 = vector.extract_strided_slice %304 {offsets = [0, 256], sizes = [8, 128], strides = [1, 1]} : vector<8x512xf32> to vector<8x128xf32>
    %318 = math.tanh %317 : vector<8x128xf32>
    %319 = vector.extract_strided_slice %304 {offsets = [0, 384], sizes = [8, 128], strides = [1, 1]} : vector<8x512xf32> to vector<8x128xf32>
    %320 = arith.negf %319 : vector<8x128xf32>
    %321 = math.exp %320 : vector<8x128xf32>
    %cst_144 = arith.constant 1.000000e+00 : f32
    %322 = vector.broadcast %cst_144 : f32 to vector<8x128xf32>
    %323 = arith.addf %322, %321 : vector<8x128xf32>
    %324 = arith.divf %322, %323 : vector<8x128xf32>
    %c0_145 = arith.constant 0 : index
    %c0_146 = arith.constant 0 : index
    %325 = vector.load %arg10[%c0_145, %c0_146] : memref<8x128xf32, #tpu.memory_space<vmem>>, vector<8x128xf32>
    %326 = arith.mulf %316, %325 : vector<8x128xf32>
    %327 = arith.mulf %310, %318 : vector<8x128xf32>
    %328 = arith.addf %326, %327 : vector<8x128xf32>
    %329 = math.tanh %328 : vector<8x128xf32>
    %330 = arith.mulf %324, %329 : vector<8x128xf32>
    %c0_147 = arith.constant 0 : index
    %c0_148 = arith.constant 0 : index
    %331 = vector.load %arg10[%c0_147, %c0_148] : memref<8x128xf32, #tpu.memory_space<vmem>>, vector<8x128xf32>
    tpu.vector_store %arg10[%c0_147, %c0_148], %328 {strides = array<i32>} : memref<8x128xf32, #tpu.memory_space<vmem>>, vector<8x128xf32>,
    %c0_149 = arith.constant 0 : index
    %c0_150 = arith.constant 0 : index
    %332 = vector.load %arg9[%c0_149, %c0_150] : memref<8x128xf32, #tpu.memory_space<vmem>>, vector<8x128xf32>
    tpu.vector_store %arg9[%c0_149, %c0_150], %330 {strides = array<i32>} : memref<8x128xf32, #tpu.memory_space<vmem>>, vector<8x128xf32>,
    %333 = arith.index_cast %298 : i32 to index
    %c0_151 = arith.constant 0 : index
    %c0_152 = arith.constant 0 : index
    %334 = vector.load %arg7[%333, %c0_151, %c0_152] : memref<8x8x128xf32, #tpu.memory_space<vmem>>, vector<1x8x128xf32>
    %335 = vector.shape_cast %334 : vector<1x8x128xf32> to vector<8x128xf32>
    %336 = vector.shape_cast %330 : vector<8x128xf32> to vector<1x8x128xf32>
    tpu.vector_store %arg7[%333, %c0_151, %c0_152], %336 {strides = array<i32>} : memref<8x8x128xf32, #tpu.memory_space<vmem>>, vector<1x8x128xf32>,
    %c8_i32 = arith.constant 8 : i32
    return
  }
  func.func @transform_0(%arg0: i32, %arg1: i32, %arg2: i32) -> (i32, i32, i32) {
    %c1_i32 = arith.constant 1 : i32
    %0 = arith.subi %c1_i32, %arg0 : i32
    %1 = arith.muli %0, %arg2 : i32
    %c0_i32 = arith.constant 0 : i32
    %2 = arith.subi %c0_i32, %arg2 : i32
    %3 = arith.muli %arg0, %2 : i32
    %4 = arith.addi %1, %3 : i32
    %c0_i32_0 = arith.constant 0 : i32
    %c0_i32_1 = arith.constant 0 : i32
    return %4, %arg1, %c0_i32_0 : i32, i32, i32
  }
  func.func @transform_1(%arg0: i32, %arg1: i32, %arg2: i32) -> (i32, i32, i32) {
    %c0_i32 = arith.constant 0 : i32
    %c0_i32_0 = arith.constant 0 : i32
    %c0_i32_1 = arith.constant 0 : i32
    return %arg0, %c0_i32, %c0_i32_0 : i32, i32, i32
  }
  func.func @transform_2(%arg0: i32, %arg1: i32, %arg2: i32) -> (i32, i32, i32) {
    %c0_i32 = arith.constant 0 : i32
    %c0_i32_0 = arith.constant 0 : i32
    %c0_i32_1 = arith.constant 0 : i32
    return %arg0, %c0_i32, %c0_i32_0 : i32, i32, i32
  }
  func.func @transform_3(%arg0: i32, %arg1: i32, %arg2: i32) -> (i32, i32, i32) {
    %c0_i32 = arith.constant 0 : i32
    %c0_i32_0 = arith.constant 0 : i32
    %c0_i32_1 = arith.constant 0 : i32
    return %arg0, %c0_i32, %c0_i32_0 : i32, i32, i32
  }
  func.func @transform_4(%arg0: i32, %arg1: i32, %arg2: i32) -> (i32, i32, i32) {
    %c1_i32 = arith.constant 1 : i32
    %0 = arith.subi %c1_i32, %arg0 : i32
    %1 = arith.muli %0, %arg2 : i32
    %c0_i32 = arith.constant 0 : i32
    %2 = arith.subi %c0_i32, %arg2 : i32
    %3 = arith.muli %arg0, %2 : i32
    %4 = arith.addi %1, %3 : i32
    %c0_i32_0 = arith.constant 0 : i32
    return %4, %arg1, %arg0 : i32, i32, i32
  }
}

module attributes {stable_mosaic.version = 11 : i64} {
  func.func @_bilstm_layer_kernel(%arg0: i32, %arg1: i32, %arg2: i32, %arg3: memref<8x8x16xf32, #tpu.memory_space<vmem>>, %arg4: memref<1x16x512xf32, #tpu.memory_space<vmem>>, %arg5: memref<1x128x512xf32, #tpu.memory_space<vmem>>, %arg6: memref<1x1x512xf32, #tpu.memory_space<vmem>>, %arg7: memref<8x8x128xf32, #tpu.memory_space<vmem>>, %arg8: memref<8x8x512xf32, #tpu.memory_space<vmem>>, %arg9: memref<8x128xf32, #tpu.memory_space<vmem>>, %arg10: memref<8x128xf32, #tpu.memory_space<vmem>>) attributes {dimension_semantics = [#tpu.dimension_semantics<parallel>, #tpu.dimension_semantics<parallel>, #tpu.dimension_semantics<arbitrary>], iteration_bounds = array<i64: 2, 1, 1>, scalar_prefetch = 0 : i64, scratch_operands = 3 : i64, tpu.core_type = #tpu.core_type<tc>, window_params = [{transform_indices = @transform_0, window_bounds = array<i64: 8, 8, 16>}, {transform_indices = @transform_1, window_bounds = array<i64: 1, 16, 512>}, {transform_indices = @transform_2, window_bounds = array<i64: 1, 128, 512>}, {transform_indices = @transform_3, window_bounds = array<i64: 1, 1, 512>}, {transform_indices = @transform_4, window_bounds = array<i64: 8, 8, 128>}]} {
    %c1_i32 = arith.constant 1 : i32
    %0 = arith.cmpi eq, %arg0, %c1_i32 : i32
    %c0_i32 = arith.constant 0 : i32
    %1 = arith.cmpi eq, %arg2, %c0_i32 : i32
    %2 = arith.extui %1 : i1 to i32
    %c0_i32_0 = arith.constant 0 : i32
    %3 = arith.cmpi ne, %2, %c0_i32_0 : i32
    scf.if %3 {
      %cst_153 = arith.constant 0.000000e+00 : f32
      %337 = vector.broadcast %cst_153 : f32 to vector<8x128xf32>
      %c0_154 = arith.constant 0 : index
      %c0_155 = arith.constant 0 : index
      %338 = vector.load %arg9[%c0_154, %c0_155] : memref<8x128xf32, #tpu.memory_space<vmem>>, vector<8x128xf32>
      tpu.vector_store %arg9[%c0_154, %c0_155], %337 {strides = array<i32>} : memref<8x128xf32, #tpu.memory_space<vmem>>, vector<8x128xf32>,
      %cst_156 = arith.constant 0.000000e+00 : f32
      %339 = vector.broadcast %cst_156 : f32 to vector<8x128xf32>
      %c0_157 = arith.constant 0 : index
      %c0_158 = arith.constant 0 : index
      %340 = vector.load %arg10[%c0_157, %c0_158] : memref<8x128xf32, #tpu.memory_space<vmem>>, vector<8x128xf32>
      tpu.vector_store %arg10[%c0_157, %c0_158], %339 {strides = array<i32>} : memref<8x128xf32, #tpu.memory_space<vmem>>, vector<8x128xf32>,
    } else {
    }
    %c0 = arith.constant 0 : index
    %c0_1 = arith.constant 0 : index
    %c0_2 = arith.constant 0 : index
    %4 = vector.load %arg4[%c0, %c0_1, %c0_2] : memref<1x16x512xf32, #tpu.memory_space<vmem>>, vector<1x16x512xf32>
    %5 = vector.shape_cast %4 : vector<1x16x512xf32> to vector<16x512xf32>
    %c0_3 = arith.constant 0 : index
    %c0_4 = arith.constant 0 : index
    %c0_5 = arith.constant 0 : index
    %6 = vector.load %arg5[%c0_3, %c0_4, %c0_5] : memref<1x128x512xf32, #tpu.memory_space<vmem>>, vector<1x128x512xf32>
    %7 = vector.shape_cast %6 : vector<1x128x512xf32> to vector<128x512xf32>
    %c0_6 = arith.constant 0 : index
    %c0_7 = arith.constant 0 : index
    %c0_8 = arith.constant 0 : index
    %8 = vector.load %arg6[%c0_6, %c0_7, %c0_8] : memref<1x1x512xf32, #tpu.memory_space<vmem>>, vector<1x1x512xf32>
    %9 = vector.shape_cast %8 : vector<1x1x512xf32> to vector<1x512xf32>
    %c0_9 = arith.constant 0 : index
    %c0_10 = arith.constant 0 : index
    %c0_11 = arith.constant 0 : index
    %10 = vector.load %arg3[%c0_9, %c0_10, %c0_11] : memref<8x8x16xf32, #tpu.memory_space<vmem>>, vector<8x8x16xf32>
    %11 = vector.shape_cast %10 : vector<8x8x16xf32> to vector<64x16xf32>
    %cst = arith.constant dense<0.000000e+00> : vector<64x512xf32>
    %12 = tpu.matmul %11, %5, %cst {dimension_numbers = #tpu.dot_dimension_numbers<[1], [0], [0], [1], [0, 0, 1, 1], [], []>} : vector<64x16xf32>, vector<16x512xf32>, vector<64x512xf32> -> vector<64x512xf32>
    %13 = vector.broadcast %9 : vector<1x512xf32> to vector<64x512xf32>
    %14 = arith.addf %12, %13 : vector<64x512xf32>
    %15 = vector.shape_cast %14 : vector<64x512xf32> to vector<8x8x512xf32>
    %c0_12 = arith.constant 0 : index
    %c0_13 = arith.constant 0 : index
    %c0_14 = arith.constant 0 : index
    %16 = vector.load %arg8[%c0_12, %c0_13, %c0_14] : memref<8x8x512xf32, #tpu.memory_space<vmem>>, vector<8x8x512xf32>
    tpu.vector_store %arg8[%c0_12, %c0_13, %c0_14], %15 {strides = array<i32>} : memref<8x8x512xf32, #tpu.memory_space<vmem>>, vector<8x8x512xf32>,
    %c0_i32_15 = arith.constant 0 : i32
    %c7_i32 = arith.constant 7 : i32
    %17 = arith.subi %c7_i32, %c0_i32_15 : i32
    %18 = arith.select %0, %17, %c0_i32_15 : i32
    %c0_16 = arith.constant 0 : index
    %c0_17 = arith.constant 0 : index
    %19 = vector.load %arg9[%c0_16, %c0_17] : memref<8x128xf32, #tpu.memory_space<vmem>>, vector<8x128xf32>
    %20 = arith.index_cast %18 : i32 to index
    %c0_18 = arith.constant 0 : index
    %c0_19 = arith.constant 0 : index
    %21 = vector.load %arg8[%20, %c0_18, %c0_19] : memref<8x8x512xf32, #tpu.memory_space<vmem>>, vector<1x8x512xf32>
    %22 = vector.shape_cast %21 : vector<1x8x512xf32> to vector<8x512xf32>
    %cst_20 = arith.constant dense<0.000000e+00> : vector<8x512xf32>
    %23 = tpu.matmul %19, %7, %cst_20 {dimension_numbers = #tpu.dot_dimension_numbers<[1], [0], [0], [1], [0, 0, 1, 1], [], []>} : vector<8x128xf32>, vector<128x512xf32>, vector<8x512xf32> -> vector<8x512xf32>
    %24 = arith.addf %22, %23 : vector<8x512xf32>
    %25 = vector.extract_strided_slice %24 {offsets = [0, 0], sizes = [8, 128], strides = [1, 1]} : vector<8x512xf32> to vector<8x128xf32>
    %26 = arith.negf %25 : vector<8x128xf32>
    %27 = math.exp %26 : vector<8x128xf32>
    %cst_21 = arith.constant 1.000000e+00 : f32
    %28 = vector.broadcast %cst_21 : f32 to vector<8x128xf32>
    %29 = arith.addf %28, %27 : vector<8x128xf32>
    %30 = arith.divf %28, %29 : vector<8x128xf32>
    %31 = vector.extract_strided_slice %24 {offsets = [0, 128], sizes = [8, 128], strides = [1, 1]} : vector<8x512xf32> to vector<8x128xf32>
    %32 = arith.negf %31 : vector<8x128xf32>
    %33 = math.exp %32 : vector<8x128xf32>
    %cst_22 = arith.constant 1.000000e+00 : f32
    %34 = vector.broadcast %cst_22 : f32 to vector<8x128xf32>
    %35 = arith.addf %34, %33 : vector<8x128xf32>
    %36 = arith.divf %34, %35 : vector<8x128xf32>
    %37 = vector.extract_strided_slice %24 {offsets = [0, 256], sizes = [8, 128], strides = [1, 1]} : vector<8x512xf32> to vector<8x128xf32>
    %38 = math.tanh %37 : vector<8x128xf32>
    %39 = vector.extract_strided_slice %24 {offsets = [0, 384], sizes = [8, 128], strides = [1, 1]} : vector<8x512xf32> to vector<8x128xf32>
    %40 = arith.negf %39 : vector<8x128xf32>
    %41 = math.exp %40 : vector<8x128xf32>
    %cst_23 = arith.constant 1.000000e+00 : f32
    %42 = vector.broadcast %cst_23 : f32 to vector<8x128xf32>
    %43 = arith.addf %42, %41 : vector<8x128xf32>
    %44 = arith.divf %42, %43 : vector<8x128xf32>
    %c0_24 = arith.constant 0 : index
    %c0_25 = arith.constant 0 : index
    %45 = vector.load %arg10[%c0_24, %c0_25] : memref<8x128xf32, #tpu.memory_space<vmem>>, vector<8x128xf32>
    %46 = arith.mulf %36, %45 : vector<8x128xf32>
    %47 = arith.mulf %30, %38 : vector<8x128xf32>
    %48 = arith.addf %46, %47 : vector<8x128xf32>
    %49 = math.tanh %48 : vector<8x128xf32>
    %50 = arith.mulf %44, %49 : vector<8x128xf32>
    %c0_26 = arith.constant 0 : index
    %c0_27 = arith.constant 0 : index
    %51 = vector.load %arg10[%c0_26, %c0_27] : memref<8x128xf32, #tpu.memory_space<vmem>>, vector<8x128xf32>
    tpu.vector_store %arg10[%c0_26, %c0_27], %48 {strides = array<i32>} : memref<8x128xf32, #tpu.memory_space<vmem>>, vector<8x128xf32>,
    %c0_28 = arith.constant 0 : index
    %c0_29 = arith.constant 0 : index
    %52 = vector.load %arg9[%c0_28, %c0_29] : memref<8x128xf32, #tpu.memory_space<vmem>>, vector<8x128xf32>
    tpu.vector_store %arg9[%c0_28, %c0_29], %50 {strides = array<i32>} : memref<8x128xf32, #tpu.memory_space<vmem>>, vector<8x128xf32>,
    %53 = arith.index_cast %18 : i32 to index
    %c0_30 = arith.constant 0 : index
    %c0_31 = arith.constant 0 : index
    %54 = vector.load %arg7[%53, %c0_30, %c0_31] : memref<8x8x128xf32, #tpu.memory_space<vmem>>, vector<1x8x128xf32>
    %55 = vector.shape_cast %54 : vector<1x8x128xf32> to vector<8x128xf32>
    %56 = vector.shape_cast %50 : vector<8x128xf32> to vector<1x8x128xf32>
    tpu.vector_store %arg7[%53, %c0_30, %c0_31], %56 {strides = array<i32>} : memref<8x8x128xf32, #tpu.memory_space<vmem>>, vector<1x8x128xf32>,
    %c1_i32_32 = arith.constant 1 : i32
    %c7_i32_33 = arith.constant 7 : i32
    %57 = arith.subi %c7_i32_33, %c1_i32_32 : i32
    %58 = arith.select %0, %57, %c1_i32_32 : i32
    %c0_34 = arith.constant 0 : index
    %c0_35 = arith.constant 0 : index
    %59 = vector.load %arg9[%c0_34, %c0_35] : memref<8x128xf32, #tpu.memory_space<vmem>>, vector<8x128xf32>
    %60 = arith.index_cast %58 : i32 to index
    %c0_36 = arith.constant 0 : index
    %c0_37 = arith.constant 0 : index
    %61 = vector.load %arg8[%60, %c0_36, %c0_37] : memref<8x8x512xf32, #tpu.memory_space<vmem>>, vector<1x8x512xf32>
    %62 = vector.shape_cast %61 : vector<1x8x512xf32> to vector<8x512xf32>
    %cst_38 = arith.constant dense<0.000000e+00> : vector<8x512xf32>
    %63 = tpu.matmul %59, %7, %cst_38 {dimension_numbers = #tpu.dot_dimension_numbers<[1], [0], [0], [1], [0, 0, 1, 1], [], []>} : vector<8x128xf32>, vector<128x512xf32>, vector<8x512xf32> -> vector<8x512xf32>
    %64 = arith.addf %62, %63 : vector<8x512xf32>
    %65 = vector.extract_strided_slice %64 {offsets = [0, 0], sizes = [8, 128], strides = [1, 1]} : vector<8x512xf32> to vector<8x128xf32>
    %66 = arith.negf %65 : vector<8x128xf32>
    %67 = math.exp %66 : vector<8x128xf32>
    %cst_39 = arith.constant 1.000000e+00 : f32
    %68 = vector.broadcast %cst_39 : f32 to vector<8x128xf32>
    %69 = arith.addf %68, %67 : vector<8x128xf32>
    %70 = arith.divf %68, %69 : vector<8x128xf32>
    %71 = vector.extract_strided_slice %64 {offsets = [0, 128], sizes = [8, 128], strides = [1, 1]} : vector<8x512xf32> to vector<8x128xf32>
    %72 = arith.negf %71 : vector<8x128xf32>
    %73 = math.exp %72 : vector<8x128xf32>
    %cst_40 = arith.constant 1.000000e+00 : f32
    %74 = vector.broadcast %cst_40 : f32 to vector<8x128xf32>
    %75 = arith.addf %74, %73 : vector<8x128xf32>
    %76 = arith.divf %74, %75 : vector<8x128xf32>
    %77 = vector.extract_strided_slice %64 {offsets = [0, 256], sizes = [8, 128], strides = [1, 1]} : vector<8x512xf32> to vector<8x128xf32>
    %78 = math.tanh %77 : vector<8x128xf32>
    %79 = vector.extract_strided_slice %64 {offsets = [0, 384], sizes = [8, 128], strides = [1, 1]} : vector<8x512xf32> to vector<8x128xf32>
    %80 = arith.negf %79 : vector<8x128xf32>
    %81 = math.exp %80 : vector<8x128xf32>
    %cst_41 = arith.constant 1.000000e+00 : f32
    %82 = vector.broadcast %cst_41 : f32 to vector<8x128xf32>
    %83 = arith.addf %82, %81 : vector<8x128xf32>
    %84 = arith.divf %82, %83 : vector<8x128xf32>
    %c0_42 = arith.constant 0 : index
    %c0_43 = arith.constant 0 : index
    %85 = vector.load %arg10[%c0_42, %c0_43] : memref<8x128xf32, #tpu.memory_space<vmem>>, vector<8x128xf32>
    %86 = arith.mulf %76, %85 : vector<8x128xf32>
    %87 = arith.mulf %70, %78 : vector<8x128xf32>
    %88 = arith.addf %86, %87 : vector<8x128xf32>
    %89 = math.tanh %88 : vector<8x128xf32>
    %90 = arith.mulf %84, %89 : vector<8x128xf32>
    %c0_44 = arith.constant 0 : index
    %c0_45 = arith.constant 0 : index
    %91 = vector.load %arg10[%c0_44, %c0_45] : memref<8x128xf32, #tpu.memory_space<vmem>>, vector<8x128xf32>
    tpu.vector_store %arg10[%c0_44, %c0_45], %88 {strides = array<i32>} : memref<8x128xf32, #tpu.memory_space<vmem>>, vector<8x128xf32>,
    %c0_46 = arith.constant 0 : index
    %c0_47 = arith.constant 0 : index
    %92 = vector.load %arg9[%c0_46, %c0_47] : memref<8x128xf32, #tpu.memory_space<vmem>>, vector<8x128xf32>
    tpu.vector_store %arg9[%c0_46, %c0_47], %90 {strides = array<i32>} : memref<8x128xf32, #tpu.memory_space<vmem>>, vector<8x128xf32>,
    %93 = arith.index_cast %58 : i32 to index
    %c0_48 = arith.constant 0 : index
    %c0_49 = arith.constant 0 : index
    %94 = vector.load %arg7[%93, %c0_48, %c0_49] : memref<8x8x128xf32, #tpu.memory_space<vmem>>, vector<1x8x128xf32>
    %95 = vector.shape_cast %94 : vector<1x8x128xf32> to vector<8x128xf32>
    %96 = vector.shape_cast %90 : vector<8x128xf32> to vector<1x8x128xf32>
    tpu.vector_store %arg7[%93, %c0_48, %c0_49], %96 {strides = array<i32>} : memref<8x8x128xf32, #tpu.memory_space<vmem>>, vector<1x8x128xf32>,
    %c2_i32 = arith.constant 2 : i32
    %c7_i32_50 = arith.constant 7 : i32
    %97 = arith.subi %c7_i32_50, %c2_i32 : i32
    %98 = arith.select %0, %97, %c2_i32 : i32
    %c0_51 = arith.constant 0 : index
    %c0_52 = arith.constant 0 : index
    %99 = vector.load %arg9[%c0_51, %c0_52] : memref<8x128xf32, #tpu.memory_space<vmem>>, vector<8x128xf32>
    %100 = arith.index_cast %98 : i32 to index
    %c0_53 = arith.constant 0 : index
    %c0_54 = arith.constant 0 : index
    %101 = vector.load %arg8[%100, %c0_53, %c0_54] : memref<8x8x512xf32, #tpu.memory_space<vmem>>, vector<1x8x512xf32>
    %102 = vector.shape_cast %101 : vector<1x8x512xf32> to vector<8x512xf32>
    %cst_55 = arith.constant dense<0.000000e+00> : vector<8x512xf32>
    %103 = tpu.matmul %99, %7, %cst_55 {dimension_numbers = #tpu.dot_dimension_numbers<[1], [0], [0], [1], [0, 0, 1, 1], [], []>} : vector<8x128xf32>, vector<128x512xf32>, vector<8x512xf32> -> vector<8x512xf32>
    %104 = arith.addf %102, %103 : vector<8x512xf32>
    %105 = vector.extract_strided_slice %104 {offsets = [0, 0], sizes = [8, 128], strides = [1, 1]} : vector<8x512xf32> to vector<8x128xf32>
    %106 = arith.negf %105 : vector<8x128xf32>
    %107 = math.exp %106 : vector<8x128xf32>
    %cst_56 = arith.constant 1.000000e+00 : f32
    %108 = vector.broadcast %cst_56 : f32 to vector<8x128xf32>
    %109 = arith.addf %108, %107 : vector<8x128xf32>
    %110 = arith.divf %108, %109 : vector<8x128xf32>
    %111 = vector.extract_strided_slice %104 {offsets = [0, 128], sizes = [8, 128], strides = [1, 1]} : vector<8x512xf32> to vector<8x128xf32>
    %112 = arith.negf %111 : vector<8x128xf32>
    %113 = math.exp %112 : vector<8x128xf32>
    %cst_57 = arith.constant 1.000000e+00 : f32
    %114 = vector.broadcast %cst_57 : f32 to vector<8x128xf32>
    %115 = arith.addf %114, %113 : vector<8x128xf32>
    %116 = arith.divf %114, %115 : vector<8x128xf32>
    %117 = vector.extract_strided_slice %104 {offsets = [0, 256], sizes = [8, 128], strides = [1, 1]} : vector<8x512xf32> to vector<8x128xf32>
    %118 = math.tanh %117 : vector<8x128xf32>
    %119 = vector.extract_strided_slice %104 {offsets = [0, 384], sizes = [8, 128], strides = [1, 1]} : vector<8x512xf32> to vector<8x128xf32>
    %120 = arith.negf %119 : vector<8x128xf32>
    %121 = math.exp %120 : vector<8x128xf32>
    %cst_58 = arith.constant 1.000000e+00 : f32
    %122 = vector.broadcast %cst_58 : f32 to vector<8x128xf32>
    %123 = arith.addf %122, %121 : vector<8x128xf32>
    %124 = arith.divf %122, %123 : vector<8x128xf32>
    %c0_59 = arith.constant 0 : index
    %c0_60 = arith.constant 0 : index
    %125 = vector.load %arg10[%c0_59, %c0_60] : memref<8x128xf32, #tpu.memory_space<vmem>>, vector<8x128xf32>
    %126 = arith.mulf %116, %125 : vector<8x128xf32>
    %127 = arith.mulf %110, %118 : vector<8x128xf32>
    %128 = arith.addf %126, %127 : vector<8x128xf32>
    %129 = math.tanh %128 : vector<8x128xf32>
    %130 = arith.mulf %124, %129 : vector<8x128xf32>
    %c0_61 = arith.constant 0 : index
    %c0_62 = arith.constant 0 : index
    %131 = vector.load %arg10[%c0_61, %c0_62] : memref<8x128xf32, #tpu.memory_space<vmem>>, vector<8x128xf32>
    tpu.vector_store %arg10[%c0_61, %c0_62], %128 {strides = array<i32>} : memref<8x128xf32, #tpu.memory_space<vmem>>, vector<8x128xf32>,
    %c0_63 = arith.constant 0 : index
    %c0_64 = arith.constant 0 : index
    %132 = vector.load %arg9[%c0_63, %c0_64] : memref<8x128xf32, #tpu.memory_space<vmem>>, vector<8x128xf32>
    tpu.vector_store %arg9[%c0_63, %c0_64], %130 {strides = array<i32>} : memref<8x128xf32, #tpu.memory_space<vmem>>, vector<8x128xf32>,
    %133 = arith.index_cast %98 : i32 to index
    %c0_65 = arith.constant 0 : index
    %c0_66 = arith.constant 0 : index
    %134 = vector.load %arg7[%133, %c0_65, %c0_66] : memref<8x8x128xf32, #tpu.memory_space<vmem>>, vector<1x8x128xf32>
    %135 = vector.shape_cast %134 : vector<1x8x128xf32> to vector<8x128xf32>
    %136 = vector.shape_cast %130 : vector<8x128xf32> to vector<1x8x128xf32>
    tpu.vector_store %arg7[%133, %c0_65, %c0_66], %136 {strides = array<i32>} : memref<8x8x128xf32, #tpu.memory_space<vmem>>, vector<1x8x128xf32>,
    %c3_i32 = arith.constant 3 : i32
    %c7_i32_67 = arith.constant 7 : i32
    %137 = arith.subi %c7_i32_67, %c3_i32 : i32
    %138 = arith.select %0, %137, %c3_i32 : i32
    %c0_68 = arith.constant 0 : index
    %c0_69 = arith.constant 0 : index
    %139 = vector.load %arg9[%c0_68, %c0_69] : memref<8x128xf32, #tpu.memory_space<vmem>>, vector<8x128xf32>
    %140 = arith.index_cast %138 : i32 to index
    %c0_70 = arith.constant 0 : index
    %c0_71 = arith.constant 0 : index
    %141 = vector.load %arg8[%140, %c0_70, %c0_71] : memref<8x8x512xf32, #tpu.memory_space<vmem>>, vector<1x8x512xf32>
    %142 = vector.shape_cast %141 : vector<1x8x512xf32> to vector<8x512xf32>
    %cst_72 = arith.constant dense<0.000000e+00> : vector<8x512xf32>
    %143 = tpu.matmul %139, %7, %cst_72 {dimension_numbers = #tpu.dot_dimension_numbers<[1], [0], [0], [1], [0, 0, 1, 1], [], []>} : vector<8x128xf32>, vector<128x512xf32>, vector<8x512xf32> -> vector<8x512xf32>
    %144 = arith.addf %142, %143 : vector<8x512xf32>
    %145 = vector.extract_strided_slice %144 {offsets = [0, 0], sizes = [8, 128], strides = [1, 1]} : vector<8x512xf32> to vector<8x128xf32>
    %146 = arith.negf %145 : vector<8x128xf32>
    %147 = math.exp %146 : vector<8x128xf32>
    %cst_73 = arith.constant 1.000000e+00 : f32
    %148 = vector.broadcast %cst_73 : f32 to vector<8x128xf32>
    %149 = arith.addf %148, %147 : vector<8x128xf32>
    %150 = arith.divf %148, %149 : vector<8x128xf32>
    %151 = vector.extract_strided_slice %144 {offsets = [0, 128], sizes = [8, 128], strides = [1, 1]} : vector<8x512xf32> to vector<8x128xf32>
    %152 = arith.negf %151 : vector<8x128xf32>
    %153 = math.exp %152 : vector<8x128xf32>
    %cst_74 = arith.constant 1.000000e+00 : f32
    %154 = vector.broadcast %cst_74 : f32 to vector<8x128xf32>
    %155 = arith.addf %154, %153 : vector<8x128xf32>
    %156 = arith.divf %154, %155 : vector<8x128xf32>
    %157 = vector.extract_strided_slice %144 {offsets = [0, 256], sizes = [8, 128], strides = [1, 1]} : vector<8x512xf32> to vector<8x128xf32>
    %158 = math.tanh %157 : vector<8x128xf32>
    %159 = vector.extract_strided_slice %144 {offsets = [0, 384], sizes = [8, 128], strides = [1, 1]} : vector<8x512xf32> to vector<8x128xf32>
    %160 = arith.negf %159 : vector<8x128xf32>
    %161 = math.exp %160 : vector<8x128xf32>
    %cst_75 = arith.constant 1.000000e+00 : f32
    %162 = vector.broadcast %cst_75 : f32 to vector<8x128xf32>
    %163 = arith.addf %162, %161 : vector<8x128xf32>
    %164 = arith.divf %162, %163 : vector<8x128xf32>
    %c0_76 = arith.constant 0 : index
    %c0_77 = arith.constant 0 : index
    %165 = vector.load %arg10[%c0_76, %c0_77] : memref<8x128xf32, #tpu.memory_space<vmem>>, vector<8x128xf32>
    %166 = arith.mulf %156, %165 : vector<8x128xf32>
    %167 = arith.mulf %150, %158 : vector<8x128xf32>
    %168 = arith.addf %166, %167 : vector<8x128xf32>
    %169 = math.tanh %168 : vector<8x128xf32>
    %170 = arith.mulf %164, %169 : vector<8x128xf32>
    %c0_78 = arith.constant 0 : index
    %c0_79 = arith.constant 0 : index
    %171 = vector.load %arg10[%c0_78, %c0_79] : memref<8x128xf32, #tpu.memory_space<vmem>>, vector<8x128xf32>
    tpu.vector_store %arg10[%c0_78, %c0_79], %168 {strides = array<i32>} : memref<8x128xf32, #tpu.memory_space<vmem>>, vector<8x128xf32>,
    %c0_80 = arith.constant 0 : index
    %c0_81 = arith.constant 0 : index
    %172 = vector.load %arg9[%c0_80, %c0_81] : memref<8x128xf32, #tpu.memory_space<vmem>>, vector<8x128xf32>
    tpu.vector_store %arg9[%c0_80, %c0_81], %170 {strides = array<i32>} : memref<8x128xf32, #tpu.memory_space<vmem>>, vector<8x128xf32>,
    %173 = arith.index_cast %138 : i32 to index
    %c0_82 = arith.constant 0 : index
    %c0_83 = arith.constant 0 : index
    %174 = vector.load %arg7[%173, %c0_82, %c0_83] : memref<8x8x128xf32, #tpu.memory_space<vmem>>, vector<1x8x128xf32>
    %175 = vector.shape_cast %174 : vector<1x8x128xf32> to vector<8x128xf32>
    %176 = vector.shape_cast %170 : vector<8x128xf32> to vector<1x8x128xf32>
    tpu.vector_store %arg7[%173, %c0_82, %c0_83], %176 {strides = array<i32>} : memref<8x8x128xf32, #tpu.memory_space<vmem>>, vector<1x8x128xf32>,
    %c4_i32 = arith.constant 4 : i32
    %c7_i32_84 = arith.constant 7 : i32
    %177 = arith.subi %c7_i32_84, %c4_i32 : i32
    %178 = arith.select %0, %177, %c4_i32 : i32
    %c0_85 = arith.constant 0 : index
    %c0_86 = arith.constant 0 : index
    %179 = vector.load %arg9[%c0_85, %c0_86] : memref<8x128xf32, #tpu.memory_space<vmem>>, vector<8x128xf32>
    %180 = arith.index_cast %178 : i32 to index
    %c0_87 = arith.constant 0 : index
    %c0_88 = arith.constant 0 : index
    %181 = vector.load %arg8[%180, %c0_87, %c0_88] : memref<8x8x512xf32, #tpu.memory_space<vmem>>, vector<1x8x512xf32>
    %182 = vector.shape_cast %181 : vector<1x8x512xf32> to vector<8x512xf32>
    %cst_89 = arith.constant dense<0.000000e+00> : vector<8x512xf32>
    %183 = tpu.matmul %179, %7, %cst_89 {dimension_numbers = #tpu.dot_dimension_numbers<[1], [0], [0], [1], [0, 0, 1, 1], [], []>} : vector<8x128xf32>, vector<128x512xf32>, vector<8x512xf32> -> vector<8x512xf32>
    %184 = arith.addf %182, %183 : vector<8x512xf32>
    %185 = vector.extract_strided_slice %184 {offsets = [0, 0], sizes = [8, 128], strides = [1, 1]} : vector<8x512xf32> to vector<8x128xf32>
    %186 = arith.negf %185 : vector<8x128xf32>
    %187 = math.exp %186 : vector<8x128xf32>
    %cst_90 = arith.constant 1.000000e+00 : f32
    %188 = vector.broadcast %cst_90 : f32 to vector<8x128xf32>
    %189 = arith.addf %188, %187 : vector<8x128xf32>
    %190 = arith.divf %188, %189 : vector<8x128xf32>
    %191 = vector.extract_strided_slice %184 {offsets = [0, 128], sizes = [8, 128], strides = [1, 1]} : vector<8x512xf32> to vector<8x128xf32>
    %192 = arith.negf %191 : vector<8x128xf32>
    %193 = math.exp %192 : vector<8x128xf32>
    %cst_91 = arith.constant 1.000000e+00 : f32
    %194 = vector.broadcast %cst_91 : f32 to vector<8x128xf32>
    %195 = arith.addf %194, %193 : vector<8x128xf32>
    %196 = arith.divf %194, %195 : vector<8x128xf32>
    %197 = vector.extract_strided_slice %184 {offsets = [0, 256], sizes = [8, 128], strides = [1, 1]} : vector<8x512xf32> to vector<8x128xf32>
    %198 = math.tanh %197 : vector<8x128xf32>
    %199 = vector.extract_strided_slice %184 {offsets = [0, 384], sizes = [8, 128], strides = [1, 1]} : vector<8x512xf32> to vector<8x128xf32>
    %200 = arith.negf %199 : vector<8x128xf32>
    %201 = math.exp %200 : vector<8x128xf32>
    %cst_92 = arith.constant 1.000000e+00 : f32
    %202 = vector.broadcast %cst_92 : f32 to vector<8x128xf32>
    %203 = arith.addf %202, %201 : vector<8x128xf32>
    %204 = arith.divf %202, %203 : vector<8x128xf32>
    %c0_93 = arith.constant 0 : index
    %c0_94 = arith.constant 0 : index
    %205 = vector.load %arg10[%c0_93, %c0_94] : memref<8x128xf32, #tpu.memory_space<vmem>>, vector<8x128xf32>
    %206 = arith.mulf %196, %205 : vector<8x128xf32>
    %207 = arith.mulf %190, %198 : vector<8x128xf32>
    %208 = arith.addf %206, %207 : vector<8x128xf32>
    %209 = math.tanh %208 : vector<8x128xf32>
    %210 = arith.mulf %204, %209 : vector<8x128xf32>
    %c0_95 = arith.constant 0 : index
    %c0_96 = arith.constant 0 : index
    %211 = vector.load %arg10[%c0_95, %c0_96] : memref<8x128xf32, #tpu.memory_space<vmem>>, vector<8x128xf32>
    tpu.vector_store %arg10[%c0_95, %c0_96], %208 {strides = array<i32>} : memref<8x128xf32, #tpu.memory_space<vmem>>, vector<8x128xf32>,
    %c0_97 = arith.constant 0 : index
    %c0_98 = arith.constant 0 : index
    %212 = vector.load %arg9[%c0_97, %c0_98] : memref<8x128xf32, #tpu.memory_space<vmem>>, vector<8x128xf32>
    tpu.vector_store %arg9[%c0_97, %c0_98], %210 {strides = array<i32>} : memref<8x128xf32, #tpu.memory_space<vmem>>, vector<8x128xf32>,
    %213 = arith.index_cast %178 : i32 to index
    %c0_99 = arith.constant 0 : index
    %c0_100 = arith.constant 0 : index
    %214 = vector.load %arg7[%213, %c0_99, %c0_100] : memref<8x8x128xf32, #tpu.memory_space<vmem>>, vector<1x8x128xf32>
    %215 = vector.shape_cast %214 : vector<1x8x128xf32> to vector<8x128xf32>
    %216 = vector.shape_cast %210 : vector<8x128xf32> to vector<1x8x128xf32>
    tpu.vector_store %arg7[%213, %c0_99, %c0_100], %216 {strides = array<i32>} : memref<8x8x128xf32, #tpu.memory_space<vmem>>, vector<1x8x128xf32>,
    %c5_i32 = arith.constant 5 : i32
    %c7_i32_101 = arith.constant 7 : i32
    %217 = arith.subi %c7_i32_101, %c5_i32 : i32
    %218 = arith.select %0, %217, %c5_i32 : i32
    %c0_102 = arith.constant 0 : index
    %c0_103 = arith.constant 0 : index
    %219 = vector.load %arg9[%c0_102, %c0_103] : memref<8x128xf32, #tpu.memory_space<vmem>>, vector<8x128xf32>
    %220 = arith.index_cast %218 : i32 to index
    %c0_104 = arith.constant 0 : index
    %c0_105 = arith.constant 0 : index
    %221 = vector.load %arg8[%220, %c0_104, %c0_105] : memref<8x8x512xf32, #tpu.memory_space<vmem>>, vector<1x8x512xf32>
    %222 = vector.shape_cast %221 : vector<1x8x512xf32> to vector<8x512xf32>
    %cst_106 = arith.constant dense<0.000000e+00> : vector<8x512xf32>
    %223 = tpu.matmul %219, %7, %cst_106 {dimension_numbers = #tpu.dot_dimension_numbers<[1], [0], [0], [1], [0, 0, 1, 1], [], []>} : vector<8x128xf32>, vector<128x512xf32>, vector<8x512xf32> -> vector<8x512xf32>
    %224 = arith.addf %222, %223 : vector<8x512xf32>
    %225 = vector.extract_strided_slice %224 {offsets = [0, 0], sizes = [8, 128], strides = [1, 1]} : vector<8x512xf32> to vector<8x128xf32>
    %226 = arith.negf %225 : vector<8x128xf32>
    %227 = math.exp %226 : vector<8x128xf32>
    %cst_107 = arith.constant 1.000000e+00 : f32
    %228 = vector.broadcast %cst_107 : f32 to vector<8x128xf32>
    %229 = arith.addf %228, %227 : vector<8x128xf32>
    %230 = arith.divf %228, %229 : vector<8x128xf32>
    %231 = vector.extract_strided_slice %224 {offsets = [0, 128], sizes = [8, 128], strides = [1, 1]} : vector<8x512xf32> to vector<8x128xf32>
    %232 = arith.negf %231 : vector<8x128xf32>
    %233 = math.exp %232 : vector<8x128xf32>
    %cst_108 = arith.constant 1.000000e+00 : f32
    %234 = vector.broadcast %cst_108 : f32 to vector<8x128xf32>
    %235 = arith.addf %234, %233 : vector<8x128xf32>
    %236 = arith.divf %234, %235 : vector<8x128xf32>
    %237 = vector.extract_strided_slice %224 {offsets = [0, 256], sizes = [8, 128], strides = [1, 1]} : vector<8x512xf32> to vector<8x128xf32>
    %238 = math.tanh %237 : vector<8x128xf32>
    %239 = vector.extract_strided_slice %224 {offsets = [0, 384], sizes = [8, 128], strides = [1, 1]} : vector<8x512xf32> to vector<8x128xf32>
    %240 = arith.negf %239 : vector<8x128xf32>
    %241 = math.exp %240 : vector<8x128xf32>
    %cst_109 = arith.constant 1.000000e+00 : f32
    %242 = vector.broadcast %cst_109 : f32 to vector<8x128xf32>
    %243 = arith.addf %242, %241 : vector<8x128xf32>
    %244 = arith.divf %242, %243 : vector<8x128xf32>
    %c0_110 = arith.constant 0 : index
    %c0_111 = arith.constant 0 : index
    %245 = vector.load %arg10[%c0_110, %c0_111] : memref<8x128xf32, #tpu.memory_space<vmem>>, vector<8x128xf32>
    %246 = arith.mulf %236, %245 : vector<8x128xf32>
    %247 = arith.mulf %230, %238 : vector<8x128xf32>
    %248 = arith.addf %246, %247 : vector<8x128xf32>
    %249 = math.tanh %248 : vector<8x128xf32>
    %250 = arith.mulf %244, %249 : vector<8x128xf32>
    %c0_112 = arith.constant 0 : index
    %c0_113 = arith.constant 0 : index
    %251 = vector.load %arg10[%c0_112, %c0_113] : memref<8x128xf32, #tpu.memory_space<vmem>>, vector<8x128xf32>
    tpu.vector_store %arg10[%c0_112, %c0_113], %248 {strides = array<i32>} : memref<8x128xf32, #tpu.memory_space<vmem>>, vector<8x128xf32>,
    %c0_114 = arith.constant 0 : index
    %c0_115 = arith.constant 0 : index
    %252 = vector.load %arg9[%c0_114, %c0_115] : memref<8x128xf32, #tpu.memory_space<vmem>>, vector<8x128xf32>
    tpu.vector_store %arg9[%c0_114, %c0_115], %250 {strides = array<i32>} : memref<8x128xf32, #tpu.memory_space<vmem>>, vector<8x128xf32>,
    %253 = arith.index_cast %218 : i32 to index
    %c0_116 = arith.constant 0 : index
    %c0_117 = arith.constant 0 : index
    %254 = vector.load %arg7[%253, %c0_116, %c0_117] : memref<8x8x128xf32, #tpu.memory_space<vmem>>, vector<1x8x128xf32>
    %255 = vector.shape_cast %254 : vector<1x8x128xf32> to vector<8x128xf32>
    %256 = vector.shape_cast %250 : vector<8x128xf32> to vector<1x8x128xf32>
    tpu.vector_store %arg7[%253, %c0_116, %c0_117], %256 {strides = array<i32>} : memref<8x8x128xf32, #tpu.memory_space<vmem>>, vector<1x8x128xf32>,
    %c6_i32 = arith.constant 6 : i32
    %c7_i32_118 = arith.constant 7 : i32
    %257 = arith.subi %c7_i32_118, %c6_i32 : i32
    %258 = arith.select %0, %257, %c6_i32 : i32
    %c0_119 = arith.constant 0 : index
    %c0_120 = arith.constant 0 : index
    %259 = vector.load %arg9[%c0_119, %c0_120] : memref<8x128xf32, #tpu.memory_space<vmem>>, vector<8x128xf32>
    %260 = arith.index_cast %258 : i32 to index
    %c0_121 = arith.constant 0 : index
    %c0_122 = arith.constant 0 : index
    %261 = vector.load %arg8[%260, %c0_121, %c0_122] : memref<8x8x512xf32, #tpu.memory_space<vmem>>, vector<1x8x512xf32>
    %262 = vector.shape_cast %261 : vector<1x8x512xf32> to vector<8x512xf32>
    %cst_123 = arith.constant dense<0.000000e+00> : vector<8x512xf32>
    %263 = tpu.matmul %259, %7, %cst_123 {dimension_numbers = #tpu.dot_dimension_numbers<[1], [0], [0], [1], [0, 0, 1, 1], [], []>} : vector<8x128xf32>, vector<128x512xf32>, vector<8x512xf32> -> vector<8x512xf32>
    %264 = arith.addf %262, %263 : vector<8x512xf32>
    %265 = vector.extract_strided_slice %264 {offsets = [0, 0], sizes = [8, 128], strides = [1, 1]} : vector<8x512xf32> to vector<8x128xf32>
    %266 = arith.negf %265 : vector<8x128xf32>
    %267 = math.exp %266 : vector<8x128xf32>
    %cst_124 = arith.constant 1.000000e+00 : f32
    %268 = vector.broadcast %cst_124 : f32 to vector<8x128xf32>
    %269 = arith.addf %268, %267 : vector<8x128xf32>
    %270 = arith.divf %268, %269 : vector<8x128xf32>
    %271 = vector.extract_strided_slice %264 {offsets = [0, 128], sizes = [8, 128], strides = [1, 1]} : vector<8x512xf32> to vector<8x128xf32>
    %272 = arith.negf %271 : vector<8x128xf32>
    %273 = math.exp %272 : vector<8x128xf32>
    %cst_125 = arith.constant 1.000000e+00 : f32
    %274 = vector.broadcast %cst_125 : f32 to vector<8x128xf32>
    %275 = arith.addf %274, %273 : vector<8x128xf32>
    %276 = arith.divf %274, %275 : vector<8x128xf32>
    %277 = vector.extract_strided_slice %264 {offsets = [0, 256], sizes = [8, 128], strides = [1, 1]} : vector<8x512xf32> to vector<8x128xf32>
    %278 = math.tanh %277 : vector<8x128xf32>
    %279 = vector.extract_strided_slice %264 {offsets = [0, 384], sizes = [8, 128], strides = [1, 1]} : vector<8x512xf32> to vector<8x128xf32>
    %280 = arith.negf %279 : vector<8x128xf32>
    %281 = math.exp %280 : vector<8x128xf32>
    %cst_126 = arith.constant 1.000000e+00 : f32
    %282 = vector.broadcast %cst_126 : f32 to vector<8x128xf32>
    %283 = arith.addf %282, %281 : vector<8x128xf32>
    %284 = arith.divf %282, %283 : vector<8x128xf32>
    %c0_127 = arith.constant 0 : index
    %c0_128 = arith.constant 0 : index
    %285 = vector.load %arg10[%c0_127, %c0_128] : memref<8x128xf32, #tpu.memory_space<vmem>>, vector<8x128xf32>
    %286 = arith.mulf %276, %285 : vector<8x128xf32>
    %287 = arith.mulf %270, %278 : vector<8x128xf32>
    %288 = arith.addf %286, %287 : vector<8x128xf32>
    %289 = math.tanh %288 : vector<8x128xf32>
    %290 = arith.mulf %284, %289 : vector<8x128xf32>
    %c0_129 = arith.constant 0 : index
    %c0_130 = arith.constant 0 : index
    %291 = vector.load %arg10[%c0_129, %c0_130] : memref<8x128xf32, #tpu.memory_space<vmem>>, vector<8x128xf32>
    tpu.vector_store %arg10[%c0_129, %c0_130], %288 {strides = array<i32>} : memref<8x128xf32, #tpu.memory_space<vmem>>, vector<8x128xf32>,
    %c0_131 = arith.constant 0 : index
    %c0_132 = arith.constant 0 : index
    %292 = vector.load %arg9[%c0_131, %c0_132] : memref<8x128xf32, #tpu.memory_space<vmem>>, vector<8x128xf32>
    tpu.vector_store %arg9[%c0_131, %c0_132], %290 {strides = array<i32>} : memref<8x128xf32, #tpu.memory_space<vmem>>, vector<8x128xf32>,
    %293 = arith.index_cast %258 : i32 to index
    %c0_133 = arith.constant 0 : index
    %c0_134 = arith.constant 0 : index
    %294 = vector.load %arg7[%293, %c0_133, %c0_134] : memref<8x8x128xf32, #tpu.memory_space<vmem>>, vector<1x8x128xf32>
    %295 = vector.shape_cast %294 : vector<1x8x128xf32> to vector<8x128xf32>
    %296 = vector.shape_cast %290 : vector<8x128xf32> to vector<1x8x128xf32>
    tpu.vector_store %arg7[%293, %c0_133, %c0_134], %296 {strides = array<i32>} : memref<8x8x128xf32, #tpu.memory_space<vmem>>, vector<1x8x128xf32>,
    %c7_i32_135 = arith.constant 7 : i32
    %c7_i32_136 = arith.constant 7 : i32
    %297 = arith.subi %c7_i32_136, %c7_i32_135 : i32
    %298 = arith.select %0, %297, %c7_i32_135 : i32
    %c0_137 = arith.constant 0 : index
    %c0_138 = arith.constant 0 : index
    %299 = vector.load %arg9[%c0_137, %c0_138] : memref<8x128xf32, #tpu.memory_space<vmem>>, vector<8x128xf32>
    %300 = arith.index_cast %298 : i32 to index
    %c0_139 = arith.constant 0 : index
    %c0_140 = arith.constant 0 : index
    %301 = vector.load %arg8[%300, %c0_139, %c0_140] : memref<8x8x512xf32, #tpu.memory_space<vmem>>, vector<1x8x512xf32>
    %302 = vector.shape_cast %301 : vector<1x8x512xf32> to vector<8x512xf32>
    %cst_141 = arith.constant dense<0.000000e+00> : vector<8x512xf32>
    %303 = tpu.matmul %299, %7, %cst_141 {dimension_numbers = #tpu.dot_dimension_numbers<[1], [0], [0], [1], [0, 0, 1, 1], [], []>} : vector<8x128xf32>, vector<128x512xf32>, vector<8x512xf32> -> vector<8x512xf32>
    %304 = arith.addf %302, %303 : vector<8x512xf32>
    %305 = vector.extract_strided_slice %304 {offsets = [0, 0], sizes = [8, 128], strides = [1, 1]} : vector<8x512xf32> to vector<8x128xf32>
    %306 = arith.negf %305 : vector<8x128xf32>
    %307 = math.exp %306 : vector<8x128xf32>
    %cst_142 = arith.constant 1.000000e+00 : f32
    %308 = vector.broadcast %cst_142 : f32 to vector<8x128xf32>
    %309 = arith.addf %308, %307 : vector<8x128xf32>
    %310 = arith.divf %308, %309 : vector<8x128xf32>
    %311 = vector.extract_strided_slice %304 {offsets = [0, 128], sizes = [8, 128], strides = [1, 1]} : vector<8x512xf32> to vector<8x128xf32>
    %312 = arith.negf %311 : vector<8x128xf32>
    %313 = math.exp %312 : vector<8x128xf32>
    %cst_143 = arith.constant 1.000000e+00 : f32
    %314 = vector.broadcast %cst_143 : f32 to vector<8x128xf32>
    %315 = arith.addf %314, %313 : vector<8x128xf32>
    %316 = arith.divf %314, %315 : vector<8x128xf32>
    %317 = vector.extract_strided_slice %304 {offsets = [0, 256], sizes = [8, 128], strides = [1, 1]} : vector<8x512xf32> to vector<8x128xf32>
    %318 = math.tanh %317 : vector<8x128xf32>
    %319 = vector.extract_strided_slice %304 {offsets = [0, 384], sizes = [8, 128], strides = [1, 1]} : vector<8x512xf32> to vector<8x128xf32>
    %320 = arith.negf %319 : vector<8x128xf32>
    %321 = math.exp %320 : vector<8x128xf32>
    %cst_144 = arith.constant 1.000000e+00 : f32
    %322 = vector.broadcast %cst_144 : f32 to vector<8x128xf32>
    %323 = arith.addf %322, %321 : vector<8x128xf32>
    %324 = arith.divf %322, %323 : vector<8x128xf32>
    %c0_145 = arith.constant 0 : index
    %c0_146 = arith.constant 0 : index
    %325 = vector.load %arg10[%c0_145, %c0_146] : memref<8x128xf32, #tpu.memory_space<vmem>>, vector<8x128xf32>
    %326 = arith.mulf %316, %325 : vector<8x128xf32>
    %327 = arith.mulf %310, %318 : vector<8x128xf32>
    %328 = arith.addf %326, %327 : vector<8x128xf32>
    %329 = math.tanh %328 : vector<8x128xf32>
    %330 = arith.mulf %324, %329 : vector<8x128xf32>
    %c0_147 = arith.constant 0 : index
    %c0_148 = arith.constant 0 : index
    %331 = vector.load %arg10[%c0_147, %c0_148] : memref<8x128xf32, #tpu.memory_space<vmem>>, vector<8x128xf32>
    tpu.vector_store %arg10[%c0_147, %c0_148], %328 {strides = array<i32>} : memref<8x128xf32, #tpu.memory_space<vmem>>, vector<8x128xf32>,
    %c0_149 = arith.constant 0 : index
    %c0_150 = arith.constant 0 : index
    %332 = vector.load %arg9[%c0_149, %c0_150] : memref<8x128xf32, #tpu.memory_space<vmem>>, vector<8x128xf32>
    tpu.vector_store %arg9[%c0_149, %c0_150], %330 {strides = array<i32>} : memref<8x128xf32, #tpu.memory_space<vmem>>, vector<8x128xf32>,
    %333 = arith.index_cast %298 : i32 to index
    %c0_151 = arith.constant 0 : index
    %c0_152 = arith.constant 0 : index
    %334 = vector.load %arg7[%333, %c0_151, %c0_152] : memref<8x8x128xf32, #tpu.memory_space<vmem>>, vector<1x8x128xf32>
    %335 = vector.shape_cast %334 : vector<1x8x128xf32> to vector<8x128xf32>
    %336 = vector.shape_cast %330 : vector<8x128xf32> to vector<1x8x128xf32>
    tpu.vector_store %arg7[%333, %c0_151, %c0_152], %336 {strides = array<i32>} : memref<8x8x128xf32, #tpu.memory_space<vmem>>, vector<1x8x128xf32>,
    %c8_i32 = arith.constant 8 : i32
    return
  }
  func.func @transform_0(%arg0: i32, %arg1: i32, %arg2: i32) -> (i32, i32, i32) {
    %c1_i32 = arith.constant 1 : i32
    %0 = arith.subi %c1_i32, %arg0 : i32
    %1 = arith.muli %0, %arg2 : i32
    %c0_i32 = arith.constant 0 : i32
    %2 = arith.subi %c0_i32, %arg2 : i32
    %3 = arith.muli %arg0, %2 : i32
    %4 = arith.addi %1, %3 : i32
    %c0_i32_0 = arith.constant 0 : i32
    %c0_i32_1 = arith.constant 0 : i32
    return %4, %arg1, %c0_i32_0 : i32, i32, i32
  }
  func.func @transform_1(%arg0: i32, %arg1: i32, %arg2: i32) -> (i32, i32, i32) {
    %c0_i32 = arith.constant 0 : i32
    %c0_i32_0 = arith.constant 0 : i32
    %c0_i32_1 = arith.constant 0 : i32
    return %arg0, %c0_i32, %c0_i32_0 : i32, i32, i32
  }
  func.func @transform_2(%arg0: i32, %arg1: i32, %arg2: i32) -> (i32, i32, i32) {
    %c0_i32 = arith.constant 0 : i32
    %c0_i32_0 = arith.constant 0 : i32
    %c0_i32_1 = arith.constant 0 : i32
    return %arg0, %c0_i32, %c0_i32_0 : i32, i32, i32
  }
  func.func @transform_3(%arg0: i32, %arg1: i32, %arg2: i32) -> (i32, i32, i32) {
    %c0_i32 = arith.constant 0 : i32
    %c0_i32_0 = arith.constant 0 : i32
    %c0_i32_1 = arith.constant 0 : i32
    return %arg0, %c0_i32, %c0_i32_0 : i32, i32, i32
  }
  func.func @transform_4(%arg0: i32, %arg1: i32, %arg2: i32) -> (i32, i32, i32) {
    %c1_i32 = arith.constant 1 : i32
    %0 = arith.subi %c1_i32, %arg0 : i32
    %1 = arith.muli %0, %arg2 : i32
    %c0_i32 = arith.constant 0 : i32
    %2 = arith.subi %c0_i32, %arg2 : i32
    %3 = arith.muli %arg0, %2 : i32
    %4 = arith.addi %1, %3 : i32
    %c0_i32_0 = arith.constant 0 : i32
    return %4, %arg1, %arg0 : i32, i32, i32
  }
}

</mosaic_0001>

<bundles_post_ra>
// kernel: _lambda_.2
= control target key start
LH: loop header
LB: loop body
LE: loop exit
PB: predicated region body
PF: predicated region fallthrough
CT: control target
= control target key end

     0   :  { %9 = vsyncpa [#allocation6], 0  ;;  %s4232_s0 = inlined_call_operand.vmem [shape: f32[8,8,16], index: 0, kind: input, shape index: {}]   ;;  %s4233_s1 = inlined_call_operand.hbm [shape: f32[2,16,512], index: 1, kind: input, shape index: {}]   ;;  %s4234_s2 = inlined_call_operand.hbm [shape: f32[2,128,512], index: 2, kind: input, shape index: {}]   ;;  %s4235_s3 = inlined_call_operand.vmem [shape: f32[2,1,512], index: 3, kind: input, shape index: {}]   ;;  %s4236_s4 = inlined_call_operand.vmem [shape: f32[8,8,256], index: 4, kind: output, shape index: {}]  }
   0x1   :  { %11 = vsyncpa [#allocation6 + $0x1], 0 }
   0x2   :  { %12 = vsyncpa [#allocation8], 0 }
   0x3   :  { %14 = vsyncpa [#allocation8 + $0x1], 0  ;;  %s2979_s15 = smov 0   ;;  %s2981_s16 = smov 0  }
   0x4   :  { %s2983_s17 = smov 0   ;;  %s2985_s18 = smov 0  }
   0x5   :  { %s2987_s19 = smov 0   ;;  %s2989_s20 = smov 0  }
   0x6 LB: > { %s2488_s21 = sadd.s32 4294967295, %s2947_s20   ;;  %s39_s22 = sadd.s32 1, %s2943_s19  ;;  %s2947_s20 = sphi %s2989_s20, %s20_s20   ;;  %s2943_s19 = sphi %s2987_s19, %s4461_s19   ;;  %s2939_s18 = sphi %s2985_s18, %s4460_s18   ;;  %s2935_s17 = sphi %s2983_s17, %s4459_s17   ;;  %s2931_s16 = sphi %s2981_s16, %s4458_s16   ;;  %s2927_s15 = sphi %s2979_s15, %s4457_s15  }
   0x7   : > { %p41_p0 = scmp.ge.s32.totalorder %s39_s22, 2  ;;  %s84_s23 = sadd.s32 1, %s2935_s17 }
   0x8   : > { %p91_p1 = scmp.ne.s32.totalorder %s2935_s17, %s2931_s16  ;;  %p92_p2 = scmp.eq.s32.totalorder %s2947_s20, 0 }
   0x9   : > { %s4463_s22 = smov (%p41_p0, %s39_s22), 0  ;;  %p97_p4 = scmp.ne.s32.totalorder %s2931_s16, %s2927_s15 }
   0xa   : > { %p3015_p3 = por %p92_p2, %p91_p1  ;;  %s81_s25 = ssub.s32 %s2943_s19, %s4463_s22 }
   0xb   : > { %p98_p5 = scmp.eq.s32.totalorder %s2488_s21, 0  ;;  %p82_p6 = scmp.eq.s32.totalorder %s81_s25, 0 }
   0xc   : > { %p187_p7 = scmp.eq.s32.totalorder %s2488_s21, 1  ;;  %p2593_p10 = scmp.lt.s32.totalorder %s2947_s20, 2 }
   0xd   : > { %p3022_p8 = por %p98_p5, %p97_p4  ;;  %s3035_s29 = sand.u32 1, %s2935_s17  }
   0xe   : > { %s3027_s27 = scalar_select %p82_p6, %s2935_s17, %s84_s23  }
   0xf   : > { %p3029_p9 = por %p187_p7, %p91_p1  ;;  %s2572_s30 = sshll.u32 %s2943_s19, 10 }
  0x10   : > { %s2493_s5 = sshll.u32 %s3035_s29, 6  ;;  %s245_s8 = scalar_lea.hbm %s4233_s1, %s2572_s30 }
  0x11   : > { %s239_s9 = scalar_lea.vmem [#allocation5], %s2493_s5  ;;  %p3044_p11 = pnand %p2593_p10, %p3015_p3 }
  0x12   : > { %s246_s10 = sshll.u32 %s239_s9, 4  ;;  %s236_s12 = scalar_lea.sflag [#allocation6], %s3035_s29  ;;  %s247_s10 = int_to_ptr.vmem [resolvable:$true] %s246_s10 }
  0x13   : > { %p2839_p12 = pneg %p3044_p11  ;;  %s2850_s13 = scalar_lea.vmem %s247_s10, 1024 }
  0x14   : > { %p2851_p13 = scmp.ne.s32.totalorder %s247_s10, %s2850_s13  ;;  %s2949_s14 = smov [#allocation5]  }
  0x15   : > { %s2855_s15 = sshll.u32 %s2949_s14, 4  ;;  %s2856_s15 = int_to_ptr.vmem [resolvable:$false] %s2855_s15 }
  0x16   : > { %p2853_p0 = pnand %p2851_p13, %p2839_p12  ;;  %s2857_s21 = scalar_lea.vmem %s2856_s15, 2048 }
  0x17   : > { %p2858_p2 = scmp.lt.s32.totalorder %s247_s10, %s2856_s15  ;;  %p2859_p3 = scmp.lt.s32.totalorder %s2857_s21, %s2850_s13 }
  0x18   : > { %p2854_p1 = pneg %p2853_p0 }
  0x19   : > { %p2860_p4 = por %p2859_p3, %p2858_p2 }
  0x1b   : > { %p2861_p5 = pnand %p2860_p4, %p2854_p1 }
  0x1d   : > { %2864 = shalt.err (!%p2861_p5)
}
  0x1e   : > { %s2950_s23 = smov 512   ;;  %s2951_s24 = smov 32  }
  0x1f   : > { %2589 = dma.hbm_to_vmem [thread:$0]  (!%p3044_p11), %s245_s8, 1024, %s247_s10, %s236_s12, %s2950_s23, %s2950_s23, %s2951_s24  }
  0x20   : > { %p2499_p6 = scmp.ge.s32.totalorder %s2947_s20, 1  ;;  %p282_p7 = scmp.lt.s32.totalorder %s2947_s20, 3 }
  0x21   : > { %s2496_s25 = sshll.u32 %s3035_s29, 9  ;;  %s2573_s5 = sshll.u32 %s2943_s19, 13 }
  0x22   : > { %p3062_p10 = pnand %p2499_p6, %p282_p7  ;;  %s260_s6 = scalar_lea.vmem [#allocation7], %s2496_s25 }
  0x23   : > { %s267_s7 = sshll.u32 %s260_s6, 4  ;;  %s266_s14 = scalar_lea.hbm %s4234_s2, %s2573_s5  ;;  %s268_s7 = int_to_ptr.vmem [resolvable:$true] %s267_s7 }
  0x24   : > { %s257_s15 = scalar_lea.sflag [#allocation8], %s3035_s29  ;;  %s2878_s21 = scalar_lea.vmem %s268_s7, 8192 }
  0x25   : > { %p2879_p13 = scmp.ne.s32.totalorder %s268_s7, %s2878_s21  ;;  %s2952_s8 = smov [#allocation7]  }
  0x26   : > { %s2883_s10 = sshll.u32 %s2952_s8, 4  ;;  %s2884_s10 = int_to_ptr.vmem [resolvable:$false] %s2883_s10 }
  0x27   : > { %p2881_p0 = pnand %p2879_p13, %p2839_p12  ;;  %s2885_s12 = scalar_lea.vmem %s2884_s10, 16384 }
  0x28   : > { %p2886_p2 = scmp.lt.s32.totalorder %s268_s7, %s2884_s10  ;;  %p2887_p3 = scmp.lt.s32.totalorder %s2885_s12, %s2878_s21 }
  0x29   : > { %p2882_p1 = pneg %p2881_p0 }
  0x2a   : > { %p2888_p4 = por %p2887_p3, %p2886_p2 }
  0x2c   : > { %p2889_p5 = pnand %p2888_p4, %p2882_p1 }
  0x2e   : > { %2892 = shalt.err (!%p2889_p5)
}
  0x2f   : > { %2592 = dma.hbm_to_vmem [thread:$0]  (!%p3044_p11), %s266_s14, 8192, %s268_s7, %s257_s15, %s2950_s23, %s2950_s23, %s2951_s24  }
  0x30   : > { %286 = sbr.rel (%p3062_p10) target bundleno = 2120 (0x848), region = 36 }
  0x35   : > { %s3082_s29 = sand.u32 1, %s2931_s16  }
  0x36   : > { %s2500_s25 = sshll.u32 %s3082_s29, 6  ;;  %s289_s5 = scalar_lea.sflag [#allocation6], %s3082_s29 }
  0x37   : > { %s292_s6 = scalar_lea.vmem [#allocation5], %s2500_s25 }
  0x38   : > { %2918 = dma.done.wait (%p3022_p8), %s289_s5, 1024  }
  0x39   : > { %2920 = vsyncadd (%p3022_p8), %s289_s5, 4294966272  ;;  %s2501_s11 = sshll.u32 %s3082_s29, 9  ;;  %s298_s23 = scalar_lea.sflag [#allocation8], %s3082_s29 }
  0x3a   : > { %s3094_s24 = scalar_lea.vmem [#allocation7], %s2501_s11 }
  0x3b   : > { %2922 = dma.done.wait (%p3022_p8), %s298_s23, 8192  }
  0x3c   : > { %2924 = vsyncadd (%p3022_p8), %s298_s23, 4294959104  ;;  %v4239_v0 = vmov 0.0   ;;  %v388_v1 = vld [vmem:[%s292_s6 + $0x28] sm:$0xff]  ;;  %v390_v2 = vld [vmem:[%s292_s6 + $0x38] sm:$0xff]  ;;  %vm485_vm0 = vcmask 130048   ;;  %p366_p8 = scmp.lt.s32.totalorder %s2939_s18, 1 }
  0x3d   : > { %574 = vmatprep.mubr.f32.mxu0 %v4239_v0  ;;  %687 = vmatprep.mubr.f32.mxu1 %v4239_v0  ;;  %v387_v3 = vld [vmem:[%s292_s6 + $0x20] sm:$0xff]  ;;  %v389_v4 = vld [vmem:[%s292_s6 + $0x30] sm:$0xff]  ;;  %v384_v5 = vld [vmem:[%s292_s6 + $0x8] sm:$0xff]  ;;  %p376_p11 = scmp.eq.s32.totalorder %s2939_s18, 1  ;;  %s3541_s12 = scalar_lea.vmem [#allocation9], %s2500_s25 }
  0x3e   : > { %538 = vmatprep.subr.mxu0 %v388_v1  ;;  %651 = vmatprep.subr.mxu1 %v390_v2  ;;  %v386_v6 = vld [vmem:[%s292_s6 + $0x18] sm:$0xff]  ;;  %v383_v7 = vld [vmem:[%s292_s6] sm:$0xff]  ;;  %v385_v8 = vld [vmem:[%s292_s6 + $0x10] sm:$0xff]  ;;  %s367_s30 = scalar_select %p366_p8, %s2939_s18, 1 }
  0x3f   : > { %539 = vmatpush1.msra.mxu0 %v387_v3  ;;  %652 = vmatpush1.msra.mxu1 %v389_v4  ;;  %v456_v9 = vld [vmem:[%s4232_s0] sm:$0xff]  ;;  %v3106_v10 = vld [vmem:[%s3094_s24 + $0x1e8] sm:$0xff]  ;;  %v3109_v11 = vld [vmem:[%s3094_s24 + $0x1f8] sm:$0xff]  ;;  %s3528_s15 = scalar_select %p376_p11, 7, 0 }
  0x40   : > { %540 = vmatprep.subr.mxu0 %v384_v5  ;;  %653 = vmatprep.subr.mxu1 %v386_v6  ;;  %4322 = vst [vmem:[#allocation12_spill] sm:$0xff] %v3106_v10  ;;  %4323 = vst [vmem:[#allocation13_spill] sm:$0xff] %v3109_v11  ;;  %v3114_v12 = vld [vmem:[%s3094_s24 + $0x1e0] sm:$0xff]  ;;  %v3117_v13 = vld [vmem:[%s3094_s24 + $0x1f0] sm:$0xff]  ;;  %s2503_s7 = sshll.u32 %s367_s30, 2 }
  0x41   : > { %541 = vmatpush1.msra.mxu0 %v383_v7  ;;  %654 = vmatpush1.msra.mxu1 %v385_v8  ;;  %v457_v14 = vld [vmem:[%s4232_s0 + $0x8] sm:$0xff]  ;;  %v3131_v16 = vld [vmem:[%s3094_s24 + $0x1c0] sm:$0xff]  ;;  %v3140_v18 = vld [vmem:[%s3094_s24 + $0x1d8] sm:$0xff]  ;;  %s369_s14 = scalar_lea.vmem %s4235_s3, %s2503_s7  ;;  %s2574_s21 = sshll.u32 %s3528_s15, 5 }
  0x42   : > { %2504 = vmatmul.mubr.msk.f32.vlgmr.msra.gmra.mxu0 %vm485_vm0, %v456_v9  ;;  %2512 = vmatmul.mubr.msk.f32.vlgmr.msra.gmra.mxu1 %vm485_vm0, %v456_v9  ;;  %v3126_v15 = vld [vmem:[%s3094_s24 + $0x1c8] sm:$0xff]  ;;  %v458_v19 = vld [vmem:[%s4232_s0 + $0x10] sm:$0xff]  ;;  %v3150_v20 = vld [vmem:[%s3094_s24 + $0x1a0] sm:$0xff]  ;;  %s772_s8 = scalar_lea.vmem [#allocation2], %s2574_s21  ;;  %s2525_s10 = sshll.u32 %s3528_s15, 3 }
  0x43   : > { %580 = vmatprep.mubr.f32.mxu0 %v4239_v0  ;;  %693 = vmatprep.mubr.f32.mxu1 %v4239_v0  ;;  %v3137_v17 = vld [vmem:[%s3094_s24 + $0x1a8] sm:$0xff]  ;;  %v3153_v21 = vld [vmem:[%s3094_s24 + $0x1d0] sm:$0xff]  ;;  %v3161_v23 = vld [vmem:[%s3094_s24 + $0x1b8] sm:$0xff]  ;;  %s951_s5 = scalar_lea.vmem %s3541_s12, %s2525_s10 [#allocation9] }
  0x44   : > { %777 = vmatprep.subr.mxu0 %v3106_v10  ;;  %848 = vmatprep.subr.mxu1 %v3109_v11  ;;  %v3158_v22 = vld [vmem:[%s3094_s24 + $0x188] sm:$0xff]  ;;  %v3168_v24 = vld [vmem:[%s3094_s24 + $0x180] sm:$0xff]  ;;  %v3171_v25 = vld [vmem:[%s3094_s24 + $0x1b0] sm:$0xff]  ;;  %s3612_s29 = scalar_select %p376_p11, 6, 1 }
  0x45   : > { %778 = vmatpush1.msra.mxu0 %v3114_v12  ;;  %849 = vmatpush1.msra.mxu1 %v3117_v13  ;;  %v459_v26 = vld [vmem:[%s4232_s0 + $0x18] sm:$0xff]  ;;  %v3181_v27 = vld [vmem:[%s3094_s24 + $0x168] sm:$0xff]  ;;  %v3189_v29 = vld [vmem:[%s3094_s24 + $0x160] sm:$0xff]  ;;  %s3695_s26 = scalar_select %p376_p11, 5, 2 }
  0x46   : > { %2505 = vmatmul.mubr.msk.f32.gmra.mxu0 %vm485_vm0, %v457_v14  ;;  %2513 = vmatmul.mubr.msk.f32.gmra.mxu1 %vm485_vm0, %v457_v14  ;;  %v3184_v28 = vld [vmem:[%s3094_s24 + $0x198] sm:$0xff]  ;;  %v3192_v30 = vld [vmem:[%s3094_s24 + $0x190] sm:$0xff]  ;;  %v3197_v31 = vld [vmem:[%s3094_s24 + $0x148] sm:$0xff]  ;;  %s2575_s25 = sshll.u32 %s3612_s29, 5  ;;  %s2531_s11 = sshll.u32 %s3612_s29, 3 }
  0x47   : > { %779 = vmatprep.subr.mxu0 %v3126_v15  ;;  %586 = vmatprep.mubr.f32.mxu0 %v4239_v0  ;;  %v3200_v32 = vld [vmem:[%s3094_s24 + $0x178] sm:$0xff]  ;;  %v3207_v33 = vld [vmem:[%s3094_s24 + $0x140] sm:$0xff]  ;;  %v3210_v34 = vld [vmem:[%s3094_s24 + $0x170] sm:$0xff]  ;;  %s957_s6 = scalar_lea.vmem [#allocation2], %s2575_s25  ;;  %s1136_s23 = scalar_lea.vmem %s3541_s12, %s2531_s11 [#allocation9] }
  0x48   : > { %699 = vmatprep.mubr.f32.mxu1 %v4239_v0  ;;  %780 = vmatpush1.msra.mxu0 %v3131_v16  ;;  %v460_v35 = vld [vmem:[%s4232_s0 + $0x20] sm:$0xff]  ;;  %v3220_v36 = vld [vmem:[%s3094_s24 + $0x128] sm:$0xff]  ;;  %v3223_v37 = vld [vmem:[%s3094_s24 + $0x158] sm:$0xff]  ;;  %s2576_s30 = sshll.u32 %s3695_s26, 5  ;;  %s2537_s9 = sshll.u32 %s3695_s26, 3 }
  0x49   : > { %781 = vmatprep.subr.mxu0 %v3137_v17  ;;  %850 = vmatprep.subr.mxu1 %v3140_v18  ;;  %v3228_v38 = vld [vmem:[%s3094_s24 + $0x120] sm:$0xff]  ;;  %v3231_v39 = vld [vmem:[%s3094_s24 + $0x150] sm:$0xff]  ;;  %v3236_v40 = vld [vmem:[%s3094_s24 + $0x108] sm:$0xff]  ;;  %s1142_s7 = scalar_lea.vmem [#allocation2], %s2576_s30  ;;  %s1321_s13 = scalar_lea.vmem %s3541_s12, %s2537_s9 [#allocation9] }
  0x4a   : > { %2506 = vmatmul.mubr.msk.f32.gmra.mxu0 %vm485_vm0, %v458_v19  ;;  %2514 = vmatmul.mubr.msk.f32.gmra.mxu1 %vm485_vm0, %v458_v19  ;;  %v3239_v41 = vld [vmem:[%s3094_s24 + $0x138] sm:$0xff]  ;;  %v3246_v42 = vld [vmem:[%s3094_s24 + $0x100] sm:$0xff]  ;;  %v3249_v43 = vld [vmem:[%s3094_s24 + $0x130] sm:$0xff]  ;;  %s4035_s10 = scalar_select %p376_p11, 3, 4 }
  0x4b   : > { %782 = vmatpush1.msra.mxu0 %v3150_v20  ;;  %851 = vmatpush1.msra.mxu1 %v3153_v21  ;;  %v461_v44 = vld [vmem:[%s4232_s0 + $0x28] sm:$0xff]  ;;  %v3262_v46 = vld [vmem:[%s3094_s24 + $0x118] sm:$0xff]  ;;  %v3267_v47 = vld [vmem:[%s3094_s24 + $0xe0] sm:$0xff]  ;;  %s4112_s11 = scalar_select %p376_p11, 2, 5 }
  0x4c   : > { %783 = vmatprep.subr.mxu0 %v3158_v22  ;;  %852 = vmatprep.subr.mxu1 %v3161_v23  ;;  %v3259_v45 = vld [vmem:[%s3094_s24 + $0xe8] sm:$0xff]  ;;  %v3270_v48 = vld [vmem:[%s3094_s24 + $0x110] sm:$0xff]  ;;  %v3278_v50 = vld [vmem:[%s3094_s24 + $0xf8] sm:$0xff]  ;;  %s2549_s25 = sshll.u32 %s4035_s10, 3 }
  0x4d   : > { %592 = vmatprep.mubr.f32.mxu0 %v4239_v0  ;;  %705 = vmatprep.mubr.f32.mxu1 %v4239_v0  ;;  %v3275_v49 = vld [vmem:[%s3094_s24 + $0xc8] sm:$0xff]  ;;  %v3285_v51 = vld [vmem:[%s3094_s24 + $0xc0] sm:$0xff]  ;;  %v3288_v52 = vld [vmem:[%s3094_s24 + $0xf0] sm:$0xff]  ;;  %s2555_s30 = sshll.u32 %s4112_s11, 3 }
  0x4e   : > { %784 = vmatpush1.msra.mxu0 %v3168_v24  ;;  %853 = vmatpush1.msra.mxu1 %v3171_v25  ;;  %v462_v53 = vld [vmem:[%s4232_s0 + $0x30] sm:$0xff]  ;;  %v3298_v54 = vld [vmem:[%s3094_s24 + $0xa8] sm:$0xff]  ;;  %v3301_v55 = vld [vmem:[%s3094_s24 + $0xd8] sm:$0xff]  ;;  %s4187_s9 = scalar_select %p376_p11, 1, 6 }
  0x4f   : > { %2507 = vmatmul.mubr.msk.f32.gmra.mxu0 %vm485_vm0, %v459_v26  ;;  %2515 = vmatmul.mubr.msk.f32.gmra.mxu1 %vm485_vm0, %v459_v26  ;;  %v3306_v56 = vld [vmem:[%s3094_s24 + $0xa0] sm:$0xff]  ;;  %v3309_v57 = vld [vmem:[%s3094_s24 + $0xd0] sm:$0xff]  ;;  %v3314_v58 = vld [vmem:[%s3094_s24 + $0x88] sm:$0xff] }
  0x50   : > { %785 = vmatprep.subr.mxu0 %v3181_v27  ;;  %854 = vmatprep.subr.mxu1 %v3184_v28  ;;  %v3317_v59 = vld [vmem:[%s3094_s24 + $0xb8] sm:$0xff]  ;;  %v3324_v60 = vld [vmem:[%s3094_s24 + $0x80] sm:$0xff]  ;;  %v3327_v61 = vld [vmem:[%s3094_s24 + $0xb0] sm:$0xff] }
  0x51   : > { %786 = vmatpush1.msra.mxu0 %v3189_v29  ;;  %855 = vmatpush1.msra.mxu1 %v3192_v30  ;;  %v463_v62 = vld [vmem:[%s4232_s0 + $0x38] sm:$0xff]  ;;  %v3337_v63 = vld [vmem:[%s3094_s24 + $0x68] sm:$0xff]  ;;  %v3345_v2 = vld [vmem:[%s3094_s24 + $0x60] sm:$0xff] }
  0x52   : > { %787 = vmatprep.subr.mxu0 %v3197_v31  ;;  %856 = vmatprep.subr.mxu1 %v3200_v32  ;;  %4324 = vst [vmem:[#allocation14_spill] sm:$0xff] %v3337_v63  ;;  %v3340_v1 = vld [vmem:[%s3094_s24 + $0x98] sm:$0xff]  ;;  %4325 = vst [vmem:[#allocation15_spill] sm:$0xff] %v3345_v2  ;;  %v3348_v3 = vld [vmem:[%s3094_s24 + $0x90] sm:$0xff] }
  0x53   : > { %598 = vmatprep.mubr.f32.mxu0 %v4239_v0  ;;  %711 = vmatprep.mubr.f32.mxu1 %v4239_v0  ;;  %4326 = vst [vmem:[#allocation16_spill] sm:$0xff] %v3348_v3  ;;  %v3353_v4 = vld [vmem:[%s3094_s24 + $0x48] sm:$0xff]  ;;  %v3356_v5 = vld [vmem:[%s3094_s24 + $0x78] sm:$0xff]  ;;  %v3361_v6 = vld [vmem:[%s3094_s24 + $0x40] sm:$0xff] }
  0x54   : > { %788 = vmatpush1.msra.mxu0 %v3207_v33  ;;  %857 = vmatpush1.msra.mxu1 %v3210_v34  ;;  %4327 = vst [vmem:[#allocation17_spill] sm:$0xff] %v3353_v4  ;;  %4328 = vst [vmem:[#allocation18_spill] sm:$0xff] %v3356_v5  ;;  %v3364_v7 = vld [vmem:[%s3094_s24 + $0x70] sm:$0xff]  ;;  %v3369_v8 = vld [vmem:[%s3094_s24 + $0x28] sm:$0xff] }
  0x55   : > { %2508 = vmatmul.mubr.msk.f32.gmra.mxu0 %vm485_vm0, %v460_v35  ;;  %2516 = vmatmul.mubr.msk.f32.gmra.mxu1 %vm485_vm0, %v460_v35  ;;  %4329 = vst [vmem:[#allocation19_spill] sm:$0xff] %v3361_v6  ;;  %4330 = vst [vmem:[#allocation20_spill] sm:$0xff] %v3364_v7  ;;  %v3372_v9 = vld [vmem:[%s3094_s24 + $0x58] sm:$0xff]  ;;  %v3377_v14 = vld [vmem:[%s3094_s24 + $0x20] sm:$0xff] }
  0x56   : > { %789 = vmatprep.subr.mxu0 %v3220_v36  ;;  %858 = vmatprep.subr.mxu1 %v3223_v37  ;;  %4331 = vst [vmem:[#allocation21_spill] sm:$0xff] %v3369_v8  ;;  %4332 = vst [vmem:[#allocation22_spill] sm:$0xff] %v3372_v9  ;;  %v3380_v19 = vld [vmem:[%s3094_s24 + $0x50] sm:$0xff]  ;;  %v3385_v26 = vld [vmem:[%s3094_s24 + $0x8] sm:$0xff] }
  0x57   : > { %790 = vmatpush1.msra.mxu0 %v3228_v38  ;;  %859 = vmatpush1.msra.mxu1 %v3231_v39  ;;  %4333 = vst [vmem:[#allocation23_spill] sm:$0xff] %v3377_v14  ;;  %4334 = vst [vmem:[#allocation24_spill] sm:$0xff] %v3380_v19  ;;  %v3388_v35 = vld [vmem:[%s3094_s24 + $0x38] sm:$0xff] }
  0x58   : > { %791 = vmatprep.subr.mxu0 %v3236_v40  ;;  %860 = vmatprep.subr.mxu1 %v3239_v41  ;;  %4335 = vst [vmem:[#allocation25_spill] sm:$0xff] %v3385_v26  ;;  %4336 = vst [vmem:[#allocation26_spill] sm:$0xff] %v3388_v35 }
  0x59   : > { %604 = vmatprep.mubr.f32.mxu0 %v4239_v0  ;;  %717 = vmatprep.mubr.f32.mxu1 %v4239_v0 }
  0x5a   : > { %792 = vmatpush1.msra.mxu0 %v3246_v42  ;;  %861 = vmatpush1.msra.mxu1 %v3249_v43 }
  0x5b   : > { %2509 = vmatmul.mubr.msk.f32.gmra.mxu0 %vm485_vm0, %v461_v44  ;;  %2517 = vmatmul.mubr.msk.f32.gmra.mxu1 %vm485_vm0, %v461_v44  ;;  %v3393_v44 = vld [vmem:[%s3094_s24] sm:$0xff] }
  0x5c   : > { %793 = vmatprep.subr.mxu0 %v3259_v45  ;;  %862 = vmatprep.subr.mxu1 %v3262_v46  ;;  %4337 = vst [vmem:[#allocation27_spill] sm:$0xff] %v3393_v44 }
  0x5d   : > { %794 = vmatpush1.msra.mxu0 %v3267_v47  ;;  %863 = vmatpush1.msra.mxu1 %v3270_v48 }
  0x5e   : > { %795 = vmatprep.subr.mxu0 %v3275_v49  ;;  %864 = vmatprep.subr.mxu1 %v3278_v50 }
  0x5f   : > { %610 = vmatprep.mubr.f32.mxu0 %v4239_v0  ;;  %723 = vmatprep.mubr.f32.mxu1 %v4239_v0 }
  0x60   : > { %796 = vmatpush1.msra.mxu0 %v3285_v51  ;;  %865 = vmatpush1.msra.mxu1 %v3288_v52 }
  0x61   : > { %2510 = vmatmul.mubr.msk.f32.gmra.mxu0 %vm485_vm0, %v462_v53  ;;  %2518 = vmatmul.mubr.msk.f32.gmra.mxu1 %vm485_vm0, %v462_v53  ;;  %v3398_v53 = vld [vmem:[%s3094_s24 + $0x30] sm:$0xff] }
  0x62   : > { %797 = vmatprep.subr.mxu0 %v3298_v54  ;;  %866 = vmatprep.subr.mxu1 %v3301_v55  ;;  %4338 = vst [vmem:[#allocation28_spill] sm:$0xff] %v3398_v53 }
  0x63   : > { %798 = vmatpush1.msra.mxu0 %v3306_v56  ;;  %867 = vmatpush1.msra.mxu1 %v3309_v57 }
  0x64   : > { %799 = vmatprep.subr.mxu0 %v3314_v58  ;;  %868 = vmatprep.subr.mxu1 %v3317_v59 }
  0x65   : > { %616 = vmatprep.mubr.f32.mxu0 %v4239_v0  ;;  %729 = vmatprep.mubr.f32.mxu1 %v4239_v0 }
  0x66   : > { %800 = vmatpush1.msra.mxu0 %v3324_v60  ;;  %869 = vmatpush1.msra.mxu1 %v3327_v61 }
  0x67   : > { %2511 = vmatmul.mubr.msk.f32.gmra.mxu0 %vm485_vm0, %v463_v62  ;;  %2519 = vmatmul.mubr.msk.f32.gmra.mxu1 %vm485_vm0, %v463_v62  ;;  %v3403_v62 = vld [vmem:[%s3094_s24 + $0x18] sm:$0xff] }
  0x68   : > { %801 = vmatprep.subr.mxu0 %v3337_v63  ;;  %870 = vmatprep.subr.mxu1 %v3340_v1  ;;  %4339 = vst [vmem:[#allocation29_spill] sm:$0xff] %v3403_v62 }
  0x69   : > { %802 = vmatpush1.msra.mxu0 %v3345_v2  ;;  %871 = vmatpush1.msra.mxu1 %v3348_v3 }
  0x6a   : > { %803 = vmatprep.subr.mxu0 %v3353_v4  ;;  %872 = vmatprep.subr.mxu1 %v3356_v5 }
  0x6b   : > { %804 = vmatpush1.msra.mxu0 %v3361_v6  ;;  %873 = vmatpush1.msra.mxu1 %v3364_v7 }
  0x6c   : > { %805 = vmatprep.subr.mxu0 %v3369_v8  ;;  %874 = vmatprep.subr.mxu1 %v3372_v9  ;;  %v3408_v8 = vld [vmem:[%s3094_s24 + $0x10] sm:$0xff] }
  0x6d   : > { %806 = vmatpush1.msra.mxu0 %v3377_v14  ;;  %875 = vmatpush1.msra.mxu1 %v3380_v19  ;;  %4340 = vst [vmem:[#allocation30_spill] sm:$0xff] %v3408_v8 }
  0x6e   : > { %807 = vmatprep.subr.mxu0 %v3385_v26  ;;  %876 = vmatprep.subr.mxu1 %v3388_v35 }
  0x6f   : > { %808 = vmatpush1.msra.mxu0 %v3393_v44  ;;  %841 = vmatprep.mubr.f32.mxu0 %v4239_v0 }
  0x70   : > { %877 = vmatpush1.msra.mxu1 %v3398_v53  ;;  %842 = vmatmul.mubr.f32.vlgmr.msra.gmra.mxu0 %v4239_v0 }
  0x71   : > { %878 = vmatprep.subr.mxu1 %v3403_v62  ;;  %912 = vmatprep.mubr.f32.mxu1 %v4239_v0 }
  0x72   : > { %879 = vmatpush1.msra.mxu1 %v3408_v8  ;;  %962 = vmatprep.subr.mxu0 %v3106_v10 }
  0x73   : > { %913 = vmatmul.mubr.f32.vlgmr.msra.gmra.mxu1 %v4239_v0  ;;  %1033 = vmatprep.subr.mxu1 %v3109_v11  ;;  %v4341_v0 = vld [vmem:[#allocation21_spill] sm:$0xff] }
  0x74   : > { %963 = vmatpush1.msra.mxu0 %v3114_v12  ;;  %1034 = vmatpush1.msra.mxu1 %v3117_v13 }
  0x75   : > { %964 = vmatprep.subr.mxu0 %v3126_v15  ;;  %1035 = vmatprep.subr.mxu1 %v3140_v18 }
  0x76   : > { %965 = vmatpush1.msra.mxu0 %v3131_v16  ;;  %1036 = vmatpush1.msra.mxu1 %v3153_v21 }
  0x77   : > { %966 = vmatprep.subr.mxu0 %v3137_v17  ;;  %1037 = vmatprep.subr.mxu1 %v3161_v23 }
  0x78   : > { %967 = vmatpush1.msra.mxu0 %v3150_v20  ;;  %1038 = vmatpush1.msra.mxu1 %v3171_v25 }
  0x79   : > { %968 = vmatprep.subr.mxu0 %v3158_v22  ;;  %1039 = vmatprep.subr.mxu1 %v3184_v28 }
  0x7a   : > { %969 = vmatpush1.msra.mxu0 %v3168_v24  ;;  %1040 = vmatpush1.msra.mxu1 %v3192_v30 }
  0x7b   : > { %970 = vmatprep.subr.mxu0 %v3181_v27  ;;  %1041 = vmatprep.subr.mxu1 %v3200_v32 }
  0x7c   : > { %971 = vmatpush1.msra.mxu0 %v3189_v29  ;;  %1042 = vmatpush1.msra.mxu1 %v3210_v34 }
  0x7d   : > { %972 = vmatprep.subr.mxu0 %v3197_v31  ;;  %1043 = vmatprep.subr.mxu1 %v3223_v37 }
  0x7e   : > { %973 = vmatpush1.msra.mxu0 %v3207_v33  ;;  %1044 = vmatpush1.msra.mxu1 %v3231_v39 }
  0x7f   : > { %974 = vmatprep.subr.mxu0 %v3220_v36  ;;  %1045 = vmatprep.subr.mxu1 %v3239_v41 }
  0x80   : > { %975 = vmatpush1.msra.mxu0 %v3228_v38  ;;  %1046 = vmatpush1.msra.mxu1 %v3249_v43 }
  0x81   : > { %976 = vmatprep.subr.mxu0 %v3236_v40  ;;  %1047 = vmatprep.subr.mxu1 %v3262_v46 }
  0x82   : > { %977 = vmatpush1.msra.mxu0 %v3246_v42  ;;  %1048 = vmatpush1.msra.mxu1 %v3270_v48 }
  0x83   : > { %978 = vmatprep.subr.mxu0 %v3259_v45  ;;  %1049 = vmatprep.subr.mxu1 %v3278_v50 }
  0x84   : > { %979 = vmatpush1.msra.mxu0 %v3267_v47  ;;  %1050 = vmatpush1.msra.mxu1 %v3288_v52 }
  0x85   : > { %980 = vmatprep.subr.mxu0 %v3275_v49  ;;  %1051 = vmatprep.subr.mxu1 %v3301_v55 }
  0x86   : > { %981 = vmatpush1.msra.mxu0 %v3285_v51  ;;  %1052 = vmatpush1.msra.mxu1 %v3309_v57 }
  0x87   : > { %982 = vmatprep.subr.mxu0 %v3298_v54  ;;  %1053 = vmatprep.subr.mxu1 %v3317_v59 }
  0x88   : > { %983 = vmatpush1.msra.mxu0 %v3306_v56  ;;  %1054 = vmatpush1.msra.mxu1 %v3327_v61 }
  0x89   : > { %984 = vmatprep.subr.mxu0 %v3314_v58  ;;  %1055 = vmatprep.subr.mxu1 %v3340_v1 }
  0x8a   : > { %985 = vmatpush1.msra.mxu0 %v3324_v60  ;;  %1056 = vmatpush1.msra.mxu1 %v3348_v3 }
  0x8b   : > { %986 = vmatprep.subr.mxu0 %v3337_v63  ;;  %1057 = vmatprep.subr.mxu1 %v3356_v5 }
  0x8c   : > { %987 = vmatpush1.msra.mxu0 %v3345_v2  ;;  %1058 = vmatpush1.msra.mxu1 %v3364_v7 }
  0x8d   : > { %988 = vmatprep.subr.mxu0 %v3353_v4  ;;  %1059 = vmatprep.subr.mxu1 %v3372_v9  ;;  %v4342_v9 = vmov 0.0  }
  0x8e   : > { %989 = vmatpush1.msra.mxu0 %v3361_v6  ;;  %1060 = vmatpush1.msra.mxu1 %v3380_v19 }
  0x8f   : > { %990 = vmatprep.subr.mxu0 %v4341_v0  ;;  %1061 = vmatprep.subr.mxu1 %v3388_v35 }
  0x90   : > { %991 = vmatpush1.msra.mxu0 %v3377_v14  ;;  %1062 = vmatpush1.msra.mxu1 %v3398_v53  ;;  %v465_v14 = vlaneseq }
  0x91   : > { %992 = vmatprep.subr.mxu0 %v3385_v26  ;;  %1063 = vmatprep.subr.mxu1 %v3403_v62  ;;  %v455_v26 = vld [vmem:[%s369_s14] sm:$0xf]  ;;  %s3958_s14 = scalar_select %p376_p11, 4, 3 }
  0x92   : > { %993 = vmatpush1.msra.mxu0 %v3393_v44  ;;  %1026 = vmatprep.mubr.f32.mxu0 %v4342_v9  ;;  %v466_v53 = vshrl.u32 %v465_v14, 7 }
  0x93   : > { %1064 = vmatpush1.msra.mxu1 %v3408_v8  ;;  %1097 = vmatprep.mubr.f32.mxu1 %v4342_v9  ;;  %s2577_s15 = sshll.u32 %s3958_s14, 5 }
  0x94   : > { %1147 = vmatprep.subr.mxu0 %v3106_v10  ;;  %1218 = vmatprep.subr.mxu1 %v3109_v11  ;;  %v467_v44 = vsub.s32 0, %v466_v53  ;;  %v475_v62 = vsub.s32 2, %v466_v53  ;;  %v471_v35 = vsub.s32 1, %v466_v53  ;;  %v479_v8 = vsub.s32 3, %v466_v53  ;;  %s1327_s21 = scalar_lea.vmem [#allocation2], %s2577_s15  ;;  %s2561_s15 = sshll.u32 %s4187_s9, 3 }
  0x96   : > { %v3489_v0 = vrot.slane %v455_v26, %v467_v44  ;;  %v3491_v9 = vrot.slane %v455_v26, %v475_v62  ;;  %v3493_v10 = vrot.slane %v455_v26, %v471_v35  ;;  %v3495_v11 = vrot.slane %v455_v26, %v479_v8 }
 0x102   : > { %v576_v19 = vpop.f32.mrf.mxu0  ;;  %v689_v6 = vpop.f32.mrf.mxu1 }
 0x103   : > { %v577_v14 = vadd.f32 %v576_v19, %v3489_v0  ;;  %v690_v4 = vadd.f32 %v689_v6, %v3491_v9 }
 0x104   : > { %v578_v7 = vpop.f32.mrf.mxu0  ;;  %v691_v2 = vpop.f32.mrf.mxu1 }
 0x105   : > { %736 = vst [vmem:[#allocation2] sm:$0xff] %v577_v14  ;;  %738 = vst [vmem:[#allocation2 + $0x10] sm:$0xff] %v690_v4  ;;  %v579_v53 = vadd.f32 %v578_v7, %v3493_v10  ;;  %v692_v44 = vadd.f32 %v691_v2, %v3495_v11 }
 0x106   : > { %v582_v62 = vpop.f32.mrf.mxu0  ;;  %v695_v5 = vpop.f32.mrf.mxu1 }
 0x107   : > { %737 = vst [vmem:[#allocation2 + $0x8] sm:$0xff] %v579_v53  ;;  %739 = vst [vmem:[#allocation2 + $0x18] sm:$0xff] %v692_v44  ;;  %v583_v8 = vadd.f32 %v582_v62, %v3489_v0  ;;  %v696_v26 = vadd.f32 %v695_v5, %v3491_v9 }
 0x108   : > { %v584_v35 = vpop.f32.mrf.mxu0  ;;  %v697_v19 = vpop.f32.mrf.mxu1 }
 0x109   : > { %740 = vst [vmem:[#allocation2 + $0x20] sm:$0xff] %v583_v8  ;;  %742 = vst [vmem:[#allocation2 + $0x30] sm:$0xff] %v696_v26  ;;  %v585_v6 = vadd.f32 %v584_v35, %v3493_v10  ;;  %v698_v4 = vadd.f32 %v697_v19, %v3495_v11 }
 0x10a   : > { %v588_v14 = vpop.f32.mrf.mxu0  ;;  %v701_v7 = vpop.f32.mrf.mxu1 }
 0x10b   : > { %741 = vst [vmem:[#allocation2 + $0x28] sm:$0xff] %v585_v6  ;;  %743 = vst [vmem:[#allocation2 + $0x38] sm:$0xff] %v698_v4  ;;  %v589_v2 = vadd.f32 %v588_v14, %v3489_v0  ;;  %v702_v53 = vadd.f32 %v701_v7, %v3491_v9 }
 0x10c   : > { %v590_v44 = vpop.f32.mrf.mxu0  ;;  %v703_v62 = vpop.f32.mrf.mxu1 }
 0x10d   : > { %744 = vst [vmem:[#allocation2 + $0x40] sm:$0xff] %v589_v2  ;;  %746 = vst [vmem:[#allocation2 + $0x50] sm:$0xff] %v702_v53  ;;  %v591_v5 = vadd.f32 %v590_v44, %v3493_v10  ;;  %v704_v8 = vadd.f32 %v703_v62, %v3495_v11 }
 0x10f   : > { %745 = vst [vmem:[#allocation2 + $0x48] sm:$0xff] %v591_v5  ;;  %747 = vst [vmem:[#allocation2 + $0x58] sm:$0xff] %v704_v8  ;;  %v594_v26 = vpop.f32.mrf.mxu0  ;;  %v707_v35 = vpop.f32.mrf.mxu1 }
 0x110   : > { %v595_v19 = vadd.f32 %v594_v26, %v3489_v0  ;;  %v708_v6 = vadd.f32 %v707_v35, %v3491_v9 }
 0x111   : > { %v596_v4 = vpop.f32.mrf.mxu0  ;;  %v709_v14 = vpop.f32.mrf.mxu1 }
 0x112   : > { %748 = vst [vmem:[#allocation2 + $0x60] sm:$0xff] %v595_v19  ;;  %750 = vst [vmem:[#allocation2 + $0x70] sm:$0xff] %v708_v6  ;;  %v597_v7 = vadd.f32 %v596_v4, %v3493_v10  ;;  %v710_v2 = vadd.f32 %v709_v14, %v3495_v11 }
 0x114   : > { %749 = vst [vmem:[#allocation2 + $0x68] sm:$0xff] %v597_v7  ;;  %751 = vst [vmem:[#allocation2 + $0x78] sm:$0xff] %v710_v2 }
 0x115   : > { %v600_v53 = vpop.f32.mrf.mxu0  ;;  %v713_v44 = vpop.f32.mrf.mxu1 }
 0x116   : > { %v601_v62 = vadd.f32 %v600_v53, %v3489_v0  ;;  %v714_v5 = vadd.f32 %v713_v44, %v3491_v9 }
 0x117   : > { %v602_v8 = vpop.f32.mrf.mxu0  ;;  %v715_v26 = vpop.f32.mrf.mxu1 }
 0x118   : > { %752 = vst [vmem:[#allocation2 + $0x80] sm:$0xff] %v601_v62  ;;  %754 = vst [vmem:[#allocation2 + $0x90] sm:$0xff] %v714_v5  ;;  %v603_v35 = vadd.f32 %v602_v8, %v3493_v10  ;;  %v716_v19 = vadd.f32 %v715_v26, %v3495_v11 }
 0x11a   : > { %753 = vst [vmem:[#allocation2 + $0x88] sm:$0xff] %v603_v35  ;;  %755 = vst [vmem:[#allocation2 + $0x98] sm:$0xff] %v716_v19 }
 0x11b   : > { %v606_v6 = vpop.f32.mrf.mxu0  ;;  %v719_v4 = vpop.f32.mrf.mxu1 }
 0x11c   : > { %v607_v14 = vadd.f32 %v606_v6, %v3489_v0  ;;  %v720_v7 = vadd.f32 %v719_v4, %v3491_v9 }
 0x11d   : > { %v608_v2 = vpop.f32.mrf.mxu0  ;;  %v721_v53 = vpop.f32.mrf.mxu1 }
 0x11e   : > { %756 = vst [vmem:[#allocation2 + $0xa0] sm:$0xff] %v607_v14  ;;  %758 = vst [vmem:[#allocation2 + $0xb0] sm:$0xff] %v720_v7  ;;  %v609_v44 = vadd.f32 %v608_v2, %v3493_v10  ;;  %v722_v62 = vadd.f32 %v721_v53, %v3495_v11 }
 0x120   : > { %757 = vst [vmem:[#allocation2 + $0xa8] sm:$0xff] %v609_v44  ;;  %759 = vst [vmem:[#allocation2 + $0xb8] sm:$0xff] %v722_v62 }
 0x121   : > { %v612_v5 = vpop.f32.mrf.mxu0  ;;  %v725_v8 = vpop.f32.mrf.mxu1 }
 0x122   : > { %v613_v26 = vadd.f32 %v612_v5, %v3489_v0  ;;  %v726_v35 = vadd.f32 %v725_v8, %v3491_v9 }
 0x123   : > { %v614_v19 = vpop.f32.mrf.mxu0  ;;  %v727_v6 = vpop.f32.mrf.mxu1 }
 0x124   : > { %760 = vst [vmem:[#allocation2 + $0xc0] sm:$0xff] %v613_v26  ;;  %762 = vst [vmem:[#allocation2 + $0xd0] sm:$0xff] %v726_v35  ;;  %v615_v4 = vadd.f32 %v614_v19, %v3493_v10  ;;  %v728_v14 = vadd.f32 %v727_v6, %v3495_v11 }
 0x126   : > { %761 = vst [vmem:[#allocation2 + $0xc8] sm:$0xff] %v615_v4  ;;  %763 = vst [vmem:[#allocation2 + $0xd8] sm:$0xff] %v728_v14 }
 0x127   : > { %v618_v7 = vpop.f32.mrf.mxu0  ;;  %v731_v2 = vpop.f32.mrf.mxu1 }
 0x128   : > { %v619_v53 = vadd.f32 %v618_v7, %v3489_v0  ;;  %v732_v44 = vadd.f32 %v731_v2, %v3491_v9 }
 0x129   : > { %v620_v62 = vpop.f32.mrf.mxu0  ;;  %v733_v5 = vpop.f32.mrf.mxu1 }
 0x12a   : > { %764 = vst [vmem:[#allocation2 + $0xe0] sm:$0xff] %v619_v53  ;;  %766 = vst [vmem:[#allocation2 + $0xf0] sm:$0xff] %v732_v44  ;;  %v621_v8 = vadd.f32 %v620_v62, %v3493_v10  ;;  %v734_v26 = vadd.f32 %v733_v5, %v3495_v11 }
 0x12c   : > { %765 = vst [vmem:[#allocation2 + $0xe8] sm:$0xff] %v621_v8  ;;  %767 = vst [vmem:[#allocation2 + $0xf8] sm:$0xff] %v734_v26 }
 0x130   : > { %v843_v35 = vpop.f32.mrf.mxu0 }
 0x132   : > { %v845_v14 = vpop.f32.mrf.mxu0 }
 0x133   : > { %v773_v19 = vld [vmem:[%s772_s8] sm:$0xff]  ;;  %v774_v4 = vld [vmem:[%s772_s8 + $0x8] sm:$0xff]  ;;  %v914_v2 = vpop.f32.mrf.mxu1  ;;  %v776_v53 = vld [vmem:[%s772_s8 + $0x18] sm:$0xff] }
 0x134   : > { %v919_v6 = vadd.f32 %v843_v35, %v773_v19  ;;  %v920_v7 = vadd.f32 %v845_v14, %v774_v4  ;;  %v775_v62 = vld [vmem:[%s772_s8 + $0x10] sm:$0xff] }
 0x135   : > { %v916_v44 = vpop.f32.mrf.mxu1  ;;  %v921_v8 = vadd.f32 %v914_v2, %v775_v62  ;;  %v4344_v62 = vld [vmem:[#allocation18_spill] sm:$0xff] }
 0x136   : > { %v2522_v0 = vmul.f32 -1.442695, %v919_v6  ;;  %v2523_v9 = vmul.f32 -1.442695, %v920_v7  ;;  %v922_v10 = vadd.f32 %v916_v44, %v776_v53 }
 0x138   : > { %2645 = vpow2.f32 %v2522_v0  ;;  %v2524_v11 = vmul.f32 -1.442695, %v922_v10  ;;  %v4343_v10 = vld [vmem:[#allocation14_spill] sm:$0xff] }
 0x139   : > { %2647 = vpow2.f32 %v2523_v9 }
 0x13a   : > { %2649 = vpow2.f32 %v2524_v11  ;;  %v4345_v11 = vld [vmem:[#allocation15_spill] sm:$0xff] }
 0x145   : > { %v2646_v5 = vpop.eup %2645 }
 0x146   : > { %v926_v26 = vadd.f32 1.0, %v2646_v5  ;;  %v2648_v63 = vpop.eup %2647  ;;  %v4346_v5 = vld [vmem:[#allocation20_spill] sm:$0xff] }
 0x147   : > { %v932_v35 = vadd.f32 1.0, %v2648_v63  ;;  %v2650_v19 = vpop.eup %2649 }
 0x148   : > { %2651 = vrcp.f32 %v926_v26  ;;  %v939_v0 = vadd.f32 1.0, %v2650_v19  ;;  %v4348_v26 = vld [vmem:[#allocation22_spill] sm:$0xff]  ;;  %v4350_v19 = vld [vmem:[#allocation24_spill] sm:$0xff] }
 0x149   : > { %2653 = vtanh.f32 %v921_v8  ;;  %v4347_v8 = vld [vmem:[#allocation17_spill] sm:$0xff] }
 0x14a   : > { %2655 = vrcp.f32 %v932_v35  ;;  %v4349_v35 = vld [vmem:[#allocation19_spill] sm:$0xff] }
 0x14b   : > { %2657 = vrcp.f32 %v939_v0  ;;  %v4354_v0 = vld [vmem:[#allocation28_spill] sm:$0xff] }
 0x155   : > { %v2652_v6 = vpop.eup %2651 }
 0x156   : > { %v2654_v4 = vpop.eup %2653 }
 0x157   : > { %v2656_v14 = vpop.eup %2655  ;;  %v944_v9 = vmul.f32 %v2654_v4, %v2652_v6  ;;  %v4351_v6 = vld [vmem:[#allocation21_spill] sm:$0xff]  ;;  %v4352_v4 = vld [vmem:[#allocation26_spill] sm:$0xff] }
 0x158   : > { %v943_v7 = vmul.f32 0.0, %v2656_v14  ;;  %v2658_v2 = vpop.eup %2657  ;;  %v4353_v14 = vld [vmem:[#allocation23_spill] sm:$0xff] }
 0x15a   : > { %v3535_v53 = vadd.f32 %v944_v9, %v943_v7  ;;  %v4355_v7 = vld [vmem:[#allocation25_spill] sm:$0xff] }
 0x15b   : > { %v4356_v9 = vld [vmem:[#allocation29_spill] sm:$0xff] }
 0x15c   : > { %2659 = vtanh.f32 %v3535_v53 }
 0x169   : > { %v2660_v44 = vpop.eup %2659 }
 0x16a   : > { %v947_v63 = vmul.f32 %v2660_v44, %v2658_v2  ;;  %v4357_v2 = vld [vmem:[#allocation27_spill] sm:$0xff]  ;;  %v4358_v44 = vmov 0.0  }
 0x16c   : > { %952 = vst [vmem:[%s951_s5] sm:$0xff] %v947_v63  ;;  %1027 = vmatmul.mubr.f32.vlgmr.msra.gmra.mxu0 %v947_v63  ;;  %1098 = vmatmul.mubr.f32.vlgmr.msra.gmra.mxu1 %v947_v63  ;;  %v4359_v63 = vld [vmem:[#allocation30_spill] sm:$0xff]  ;;  %s2578_s5 = sshll.u32 %s4035_s10, 5 }
 0x16d   : > { %1148 = vmatpush1.msra.mxu0 %v3114_v12  ;;  %1219 = vmatpush1.msra.mxu1 %v3117_v13  ;;  %s1512_s29 = scalar_lea.vmem [#allocation2], %s2578_s5 }
 0x16e   : > { %1149 = vmatprep.subr.mxu0 %v3126_v15  ;;  %1220 = vmatprep.subr.mxu1 %v3140_v18 }
 0x16f   : > { %1150 = vmatpush1.msra.mxu0 %v3131_v16  ;;  %1221 = vmatpush1.msra.mxu1 %v3153_v21 }
 0x170   : > { %1151 = vmatprep.subr.mxu0 %v3137_v17  ;;  %1222 = vmatprep.subr.mxu1 %v3161_v23 }
 0x171   : > { %1152 = vmatpush1.msra.mxu0 %v3150_v20  ;;  %1223 = vmatpush1.msra.mxu1 %v3171_v25 }
 0x172   : > { %1153 = vmatprep.subr.mxu0 %v3158_v22  ;;  %1224 = vmatprep.subr.mxu1 %v3184_v28 }
 0x173   : > { %1154 = vmatpush1.msra.mxu0 %v3168_v24  ;;  %1225 = vmatpush1.msra.mxu1 %v3192_v30 }
 0x174   : > { %1155 = vmatprep.subr.mxu0 %v3181_v27  ;;  %1226 = vmatprep.subr.mxu1 %v3200_v32 }
 0x175   : > { %1156 = vmatpush1.msra.mxu0 %v3189_v29  ;;  %1227 = vmatpush1.msra.mxu1 %v3210_v34 }
 0x176   : > { %1157 = vmatprep.subr.mxu0 %v3197_v31  ;;  %1228 = vmatprep.subr.mxu1 %v3223_v37 }
 0x177   : > { %1158 = vmatpush1.msra.mxu0 %v3207_v33  ;;  %1229 = vmatpush1.msra.mxu1 %v3231_v39 }
 0x178   : > { %1159 = vmatprep.subr.mxu0 %v3220_v36  ;;  %1230 = vmatprep.subr.mxu1 %v3239_v41 }
 0x179   : > { %1160 = vmatpush1.msra.mxu0 %v3228_v38  ;;  %1231 = vmatpush1.msra.mxu1 %v3249_v43 }
 0x17a   : > { %1161 = vmatprep.subr.mxu0 %v3236_v40  ;;  %1232 = vmatprep.subr.mxu1 %v3262_v46 }
 0x17b   : > { %1162 = vmatpush1.msra.mxu0 %v3246_v42  ;;  %1233 = vmatpush1.msra.mxu1 %v3270_v48 }
 0x17c   : > { %1163 = vmatprep.subr.mxu0 %v3259_v45  ;;  %1234 = vmatprep.subr.mxu1 %v3278_v50 }
 0x17d   : > { %1164 = vmatpush1.msra.mxu0 %v3267_v47  ;;  %1235 = vmatpush1.msra.mxu1 %v3288_v52 }
 0x17e   : > { %1165 = vmatprep.subr.mxu0 %v3275_v49  ;;  %1236 = vmatprep.subr.mxu1 %v3301_v55 }
 0x17f   : > { %1166 = vmatpush1.msra.mxu0 %v3285_v51  ;;  %1237 = vmatpush1.msra.mxu1 %v3309_v57 }
 0x180   : > { %1167 = vmatprep.subr.mxu0 %v3298_v54  ;;  %1238 = vmatprep.subr.mxu1 %v3317_v59 }
 0x181   : > { %1168 = vmatpush1.msra.mxu0 %v3306_v56  ;;  %1239 = vmatpush1.msra.mxu1 %v3327_v61 }
 0x182   : > { %1169 = vmatprep.subr.mxu0 %v3314_v58  ;;  %1240 = vmatprep.subr.mxu1 %v3340_v1 }
 0x183   : > { %1170 = vmatpush1.msra.mxu0 %v3324_v60  ;;  %1241 = vmatpush1.msra.mxu1 %v3348_v3 }
 0x184   : > { %1171 = vmatprep.subr.mxu0 %v4343_v10  ;;  %1242 = vmatprep.subr.mxu1 %v4344_v62 }
 0x185   : > { %1172 = vmatpush1.msra.mxu0 %v4345_v11  ;;  %1243 = vmatpush1.msra.mxu1 %v4346_v5  ;;  %v960_v5 = vld [vmem:[%s957_s6 + $0x10] sm:$0xff] }
 0x186   : > { %1173 = vmatprep.subr.mxu0 %v4347_v8  ;;  %1244 = vmatprep.subr.mxu1 %v4348_v26  ;;  %v961_v26 = vld [vmem:[%s957_s6 + $0x18] sm:$0xff] }
 0x187   : > { %1174 = vmatpush1.msra.mxu0 %v4349_v35  ;;  %1245 = vmatpush1.msra.mxu1 %v4350_v19  ;;  %v4360_v19 = vld [vmem:[#allocation12_spill] sm:$0xff] }
 0x188   : > { %1175 = vmatprep.subr.mxu0 %v4351_v6  ;;  %1246 = vmatprep.subr.mxu1 %v4352_v4  ;;  %v4361_v6 = vld [vmem:[#allocation13_spill] sm:$0xff] }
 0x189   : > { %1176 = vmatpush1.msra.mxu0 %v4353_v14  ;;  %1247 = vmatpush1.msra.mxu1 %v4354_v0 }
 0x18a   : > { %1177 = vmatprep.subr.mxu0 %v4355_v7  ;;  %1248 = vmatprep.subr.mxu1 %v4356_v9  ;;  %v958_v7 = vld [vmem:[%s957_s6] sm:$0xff] }
 0x18b   : > { %1178 = vmatpush1.msra.mxu0 %v4357_v2  ;;  %1211 = vmatprep.mubr.f32.mxu0 %v4358_v44  ;;  %v959_v2 = vld [vmem:[%s957_s6 + $0x8] sm:$0xff]  ;;  %s1691_s6 = scalar_lea.vmem %s3541_s12, %s2549_s25 [#allocation9]  ;;  %s2569_s25 = sshll.u32 (%p3029_p9), %s2939_s18, 3 }
 0x18c   : > { %1249 = vmatpush1.msra.mxu1 %v4359_v63  ;;  %1282 = vmatprep.mubr.f32.mxu1 %v4358_v44 }
 0x18d   : > { %1332 = vmatprep.subr.mxu0 %v4360_v19  ;;  %1403 = vmatprep.subr.mxu1 %v4361_v6 }
 0x22c   : > { %v1028_v9 = vpop.f32.mrf.mxu0  ;;  %v1099_v63 = vpop.f32.mrf.mxu1 }
 0x22d   : > { %v1104_v0 = vadd.f32 %v1028_v9, %v958_v7  ;;  %v1106_v62 = vadd.f32 %v1099_v63, %v960_v5 }
 0x22e   : > { %v1030_v14 = vpop.f32.mrf.mxu0  ;;  %v1101_v19 = vpop.f32.mrf.mxu1 }
 0x22f   : > { %v2528_v4 = vmul.f32 -1.442695, %v1104_v0  ;;  %v1105_v35 = vadd.f32 %v1030_v14, %v959_v2  ;;  %v1107_v6 = vadd.f32 %v1101_v19, %v961_v26  ;;  %v3705_v19 = vld [vmem:[%s3094_s24 + $0x1e0] sm:$0xff] }
 0x231   : > { %2661 = vpow2.f32 %v2528_v4  ;;  %v2529_v44 = vmul.f32 -1.442695, %v1105_v35  ;;  %v2530_v8 = vmul.f32 -1.442695, %v1107_v6  ;;  %v3709_v6 = vld [vmem:[%s3094_s24 + $0x1f0] sm:$0xff] }
 0x233   : > { %2663 = vpow2.f32 %v2529_v44 }
 0x234   : > { %2665 = vpow2.f32 %v2530_v8 }
 0x23e   : > { %v2662_v11 = vpop.eup %2661 }
 0x23f   : > { %v1111_v10 = vadd.f32 1.0, %v2662_v11 }
 0x240   : > { %v2664_v3 = vpop.eup %2663 }
 0x241   : > { %2667 = vrcp.f32 %v1111_v10  ;;  %v1117_v7 = vadd.f32 1.0, %v2664_v3  ;;  %v2666_v4 = vpop.eup %2665 }
 0x242   : > { %2669 = vtanh.f32 %v1106_v62  ;;  %v1124_v9 = vadd.f32 1.0, %v2666_v4  ;;  %v3717_v4 = vld [vmem:[%s3094_s24 + $0x1d8] sm:$0xff] }
 0x243   : > { %2671 = vrcp.f32 %v1117_v7  ;;  %v3713_v7 = vld [vmem:[%s3094_s24 + $0x1c8] sm:$0xff] }
 0x244   : > { %2673 = vrcp.f32 %v1124_v9  ;;  %v3733_v9 = vld [vmem:[%s3094_s24 + $0x1b8] sm:$0xff] }
 0x24e   : > { %v2668_v14 = vpop.eup %2667 }
 0x24f   : > { %v2670_v35 = vpop.eup %2669 }
 0x250   : > { %v2672_v0 = vpop.eup %2671  ;;  %v1129_v2 = vmul.f32 %v2670_v35, %v2668_v14  ;;  %v3721_v14 = vld [vmem:[%s3094_s24 + $0x1c0] sm:$0xff]  ;;  %v3725_v35 = vld [vmem:[%s3094_s24 + $0x1d0] sm:$0xff] }
 0x251   : > { %v1128_v26 = vmul.f32 %v2672_v0, %v3535_v53  ;;  %v2674_v11 = vpop.eup %2673  ;;  %v3729_v0 = vld [vmem:[%s3094_s24 + $0x1a8] sm:$0xff] }
 0x253   : > { %v3616_v44 = vadd.f32 %v1129_v2, %v1128_v26  ;;  %v3737_v2 = vld [vmem:[%s3094_s24 + $0x1a0] sm:$0xff]  ;;  %v3741_v26 = vld [vmem:[%s3094_s24 + $0x1b0] sm:$0xff] }
 0x255   : > { %2675 = vtanh.f32 %v3616_v44 }
 0x262   : > { %v2676_v10 = vpop.eup %2675 }
 0x263   : > { %v1132_v3 = vmul.f32 %v2676_v10, %v2674_v11  ;;  %v3749_v11 = vld [vmem:[%s3094_s24 + $0x198] sm:$0xff]  ;;  %v3753_v10 = vld [vmem:[%s3094_s24 + $0x180] sm:$0xff] }
 0x265   : > { %1137 = vst [vmem:[%s1136_s23] sm:$0xff] %v1132_v3  ;;  %1212 = vmatmul.mubr.f32.vlgmr.msra.gmra.mxu0 %v1132_v3  ;;  %1283 = vmatmul.mubr.f32.vlgmr.msra.gmra.mxu1 %v1132_v3  ;;  %v3757_v3 = vld [vmem:[%s3094_s24 + $0x190] sm:$0xff]  ;;  %s2579_s23 = sshll.u32 %s4112_s11, 5 }
 0x266   : > { %1333 = vmatpush1.msra.mxu0 %v3114_v12  ;;  %1404 = vmatpush1.msra.mxu1 %v3117_v13  ;;  %v4362_v12 = vld [vmem:[#allocation16_spill] sm:$0xff]  ;;  %v4363_v13 = vld [vmem:[#allocation14_spill] sm:$0xff]  ;;  %s1697_s26 = scalar_lea.vmem [#allocation2], %s2579_s23  ;;  %s2266_s23 = scalar_lea.vmem (%p3029_p9), %s4236_s4, %s2569_s25 }
 0x267   : > { %1334 = vmatprep.subr.mxu0 %v3126_v15  ;;  %1405 = vmatprep.subr.mxu1 %v3140_v18  ;;  %v4364_v15 = vld [vmem:[#allocation18_spill] sm:$0xff]  ;;  %v4367_v18 = vld [vmem:[#allocation17_spill] sm:$0xff] }
 0x268   : > { %1335 = vmatpush1.msra.mxu0 %v3131_v16  ;;  %1406 = vmatpush1.msra.mxu1 %v3153_v21  ;;  %v4365_v16 = vld [vmem:[#allocation15_spill] sm:$0xff] }
 0x269   : > { %1336 = vmatprep.subr.mxu0 %v3137_v17  ;;  %1407 = vmatprep.subr.mxu1 %v3161_v23  ;;  %v4366_v17 = vld [vmem:[#allocation20_spill] sm:$0xff]  ;;  %v4369_v21 = vld [vmem:[#allocation19_spill] sm:$0xff]  ;;  %v4371_v23 = vld [vmem:[#allocation21_spill] sm:$0xff] }
 0x26a   : > { %1337 = vmatpush1.msra.mxu0 %v3150_v20  ;;  %1408 = vmatpush1.msra.mxu1 %v3171_v25  ;;  %v4368_v20 = vld [vmem:[#allocation22_spill] sm:$0xff]  ;;  %v4373_v25 = vld [vmem:[#allocation23_spill] sm:$0xff] }
 0x26b   : > { %1338 = vmatprep.subr.mxu0 %v3158_v22  ;;  %1409 = vmatprep.subr.mxu1 %v3184_v28  ;;  %v4370_v22 = vld [vmem:[#allocation24_spill] sm:$0xff]  ;;  %v4375_v28 = vld [vmem:[#allocation25_spill] sm:$0xff] }
 0x26c   : > { %1339 = vmatpush1.msra.mxu0 %v3168_v24  ;;  %1410 = vmatpush1.msra.mxu1 %v3192_v30  ;;  %v4372_v24 = vld [vmem:[#allocation26_spill] sm:$0xff]  ;;  %v4377_v30 = vld [vmem:[#allocation27_spill] sm:$0xff] }
 0x26d   : > { %1340 = vmatprep.subr.mxu0 %v3181_v27  ;;  %1411 = vmatprep.subr.mxu1 %v3200_v32  ;;  %v4374_v27 = vld [vmem:[#allocation28_spill] sm:$0xff]  ;;  %v4379_v32 = vld [vmem:[#allocation30_spill] sm:$0xff] }
 0x26e   : > { %1341 = vmatpush1.msra.mxu0 %v3189_v29  ;;  %1412 = vmatpush1.msra.mxu1 %v3210_v34  ;;  %v4376_v29 = vld [vmem:[#allocation29_spill] sm:$0xff]  ;;  %v3690_v34 = vld [vmem:[%s3094_s24 + $0x1f8] sm:$0xff] }
 0x26f   : > { %1342 = vmatprep.subr.mxu0 %v3197_v31  ;;  %1413 = vmatprep.subr.mxu1 %v3223_v37  ;;  %v4378_v31 = vmov 0.0   ;;  %4381 = vst [vmem:[#allocation13_spill] sm:$0xff] %v3690_v34 }
 0x270   : > { %1343 = vmatpush1.msra.mxu0 %v3207_v33  ;;  %1414 = vmatpush1.msra.mxu1 %v3231_v39  ;;  %v3686_v33 = vld [vmem:[%s3094_s24 + $0x1e8] sm:$0xff] }
 0x271   : > { %1344 = vmatprep.subr.mxu0 %v3220_v36  ;;  %1415 = vmatprep.subr.mxu1 %v3239_v41  ;;  %4380 = vst [vmem:[#allocation12_spill] sm:$0xff] %v3686_v33  ;;  %v1143_v36 = vld [vmem:[%s1142_s7] sm:$0xff]  ;;  %v1144_v39 = vld [vmem:[%s1142_s7 + $0x8] sm:$0xff] }
 0x272   : > { %1345 = vmatpush1.msra.mxu0 %v3228_v38  ;;  %1416 = vmatpush1.msra.mxu1 %v3249_v43 }
 0x273   : > { %1346 = vmatprep.subr.mxu0 %v3236_v40  ;;  %1417 = vmatprep.subr.mxu1 %v3262_v46 }
 0x274   : > { %1347 = vmatpush1.msra.mxu0 %v3246_v42  ;;  %1418 = vmatpush1.msra.mxu1 %v3270_v48 }
 0x275   : > { %1348 = vmatprep.subr.mxu0 %v3259_v45  ;;  %1419 = vmatprep.subr.mxu1 %v3278_v50  ;;  %v1145_v50 = vld [vmem:[%s1142_s7 + $0x10] sm:$0xff] }
 0x276   : > { %1349 = vmatpush1.msra.mxu0 %v3267_v47  ;;  %1420 = vmatpush1.msra.mxu1 %v3288_v52  ;;  %v1146_v47 = vld [vmem:[%s1142_s7 + $0x18] sm:$0xff]  ;;  %s1876_s7 = scalar_lea.vmem %s3541_s12, %s2555_s30 [#allocation9] }
 0x277   : > { %1350 = vmatprep.subr.mxu0 %v3275_v49  ;;  %1421 = vmatprep.subr.mxu1 %v3301_v55 }
 0x278   : > { %1351 = vmatpush1.msra.mxu0 %v3285_v51  ;;  %1422 = vmatpush1.msra.mxu1 %v3309_v57 }
 0x279   : > { %1352 = vmatprep.subr.mxu0 %v3298_v54  ;;  %1423 = vmatprep.subr.mxu1 %v3317_v59 }
 0x27a   : > { %1353 = vmatpush1.msra.mxu0 %v3306_v56  ;;  %1424 = vmatpush1.msra.mxu1 %v3327_v61 }
 0x27b   : > { %1354 = vmatprep.subr.mxu0 %v3314_v58  ;;  %1425 = vmatprep.subr.mxu1 %v3340_v1 }
 0x27c   : > { %1355 = vmatpush1.msra.mxu0 %v3324_v60  ;;  %1426 = vmatpush1.msra.mxu1 %v4362_v12  ;;  %v3761_v12 = vld [vmem:[%s3094_s24 + $0x168] sm:$0xff] }
 0x27d   : > { %1356 = vmatprep.subr.mxu0 %v4363_v13  ;;  %1427 = vmatprep.subr.mxu1 %v4364_v15  ;;  %v3765_v13 = vld [vmem:[%s3094_s24 + $0x178] sm:$0xff]  ;;  %v3769_v15 = vld [vmem:[%s3094_s24 + $0x160] sm:$0xff] }
 0x27e   : > { %1357 = vmatpush1.msra.mxu0 %v4365_v16  ;;  %1428 = vmatpush1.msra.mxu1 %v4366_v17  ;;  %v3773_v16 = vld [vmem:[%s3094_s24 + $0x170] sm:$0xff]  ;;  %v3777_v17 = vld [vmem:[%s3094_s24 + $0x148] sm:$0xff] }
 0x27f   : > { %1358 = vmatprep.subr.mxu0 %v4367_v18  ;;  %1429 = vmatprep.subr.mxu1 %v4368_v20  ;;  %v3781_v18 = vld [vmem:[%s3094_s24 + $0x158] sm:$0xff]  ;;  %v3785_v20 = vld [vmem:[%s3094_s24 + $0x140] sm:$0xff] }
 0x280   : > { %1359 = vmatpush1.msra.mxu0 %v4369_v21  ;;  %1430 = vmatpush1.msra.mxu1 %v4370_v22  ;;  %v3789_v21 = vld [vmem:[%s3094_s24 + $0x150] sm:$0xff]  ;;  %v3793_v22 = vld [vmem:[%s3094_s24 + $0x128] sm:$0xff] }
 0x281   : > { %1360 = vmatprep.subr.mxu0 %v4371_v23  ;;  %1431 = vmatprep.subr.mxu1 %v4372_v24  ;;  %v3797_v23 = vld [vmem:[%s3094_s24 + $0x138] sm:$0xff]  ;;  %v3801_v24 = vld [vmem:[%s3094_s24 + $0x120] sm:$0xff] }
 0x282   : > { %1361 = vmatpush1.msra.mxu0 %v4373_v25  ;;  %1432 = vmatpush1.msra.mxu1 %v4374_v27  ;;  %v3805_v25 = vld [vmem:[%s3094_s24 + $0x130] sm:$0xff]  ;;  %v3809_v27 = vld [vmem:[%s3094_s24 + $0x108] sm:$0xff] }
 0x283   : > { %1362 = vmatprep.subr.mxu0 %v4375_v28  ;;  %1433 = vmatprep.subr.mxu1 %v4376_v29  ;;  %v3813_v28 = vld [vmem:[%s3094_s24 + $0x118] sm:$0xff]  ;;  %v3817_v29 = vld [vmem:[%s3094_s24 + $0x100] sm:$0xff] }
 0x284   : > { %1363 = vmatpush1.msra.mxu0 %v4377_v30  ;;  %1396 = vmatprep.mubr.f32.mxu0 %v4378_v31  ;;  %v3821_v30 = vld [vmem:[%s3094_s24 + $0x110] sm:$0xff] }
 0x285   : > { %1434 = vmatpush1.msra.mxu1 %v4379_v32  ;;  %1467 = vmatprep.mubr.f32.mxu1 %v4378_v31  ;;  %v3825_v32 = vld [vmem:[%s3094_s24 + $0xe8] sm:$0xff] }
 0x286   : > { %1517 = vmatprep.subr.mxu0 %v3686_v33  ;;  %1588 = vmatprep.subr.mxu1 %v3690_v34 }
 0x325   : > { %v1213_v37 = vpop.f32.mrf.mxu0  ;;  %v1284_v43 = vpop.f32.mrf.mxu1 }
 0x326   : > { %v1289_v38 = vadd.f32 %v1213_v37, %v1143_v36  ;;  %v1291_v52 = vadd.f32 %v1284_v43, %v1145_v50  ;;  %v3829_v36 = vld [vmem:[%s3094_s24 + $0xf8] sm:$0xff]  ;;  %v3833_v37 = vld [vmem:[%s3094_s24 + $0xe0] sm:$0xff]  ;;  %v3857_v43 = vld [vmem:[%s3094_s24 + $0xa8] sm:$0xff] }
 0x327   : > { %v1215_v40 = vpop.f32.mrf.mxu0  ;;  %v1286_v46 = vpop.f32.mrf.mxu1  ;;  %v3881_v50 = vld [vmem:[%s3094_s24 + $0x80] sm:$0xff] }
 0x328   : > { %v2534_v41 = vmul.f32 -1.442695, %v1289_v38  ;;  %v1290_v42 = vadd.f32 %v1215_v40, %v1144_v39  ;;  %v1292_v48 = vadd.f32 %v1286_v46, %v1146_v47  ;;  %v3837_v38 = vld [vmem:[%s3094_s24 + $0xf0] sm:$0xff]  ;;  %v3841_v39 = vld [vmem:[%s3094_s24 + $0xc8] sm:$0xff]  ;;  %v3845_v40 = vld [vmem:[%s3094_s24 + $0xd8] sm:$0xff] }
 0x329   : > { %v3865_v46 = vld [vmem:[%s3094_s24 + $0xa0] sm:$0xff]  ;;  %v3869_v47 = vld [vmem:[%s3094_s24 + $0xb0] sm:$0xff] }
 0x32a   : > { %2677 = vpow2.f32 %v2534_v41  ;;  %v2535_v45 = vmul.f32 -1.442695, %v1290_v42  ;;  %v2536_v49 = vmul.f32 -1.442695, %v1292_v48  ;;  %v3849_v41 = vld [vmem:[%s3094_s24 + $0xc0] sm:$0xff]  ;;  %v3853_v42 = vld [vmem:[%s3094_s24 + $0xd0] sm:$0xff] }
 0x32b   : > { %v3873_v48 = vld [vmem:[%s3094_s24 + $0x88] sm:$0xff] }
 0x32c   : > { %2679 = vpow2.f32 %v2535_v45  ;;  %v3861_v45 = vld [vmem:[%s3094_s24 + $0xb8] sm:$0xff] }
 0x32d   : > { %2681 = vpow2.f32 %v2536_v49  ;;  %v3877_v49 = vld [vmem:[%s3094_s24 + $0x98] sm:$0xff] }
 0x337   : > { %v2678_v51 = vpop.eup %2677 }
 0x338   : > { %v1296_v54 = vadd.f32 1.0, %v2678_v51  ;;  %v3885_v51 = vld [vmem:[%s3094_s24 + $0x90] sm:$0xff] }
 0x339   : > { %v2680_v55 = vpop.eup %2679  ;;  %4382 = vst [vmem:[#allocation16_spill] sm:$0xff] %v3885_v51 }
 0x33a   : > { %2683 = vrcp.f32 %v1296_v54  ;;  %v1302_v56 = vadd.f32 1.0, %v2680_v55  ;;  %v2682_v57 = vpop.eup %2681  ;;  %v3893_v54 = vld [vmem:[%s3094_s24 + $0x78] sm:$0xff]  ;;  %v3897_v55 = vld [vmem:[%s3094_s24 + $0x60] sm:$0xff] }
 0x33b   : > { %2685 = vtanh.f32 %v1291_v52  ;;  %v1309_v61 = vadd.f32 1.0, %v2682_v57  ;;  %v3889_v52 = vld [vmem:[%s3094_s24 + $0x68] sm:$0xff]  ;;  %4384 = vst [vmem:[#allocation18_spill] sm:$0xff] %v3893_v54  ;;  %4385 = vst [vmem:[#allocation15_spill] sm:$0xff] %v3897_v55 }
 0x33c   : > { %2687 = vrcp.f32 %v1302_v56  ;;  %4383 = vst [vmem:[#allocation14_spill] sm:$0xff] %v3889_v52  ;;  %v3901_v56 = vld [vmem:[%s3094_s24 + $0x70] sm:$0xff]  ;;  %v3905_v57 = vld [vmem:[%s3094_s24 + $0x48] sm:$0xff] }
 0x33d   : > { %2689 = vrcp.f32 %v1309_v61  ;;  %4386 = vst [vmem:[#allocation20_spill] sm:$0xff] %v3901_v56  ;;  %4387 = vst [vmem:[#allocation17_spill] sm:$0xff] %v3905_v57  ;;  %v3921_v61 = vld [vmem:[%s3094_s24 + $0x28] sm:$0xff] }
 0x33e   : > { %4391 = vst [vmem:[#allocation21_spill] sm:$0xff] %v3921_v61 }
 0x347   : > { %v2684_v58 = vpop.eup %2683 }
 0x348   : > { %v2686_v59 = vpop.eup %2685 }
 0x349   : > { %v2688_v60 = vpop.eup %2687  ;;  %v1314_v1 = vmul.f32 %v2686_v59, %v2684_v58  ;;  %v3909_v58 = vld [vmem:[%s3094_s24 + $0x58] sm:$0xff]  ;;  %v3913_v59 = vld [vmem:[%s3094_s24 + $0x40] sm:$0xff] }
 0x34a   : > { %v1313_v53 = vmul.f32 %v2688_v60, %v3616_v44  ;;  %v2690_v5 = vpop.eup %2689  ;;  %v3745_v44 = vld [vmem:[%s3094_s24 + $0x188] sm:$0xff]  ;;  %4388 = vst [vmem:[#allocation22_spill] sm:$0xff] %v3909_v58  ;;  %4389 = vst [vmem:[#allocation19_spill] sm:$0xff] %v3913_v59  ;;  %v3917_v60 = vld [vmem:[%s3094_s24 + $0x50] sm:$0xff] }
 0x34b   : > { %4390 = vst [vmem:[#allocation24_spill] sm:$0xff] %v3917_v60 }
 0x34c   : > { %v3699_v62 = vadd.f32 %v1314_v1, %v1313_v53  ;;  %v3925_v1 = vld [vmem:[%s3094_s24 + $0x38] sm:$0xff]  ;;  %v3929_v53 = vld [vmem:[%s3094_s24 + $0x20] sm:$0xff] }
 0x34d   : > { %4392 = vst [vmem:[#allocation26_spill] sm:$0xff] %v3925_v1  ;;  %4393 = vst [vmem:[#allocation23_spill] sm:$0xff] %v3929_v53 }
 0x34e   : > { %2691 = vtanh.f32 %v3699_v62 }
 0x35b   : > { %v2692_v8 = vpop.eup %2691 }
 0x35c   : > { %v1317_v63 = vmul.f32 %v2692_v8, %v2690_v5  ;;  %v3933_v5 = vld [vmem:[%s3094_s24 + $0x30] sm:$0xff]  ;;  %v3937_v8 = vld [vmem:[%s3094_s24 + $0x8] sm:$0xff] }
 0x35d   : > { %4394 = vst [vmem:[#allocation28_spill] sm:$0xff] %v3933_v5  ;;  %4395 = vst [vmem:[#allocation25_spill] sm:$0xff] %v3937_v8 }
 0x35e   : > { %1322 = vst [vmem:[%s1321_s13] sm:$0xff] %v1317_v63  ;;  %1397 = vmatmul.mubr.f32.vlgmr.msra.gmra.mxu0 %v1317_v63  ;;  %1468 = vmatmul.mubr.f32.vlgmr.msra.gmra.mxu1 %v1317_v63  ;;  %v3941_v63 = vld [vmem:[%s3094_s24 + $0x18] sm:$0xff]  ;;  %s2580_s13 = sshll.u32 %s4187_s9, 5 }
 0x35f   : > { %1518 = vmatpush1.msra.mxu0 %v3705_v19  ;;  %1589 = vmatpush1.msra.mxu1 %v3709_v6  ;;  %4396 = vst [vmem:[#allocation29_spill] sm:$0xff] %v3941_v63 }
 0x360   : > { %1519 = vmatprep.subr.mxu0 %v3713_v7  ;;  %1590 = vmatprep.subr.mxu1 %v3717_v4 }
 0x361   : > { %1520 = vmatpush1.msra.mxu0 %v3721_v14  ;;  %1591 = vmatpush1.msra.mxu1 %v3725_v35 }
 0x362   : > { %1521 = vmatprep.subr.mxu0 %v3729_v0  ;;  %1592 = vmatprep.subr.mxu1 %v3733_v9 }
 0x363   : > { %1522 = vmatpush1.msra.mxu0 %v3737_v2  ;;  %1593 = vmatpush1.msra.mxu1 %v3741_v26 }
 0x364   : > { %1523 = vmatprep.subr.mxu0 %v3745_v44  ;;  %1594 = vmatprep.subr.mxu1 %v3749_v11 }
 0x365   : > { %1524 = vmatpush1.msra.mxu0 %v3753_v10  ;;  %1595 = vmatpush1.msra.mxu1 %v3757_v3 }
 0x366   : > { %1525 = vmatprep.subr.mxu0 %v3761_v12  ;;  %1596 = vmatprep.subr.mxu1 %v3765_v13 }
 0x367   : > { %1526 = vmatpush1.msra.mxu0 %v3769_v15  ;;  %1597 = vmatpush1.msra.mxu1 %v3773_v16 }
 0x368   : > { %1527 = vmatprep.subr.mxu0 %v3777_v17  ;;  %1598 = vmatprep.subr.mxu1 %v3781_v18 }
 0x369   : > { %1528 = vmatpush1.msra.mxu0 %v3785_v20  ;;  %1599 = vmatpush1.msra.mxu1 %v3789_v21 }
 0x36a   : > { %1529 = vmatprep.subr.mxu0 %v3793_v22  ;;  %1600 = vmatprep.subr.mxu1 %v3797_v23 }
 0x36b   : > { %1530 = vmatpush1.msra.mxu0 %v3801_v24  ;;  %1601 = vmatpush1.msra.mxu1 %v3805_v25 }
 0x36c   : > { %1531 = vmatprep.subr.mxu0 %v3809_v27  ;;  %1602 = vmatprep.subr.mxu1 %v3813_v28 }
 0x36d   : > { %1532 = vmatpush1.msra.mxu0 %v3817_v29  ;;  %1603 = vmatpush1.msra.mxu1 %v3821_v30 }
 0x36e   : > { %1533 = vmatprep.subr.mxu0 %v3825_v32  ;;  %1604 = vmatprep.subr.mxu1 %v3829_v36 }
 0x36f   : > { %1534 = vmatpush1.msra.mxu0 %v3833_v37  ;;  %1605 = vmatpush1.msra.mxu1 %v3837_v38 }
 0x370   : > { %1535 = vmatprep.subr.mxu0 %v3841_v39  ;;  %1606 = vmatprep.subr.mxu1 %v3845_v40 }
 0x371   : > { %1536 = vmatpush1.msra.mxu0 %v3849_v41  ;;  %1607 = vmatpush1.msra.mxu1 %v3853_v42 }
 0x372   : > { %1537 = vmatprep.subr.mxu0 %v3857_v43  ;;  %1608 = vmatprep.subr.mxu1 %v3861_v45 }
 0x373   : > { %1538 = vmatpush1.msra.mxu0 %v3865_v46  ;;  %1609 = vmatpush1.msra.mxu1 %v3869_v47 }
 0x374   : > { %1539 = vmatprep.subr.mxu0 %v3873_v48  ;;  %1610 = vmatprep.subr.mxu1 %v3877_v49 }
 0x375   : > { %1540 = vmatpush1.msra.mxu0 %v3881_v50  ;;  %1611 = vmatpush1.msra.mxu1 %v3885_v51 }
 0x376   : > { %1541 = vmatprep.subr.mxu0 %v3889_v52  ;;  %1612 = vmatprep.subr.mxu1 %v3893_v54 }
 0x377   : > { %1542 = vmatpush1.msra.mxu0 %v3897_v55  ;;  %1613 = vmatpush1.msra.mxu1 %v3901_v56  ;;  %v1330_v56 = vld [vmem:[%s1327_s21 + $0x10] sm:$0xff] }
 0x378   : > { %1543 = vmatprep.subr.mxu0 %v3905_v57  ;;  %1614 = vmatprep.subr.mxu1 %v3909_v58  ;;  %v1331_v58 = vld [vmem:[%s1327_s21 + $0x18] sm:$0xff] }
 0x379   : > { %1544 = vmatpush1.msra.mxu0 %v3913_v59  ;;  %1615 = vmatpush1.msra.mxu1 %v3917_v60 }
 0x37a   : > { %1545 = vmatprep.subr.mxu0 %v3921_v61  ;;  %1616 = vmatprep.subr.mxu1 %v3925_v1  ;;  %v3945_v61 = vld [vmem:[%s3094_s24] sm:$0xff]  ;;  %v3950_v1 = vld [vmem:[%s3094_s24 + $0x10] sm:$0xff]  ;;  %s2543_s24 = sshll.u32 %s3958_s14, 3  ;;  %s1882_s14 = scalar_lea.vmem [#allocation2], %s2580_s13 }
 0x37b   : > { %1546 = vmatpush1.msra.mxu0 %v3929_v53  ;;  %1617 = vmatpush1.msra.mxu1 %v3933_v5  ;;  %4397 = vst [vmem:[#allocation27_spill] sm:$0xff] %v3945_v61  ;;  %4398 = vst [vmem:[#allocation30_spill] sm:$0xff] %v3950_v1  ;;  %v1329_v5 = vld [vmem:[%s1327_s21 + $0x8] sm:$0xff]  ;;  %s1506_s8 = scalar_lea.vmem %s3541_s12, %s2543_s24 [#allocation9] }
 0x37c   : > { %1547 = vmatprep.subr.mxu0 %v3937_v8  ;;  %1618 = vmatprep.subr.mxu1 %v3941_v63  ;;  %v1328_v63 = vld [vmem:[%s1327_s21] sm:$0xff]  ;;  %s2061_s21 = scalar_lea.vmem %s3541_s12, %s2561_s15 [#allocation9] }
 0x37d   : > { %1548 = vmatpush1.msra.mxu0 %v3945_v61  ;;  %1581 = vmatprep.mubr.f32.mxu0 %v4378_v31  ;;  %s4195_s24 = scalar_select %p376_p11, 0, 7 }
 0x37e   : > { %1619 = vmatpush1.msra.mxu1 %v3950_v1  ;;  %1652 = vmatprep.mubr.f32.mxu1 %v4378_v31 }
 0x37f   : > { %1702 = vmatprep.subr.mxu0 %v3686_v33  ;;  %1773 = vmatprep.subr.mxu1 %v3690_v34  ;;  %s2567_s5 = sshll.u32 %s4195_s24, 3 }
 0x41e   : > { %v1398_v61 = vpop.f32.mrf.mxu0  ;;  %v1469_v1 = vpop.f32.mrf.mxu1 }
 0x41f   : > { %v1474_v8 = vadd.f32 %v1398_v61, %v1328_v63  ;;  %v1476_v54 = vadd.f32 %v1469_v1, %v1330_v56  ;;  %v4401_v56 = vld [vmem:[#allocation18_spill] sm:$0xff]  ;;  %v4404_v1 = vld [vmem:[#allocation17_spill] sm:$0xff] }
 0x420   : > { %v1400_v53 = vpop.f32.mrf.mxu0  ;;  %v1471_v33 = vpop.f32.mrf.mxu1  ;;  %v4405_v63 = vld [vmem:[#allocation22_spill] sm:$0xff] }
 0x421   : > { %v2540_v60 = vmul.f32 -1.442695, %v1474_v8  ;;  %v1475_v59 = vadd.f32 %v1400_v53, %v1329_v5  ;;  %v1477_v34 = vadd.f32 %v1471_v33, %v1331_v58  ;;  %v4403_v58 = vld [vmem:[#allocation20_spill] sm:$0xff] }
 0x423   : > { %2693 = vpow2.f32 %v2540_v60  ;;  %v2541_v31 = vmul.f32 -1.442695, %v1475_v59  ;;  %v2542_v57 = vmul.f32 -1.442695, %v1477_v34 }
 0x425   : > { %2695 = vpow2.f32 %v2541_v31 }
 0x426   : > { %2697 = vpow2.f32 %v2542_v57  ;;  %v4402_v57 = vld [vmem:[#allocation15_spill] sm:$0xff] }
 0x430   : > { %v2694_v55 = vpop.eup %2693 }
 0x431   : > { %v1481_v52 = vadd.f32 1.0, %v2694_v55 }
 0x432   : > { %v2696_v51 = vpop.eup %2695 }
 0x433   : > { %2699 = vrcp.f32 %v1481_v52  ;;  %v1487_v61 = vadd.f32 1.0, %v2696_v51  ;;  %v2698_v60 = vpop.eup %2697 }
 0x434   : > { %2701 = vtanh.f32 %v1476_v54  ;;  %v1494_v5 = vadd.f32 1.0, %v2698_v60  ;;  %v4400_v54 = vld [vmem:[#allocation14_spill] sm:$0xff]  ;;  %v4407_v60 = vld [vmem:[#allocation24_spill] sm:$0xff] }
 0x435   : > { %2703 = vrcp.f32 %v1487_v61  ;;  %v4406_v61 = vld [vmem:[#allocation19_spill] sm:$0xff] }
 0x436   : > { %2705 = vrcp.f32 %v1494_v5  ;;  %v4411_v5 = vld [vmem:[#allocation28_spill] sm:$0xff] }
 0x440   : > { %v2700_v53 = vpop.eup %2699 }
 0x441   : > { %v2702_v59 = vpop.eup %2701 }
 0x442   : > { %v2704_v31 = vpop.eup %2703  ;;  %v1499_v8 = vmul.f32 %v2702_v59, %v2700_v53  ;;  %v4408_v53 = vld [vmem:[#allocation21_spill] sm:$0xff]  ;;  %v4409_v59 = vld [vmem:[#allocation26_spill] sm:$0xff] }
 0x443   : > { %v1498_v33 = vmul.f32 %v2704_v31, %v3699_v62  ;;  %v2706_v55 = vpop.eup %2705  ;;  %v4399_v62 = vld [vmem:[#allocation16_spill] sm:$0xff]  ;;  %v4410_v31 = vld [vmem:[#allocation23_spill] sm:$0xff] }
 0x445   : > { %v3962_v34 = vadd.f32 %v1499_v8, %v1498_v33  ;;  %v4412_v8 = vld [vmem:[#allocation25_spill] sm:$0xff] }
 0x446   : > { %v4413_v33 = vld [vmem:[#allocation29_spill] sm:$0xff] }
 0x447   : > { %2707 = vtanh.f32 %v3962_v34 }
 0x454   : > { %v2708_v52 = vpop.eup %2707 }
 0x455   : > { %v1502_v51 = vmul.f32 %v2708_v52, %v2706_v55  ;;  %v4414_v55 = vld [vmem:[#allocation27_spill] sm:$0xff]  ;;  %v4415_v52 = vmov 0.0  }
 0x457   : > { %1507 = vst [vmem:[%s1506_s8] sm:$0xff] %v1502_v51  ;;  %1582 = vmatmul.mubr.f32.vlgmr.msra.gmra.mxu0 %v1502_v51  ;;  %1653 = vmatmul.mubr.f32.vlgmr.msra.gmra.mxu1 %v1502_v51  ;;  %v4416_v51 = vld [vmem:[#allocation30_spill] sm:$0xff]  ;;  %s2581_s8 = sshll.u32 %s4195_s24, 5 }
 0x458   : > { %1703 = vmatpush1.msra.mxu0 %v3705_v19  ;;  %1774 = vmatpush1.msra.mxu1 %v3709_v6  ;;  %s2067_s10 = scalar_lea.vmem [#allocation2], %s2581_s8 }
 0x459   : > { %1704 = vmatprep.subr.mxu0 %v3713_v7  ;;  %1775 = vmatprep.subr.mxu1 %v3717_v4 }
 0x45a   : > { %1705 = vmatpush1.msra.mxu0 %v3721_v14  ;;  %1776 = vmatpush1.msra.mxu1 %v3725_v35 }
 0x45b   : > { %1706 = vmatprep.subr.mxu0 %v3729_v0  ;;  %1777 = vmatprep.subr.mxu1 %v3733_v9 }
 0x45c   : > { %1707 = vmatpush1.msra.mxu0 %v3737_v2  ;;  %1778 = vmatpush1.msra.mxu1 %v3741_v26 }
 0x45d   : > { %1708 = vmatprep.subr.mxu0 %v3745_v44  ;;  %1779 = vmatprep.subr.mxu1 %v3749_v11 }
 0x45e   : > { %1709 = vmatpush1.msra.mxu0 %v3753_v10  ;;  %1780 = vmatpush1.msra.mxu1 %v3757_v3 }
 0x45f   : > { %1710 = vmatprep.subr.mxu0 %v3761_v12  ;;  %1781 = vmatprep.subr.mxu1 %v3765_v13 }
 0x460   : > { %1711 = vmatpush1.msra.mxu0 %v3769_v15  ;;  %1782 = vmatpush1.msra.mxu1 %v3773_v16 }
 0x461   : > { %1712 = vmatprep.subr.mxu0 %v3777_v17  ;;  %1783 = vmatprep.subr.mxu1 %v3781_v18 }
 0x462   : > { %1713 = vmatpush1.msra.mxu0 %v3785_v20  ;;  %1784 = vmatpush1.msra.mxu1 %v3789_v21 }
 0x463   : > { %1714 = vmatprep.subr.mxu0 %v3793_v22  ;;  %1785 = vmatprep.subr.mxu1 %v3797_v23 }
 0x464   : > { %1715 = vmatpush1.msra.mxu0 %v3801_v24  ;;  %1786 = vmatpush1.msra.mxu1 %v3805_v25 }
 0x465   : > { %1716 = vmatprep.subr.mxu0 %v3809_v27  ;;  %1787 = vmatprep.subr.mxu1 %v3813_v28 }
 0x466   : > { %1717 = vmatpush1.msra.mxu0 %v3817_v29  ;;  %1788 = vmatpush1.msra.mxu1 %v3821_v30 }
 0x467   : > { %1718 = vmatprep.subr.mxu0 %v3825_v32  ;;  %1789 = vmatprep.subr.mxu1 %v3829_v36 }
 0x468   : > { %1719 = vmatpush1.msra.mxu0 %v3833_v37  ;;  %1790 = vmatpush1.msra.mxu1 %v3837_v38 }
 0x469   : > { %1720 = vmatprep.subr.mxu0 %v3841_v39  ;;  %1791 = vmatprep.subr.mxu1 %v3845_v40 }
 0x46a   : > { %1721 = vmatpush1.msra.mxu0 %v3849_v41  ;;  %1792 = vmatpush1.msra.mxu1 %v3853_v42 }
 0x46b   : > { %1722 = vmatprep.subr.mxu0 %v3857_v43  ;;  %1793 = vmatprep.subr.mxu1 %v3861_v45 }
 0x46c   : > { %1723 = vmatpush1.msra.mxu0 %v3865_v46  ;;  %1794 = vmatpush1.msra.mxu1 %v3869_v47 }
 0x46d   : > { %1724 = vmatprep.subr.mxu0 %v3873_v48  ;;  %1795 = vmatprep.subr.mxu1 %v3877_v49 }
 0x46e   : > { %1725 = vmatpush1.msra.mxu0 %v3881_v50  ;;  %1796 = vmatpush1.msra.mxu1 %v4399_v62 }
 0x46f   : > { %1726 = vmatprep.subr.mxu0 %v4400_v54  ;;  %1797 = vmatprep.subr.mxu1 %v4401_v56 }
 0x470   : > { %1727 = vmatpush1.msra.mxu0 %v4402_v57  ;;  %1798 = vmatpush1.msra.mxu1 %v4403_v58  ;;  %v1515_v58 = vld [vmem:[%s1512_s29 + $0x10] sm:$0xff] }
 0x471   : > { %1728 = vmatprep.subr.mxu0 %v4404_v1  ;;  %1799 = vmatprep.subr.mxu1 %v4405_v63  ;;  %v1516_v63 = vld [vmem:[%s1512_s29 + $0x18] sm:$0xff] }
 0x472   : > { %1729 = vmatpush1.msra.mxu0 %v4406_v61  ;;  %1800 = vmatpush1.msra.mxu1 %v4407_v60  ;;  %v4417_v60 = vld [vmem:[#allocation12_spill] sm:$0xff] }
 0x473   : > { %1730 = vmatprep.subr.mxu0 %v4408_v53  ;;  %1801 = vmatprep.subr.mxu1 %v4409_v59  ;;  %v4418_v53 = vld [vmem:[#allocation13_spill] sm:$0xff] }
 0x474   : > { %1731 = vmatpush1.msra.mxu0 %v4410_v31  ;;  %1802 = vmatpush1.msra.mxu1 %v4411_v5 }
 0x475   : > { %1732 = vmatprep.subr.mxu0 %v4412_v8  ;;  %1803 = vmatprep.subr.mxu1 %v4413_v33  ;;  %v1513_v8 = vld [vmem:[%s1512_s29] sm:$0xff] }
 0x476   : > { %1733 = vmatpush1.msra.mxu0 %v4414_v55  ;;  %1766 = vmatprep.mubr.f32.mxu0 %v4415_v52  ;;  %v1514_v55 = vld [vmem:[%s1512_s29 + $0x8] sm:$0xff]  ;;  %s2246_s29 = scalar_lea.vmem %s3541_s12, %s2567_s5 [#allocation9] }
 0x477   : > { %1804 = vmatpush1.msra.mxu1 %v4416_v51  ;;  %1837 = vmatprep.mubr.f32.mxu1 %v4415_v52 }
 0x478   : > { %1887 = vmatprep.subr.mxu0 %v4417_v60  ;;  %1958 = vmatprep.subr.mxu1 %v4418_v53 }
 0x517   : > { %v1583_v33 = vpop.f32.mrf.mxu0  ;;  %v1654_v51 = vpop.f32.mrf.mxu1 }
 0x518   : > { %v1659_v5 = vadd.f32 %v1583_v33, %v1513_v8  ;;  %v1661_v56 = vadd.f32 %v1654_v51, %v1515_v58  ;;  %v4421_v58 = vld [vmem:[#allocation18_spill] sm:$0xff] }
 0x519   : > { %v1585_v31 = vpop.f32.mrf.mxu0  ;;  %v1656_v60 = vpop.f32.mrf.mxu1  ;;  %v4425_v51 = vld [vmem:[#allocation22_spill] sm:$0xff] }
 0x51a   : > { %v2546_v59 = vmul.f32 -1.442695, %v1659_v5  ;;  %v1660_v61 = vadd.f32 %v1585_v31, %v1514_v55  ;;  %v1662_v53 = vadd.f32 %v1656_v60, %v1516_v63 }
 0x51c   : > { %2709 = vpow2.f32 %v2546_v59  ;;  %v2547_v52 = vmul.f32 -1.442695, %v1660_v61  ;;  %v2548_v1 = vmul.f32 -1.442695, %v1662_v53  ;;  %v4423_v53 = vld [vmem:[#allocation20_spill] sm:$0xff] }
 0x51e   : > { %2711 = vpow2.f32 %v2547_v52  ;;  %v4424_v52 = vld [vmem:[#allocation17_spill] sm:$0xff] }
 0x51f   : > { %2713 = vpow2.f32 %v2548_v1  ;;  %v4422_v1 = vld [vmem:[#allocation15_spill] sm:$0xff] }
 0x529   : > { %v2710_v57 = vpop.eup %2709 }
 0x52a   : > { %v1666_v54 = vadd.f32 1.0, %v2710_v57 }
 0x52b   : > { %v2712_v62 = vpop.eup %2711 }
 0x52c   : > { %2715 = vrcp.f32 %v1666_v54  ;;  %v1672_v8 = vadd.f32 1.0, %v2712_v62  ;;  %v2714_v59 = vpop.eup %2713 }
 0x52d   : > { %2717 = vtanh.f32 %v1661_v56  ;;  %v1679_v33 = vadd.f32 1.0, %v2714_v59  ;;  %v4420_v56 = vld [vmem:[#allocation14_spill] sm:$0xff]  ;;  %v4427_v59 = vld [vmem:[#allocation24_spill] sm:$0xff] }
 0x52e   : > { %2719 = vrcp.f32 %v1672_v8  ;;  %v4426_v8 = vld [vmem:[#allocation19_spill] sm:$0xff] }
 0x52f   : > { %2721 = vrcp.f32 %v1679_v33  ;;  %v4431_v33 = vld [vmem:[#allocation28_spill] sm:$0xff] }
 0x539   : > { %v2716_v31 = vpop.eup %2715 }
 0x53a   : > { %v2718_v61 = vpop.eup %2717 }
 0x53b   : > { %v2720_v5 = vpop.eup %2719  ;;  %v1684_v55 = vmul.f32 %v2718_v61, %v2716_v31  ;;  %v4428_v31 = vld [vmem:[#allocation21_spill] sm:$0xff]  ;;  %v4429_v61 = vld [vmem:[#allocation26_spill] sm:$0xff] }
 0x53c   : > { %v1683_v63 = vmul.f32 %v2720_v5, %v3962_v34  ;;  %v2722_v57 = vpop.eup %2721  ;;  %v4419_v34 = vld [vmem:[#allocation16_spill] sm:$0xff]  ;;  %v4430_v5 = vld [vmem:[#allocation23_spill] sm:$0xff] }
 0x53e   : > { %v4039_v60 = vadd.f32 %v1684_v55, %v1683_v63  ;;  %v4432_v55 = vld [vmem:[#allocation25_spill] sm:$0xff] }
 0x53f   : > { %v4433_v63 = vld [vmem:[#allocation29_spill] sm:$0xff] }
 0x540   : > { %2723 = vtanh.f32 %v4039_v60 }
 0x54d   : > { %v2724_v54 = vpop.eup %2723 }
 0x54e   : > { %v1687_v62 = vmul.f32 %v2724_v54, %v2722_v57  ;;  %v4434_v57 = vld [vmem:[#allocation27_spill] sm:$0xff]  ;;  %v4435_v54 = vmov 0.0  }
 0x550   : > { %1692 = vst [vmem:[%s1691_s6] sm:$0xff] %v1687_v62  ;;  %1767 = vmatmul.mubr.f32.vlgmr.msra.gmra.mxu0 %v1687_v62  ;;  %1838 = vmatmul.mubr.f32.vlgmr.msra.gmra.mxu1 %v1687_v62  ;;  %v4436_v62 = vld [vmem:[#allocation30_spill] sm:$0xff] }
 0x551   : > { %1888 = vmatpush1.msra.mxu0 %v3705_v19  ;;  %1959 = vmatpush1.msra.mxu1 %v3709_v6 }
 0x552   : > { %1889 = vmatprep.subr.mxu0 %v3713_v7  ;;  %1960 = vmatprep.subr.mxu1 %v3717_v4 }
 0x553   : > { %1890 = vmatpush1.msra.mxu0 %v3721_v14  ;;  %1961 = vmatpush1.msra.mxu1 %v3725_v35 }
 0x554   : > { %1891 = vmatprep.subr.mxu0 %v3729_v0  ;;  %1962 = vmatprep.subr.mxu1 %v3733_v9 }
 0x555   : > { %1892 = vmatpush1.msra.mxu0 %v3737_v2  ;;  %1963 = vmatpush1.msra.mxu1 %v3741_v26 }
 0x556   : > { %1893 = vmatprep.subr.mxu0 %v3745_v44  ;;  %1964 = vmatprep.subr.mxu1 %v3749_v11 }
 0x557   : > { %1894 = vmatpush1.msra.mxu0 %v3753_v10  ;;  %1965 = vmatpush1.msra.mxu1 %v3757_v3 }
 0x558   : > { %1895 = vmatprep.subr.mxu0 %v3761_v12  ;;  %1966 = vmatprep.subr.mxu1 %v3765_v13 }
 0x559   : > { %1896 = vmatpush1.msra.mxu0 %v3769_v15  ;;  %1967 = vmatpush1.msra.mxu1 %v3773_v16 }
 0x55a   : > { %1897 = vmatprep.subr.mxu0 %v3777_v17  ;;  %1968 = vmatprep.subr.mxu1 %v3781_v18 }
 0x55b   : > { %1898 = vmatpush1.msra.mxu0 %v3785_v20  ;;  %1969 = vmatpush1.msra.mxu1 %v3789_v21 }
 0x55c   : > { %1899 = vmatprep.subr.mxu0 %v3793_v22  ;;  %1970 = vmatprep.subr.mxu1 %v3797_v23 }
 0x55d   : > { %1900 = vmatpush1.msra.mxu0 %v3801_v24  ;;  %1971 = vmatpush1.msra.mxu1 %v3805_v25 }
 0x55e   : > { %1901 = vmatprep.subr.mxu0 %v3809_v27  ;;  %1972 = vmatprep.subr.mxu1 %v3813_v28 }
 0x55f   : > { %1902 = vmatpush1.msra.mxu0 %v3817_v29  ;;  %1973 = vmatpush1.msra.mxu1 %v3821_v30 }
 0x560   : > { %1903 = vmatprep.subr.mxu0 %v3825_v32  ;;  %1974 = vmatprep.subr.mxu1 %v3829_v36 }
 0x561   : > { %1904 = vmatpush1.msra.mxu0 %v3833_v37  ;;  %1975 = vmatpush1.msra.mxu1 %v3837_v38 }
 0x562   : > { %1905 = vmatprep.subr.mxu0 %v3841_v39  ;;  %1976 = vmatprep.subr.mxu1 %v3845_v40 }
 0x563   : > { %1906 = vmatpush1.msra.mxu0 %v3849_v41  ;;  %1977 = vmatpush1.msra.mxu1 %v3853_v42 }
 0x564   : > { %1907 = vmatprep.subr.mxu0 %v3857_v43  ;;  %1978 = vmatprep.subr.mxu1 %v3861_v45 }
 0x565   : > { %1908 = vmatpush1.msra.mxu0 %v3865_v46  ;;  %1979 = vmatpush1.msra.mxu1 %v3869_v47 }
 0x566   : > { %1909 = vmatprep.subr.mxu0 %v3873_v48  ;;  %1980 = vmatprep.subr.mxu1 %v3877_v49 }
 0x567   : > { %1910 = vmatpush1.msra.mxu0 %v3881_v50  ;;  %1981 = vmatpush1.msra.mxu1 %v4419_v34 }
 0x568   : > { %1911 = vmatprep.subr.mxu0 %v4420_v56  ;;  %1982 = vmatprep.subr.mxu1 %v4421_v58 }
 0x569   : > { %1912 = vmatpush1.msra.mxu0 %v4422_v1  ;;  %1983 = vmatpush1.msra.mxu1 %v4423_v53  ;;  %v1700_v53 = vld [vmem:[%s1697_s26 + $0x10] sm:$0xff] }
 0x56a   : > { %1913 = vmatprep.subr.mxu0 %v4424_v52  ;;  %1984 = vmatprep.subr.mxu1 %v4425_v51  ;;  %v1701_v51 = vld [vmem:[%s1697_s26 + $0x18] sm:$0xff] }
 0x56b   : > { %1914 = vmatpush1.msra.mxu0 %v4426_v8  ;;  %1985 = vmatpush1.msra.mxu1 %v4427_v59  ;;  %v4437_v59 = vld [vmem:[#allocation12_spill] sm:$0xff] }
 0x56c   : > { %1915 = vmatprep.subr.mxu0 %v4428_v31  ;;  %1986 = vmatprep.subr.mxu1 %v4429_v61  ;;  %v4438_v31 = vld [vmem:[#allocation13_spill] sm:$0xff] }
 0x56d   : > { %1916 = vmatpush1.msra.mxu0 %v4430_v5  ;;  %1987 = vmatpush1.msra.mxu1 %v4431_v33 }
 0x56e   : > { %1917 = vmatprep.subr.mxu0 %v4432_v55  ;;  %1988 = vmatprep.subr.mxu1 %v4433_v63  ;;  %v1698_v55 = vld [vmem:[%s1697_s26] sm:$0xff] }
 0x56f   : > { %1918 = vmatpush1.msra.mxu0 %v4434_v57  ;;  %1951 = vmatprep.mubr.f32.mxu0 %v4435_v54  ;;  %v1699_v57 = vld [vmem:[%s1697_s26 + $0x8] sm:$0xff] }
 0x570   : > { %1989 = vmatpush1.msra.mxu1 %v4436_v62  ;;  %2022 = vmatprep.mubr.f32.mxu1 %v4435_v54 }
 0x571   : > { %2072 = vmatprep.subr.mxu0 %v4437_v59  ;;  %2143 = vmatprep.subr.mxu1 %v4438_v31 }
 0x610   : > { %v1768_v63 = vpop.f32.mrf.mxu0  ;;  %v1839_v62 = vpop.f32.mrf.mxu1 }
 0x611   : > { %v1844_v33 = vadd.f32 %v1768_v63, %v1698_v55  ;;  %v1846_v58 = vadd.f32 %v1839_v62, %v1700_v53 }
 0x612   : > { %v1770_v5 = vpop.f32.mrf.mxu0  ;;  %v1841_v59 = vpop.f32.mrf.mxu1 }
 0x613   : > { %v2552_v61 = vmul.f32 -1.442695, %v1844_v33  ;;  %v1845_v8 = vadd.f32 %v1770_v5, %v1699_v57  ;;  %v1847_v31 = vadd.f32 %v1841_v59, %v1701_v51 }
 0x615   : > { %2725 = vpow2.f32 %v2552_v61  ;;  %v2553_v54 = vmul.f32 -1.442695, %v1845_v8  ;;  %v2554_v52 = vmul.f32 -1.442695, %v1847_v31  ;;  %v2069_v31 = vld [vmem:[%s2067_s10 + $0x8] sm:$0xff] }
 0x617   : > { %2727 = vpow2.f32 %v2553_v54 }
 0x618   : > { %2729 = vpow2.f32 %v2554_v52  ;;  %v2068_v52 = vld [vmem:[%s2067_s10] sm:$0xff] }
 0x622   : > { %v2726_v1 = vpop.eup %2725 }
 0x623   : > { %v1851_v56 = vadd.f32 1.0, %v2726_v1 }
 0x624   : > { %v2728_v34 = vpop.eup %2727 }
 0x625   : > { %2731 = vrcp.f32 %v1851_v56  ;;  %v1857_v55 = vadd.f32 1.0, %v2728_v34  ;;  %v2730_v61 = vpop.eup %2729 }
 0x626   : > { %2733 = vtanh.f32 %v1846_v58  ;;  %v1864_v63 = vadd.f32 1.0, %v2730_v61 }
 0x627   : > { %2735 = vrcp.f32 %v1857_v55 }
 0x628   : > { %2737 = vrcp.f32 %v1864_v63 }
 0x632   : > { %v2732_v5 = vpop.eup %2731 }
 0x633   : > { %v2734_v8 = vpop.eup %2733 }
 0x634   : > { %v2736_v33 = vpop.eup %2735  ;;  %v1869_v57 = vmul.f32 %v2734_v8, %v2732_v5 }
 0x635   : > { %v1868_v51 = vmul.f32 %v2736_v33, %v4039_v60  ;;  %v2738_v1 = vpop.eup %2737 }
 0x637   : > { %v4116_v54 = vadd.f32 %v1869_v57, %v1868_v51  ;;  %v2071_v57 = vld [vmem:[%s2067_s10 + $0x18] sm:$0xff] }
 0x639   : > { %2739 = vtanh.f32 %v4116_v54 }
 0x646   : > { %v2740_v56 = vpop.eup %2739 }
 0x647   : > { %v1872_v34 = vmul.f32 %v2740_v56, %v2738_v1  ;;  %v2070_v1 = vld [vmem:[%s2067_s10 + $0x10] sm:$0xff] }
 0x649   : > { %1877 = vst [vmem:[%s1876_s7] sm:$0xff] %v1872_v34  ;;  %1952 = vmatmul.mubr.f32.vlgmr.msra.gmra.mxu0 %v1872_v34  ;;  %2023 = vmatmul.mubr.f32.vlgmr.msra.gmra.mxu1 %v1872_v34 }
 0x64a   : > { %2073 = vmatpush1.msra.mxu0 %v3705_v19  ;;  %2144 = vmatpush1.msra.mxu1 %v3709_v6  ;;  %v4439_v19 = vld [vmem:[#allocation16_spill] sm:$0xff]  ;;  %v4440_v6 = vld [vmem:[#allocation14_spill] sm:$0xff] }
 0x64b   : > { %2074 = vmatprep.subr.mxu0 %v3713_v7  ;;  %2145 = vmatprep.subr.mxu1 %v3717_v4  ;;  %v4441_v7 = vld [vmem:[#allocation18_spill] sm:$0xff]  ;;  %v4442_v4 = vld [vmem:[#allocation15_spill] sm:$0xff] }
 0x64c   : > { %2075 = vmatpush1.msra.mxu0 %v3721_v14  ;;  %2146 = vmatpush1.msra.mxu1 %v3725_v35  ;;  %v4443_v14 = vld [vmem:[#allocation20_spill] sm:$0xff]  ;;  %v4444_v35 = vld [vmem:[#allocation17_spill] sm:$0xff] }
 0x64d   : > { %2076 = vmatprep.subr.mxu0 %v3729_v0  ;;  %2147 = vmatprep.subr.mxu1 %v3733_v9  ;;  %v4445_v0 = vld [vmem:[#allocation22_spill] sm:$0xff]  ;;  %v4446_v9 = vld [vmem:[#allocation19_spill] sm:$0xff] }
 0x64e   : > { %2077 = vmatpush1.msra.mxu0 %v3737_v2  ;;  %2148 = vmatpush1.msra.mxu1 %v3741_v26  ;;  %v4447_v2 = vld [vmem:[#allocation24_spill] sm:$0xff]  ;;  %v4448_v26 = vld [vmem:[#allocation21_spill] sm:$0xff] }
 0x64f   : > { %2078 = vmatprep.subr.mxu0 %v3745_v44  ;;  %2149 = vmatprep.subr.mxu1 %v3749_v11  ;;  %v4449_v44 = vld [vmem:[#allocation26_spill] sm:$0xff]  ;;  %v4450_v11 = vld [vmem:[#allocation23_spill] sm:$0xff] }
 0x650   : > { %2079 = vmatpush1.msra.mxu0 %v3753_v10  ;;  %2150 = vmatpush1.msra.mxu1 %v3757_v3  ;;  %v4451_v10 = vld [vmem:[#allocation28_spill] sm:$0xff]  ;;  %v4452_v3 = vld [vmem:[#allocation25_spill] sm:$0xff] }
 0x651   : > { %2080 = vmatprep.subr.mxu0 %v3761_v12  ;;  %2151 = vmatprep.subr.mxu1 %v3765_v13  ;;  %v4453_v12 = vld [vmem:[#allocation29_spill] sm:$0xff]  ;;  %v4454_v13 = vld [vmem:[#allocation27_spill] sm:$0xff] }
 0x652   : > { %2081 = vmatpush1.msra.mxu0 %v3769_v15  ;;  %2152 = vmatpush1.msra.mxu1 %v3773_v16  ;;  %v4455_v15 = vmov 0.0   ;;  %v4456_v16 = vld [vmem:[#allocation30_spill] sm:$0xff] }
 0x653   : > { %2082 = vmatprep.subr.mxu0 %v3777_v17  ;;  %2153 = vmatprep.subr.mxu1 %v3781_v18  ;;  %v1883_v17 = vld [vmem:[%s1882_s14] sm:$0xff] }
 0x654   : > { %2083 = vmatpush1.msra.mxu0 %v3785_v20  ;;  %2154 = vmatpush1.msra.mxu1 %v3789_v21  ;;  %v1884_v21 = vld [vmem:[%s1882_s14 + $0x8] sm:$0xff] }
 0x655   : > { %2084 = vmatprep.subr.mxu0 %v3793_v22  ;;  %2155 = vmatprep.subr.mxu1 %v3797_v23 }
 0x656   : > { %2085 = vmatpush1.msra.mxu0 %v3801_v24  ;;  %2156 = vmatpush1.msra.mxu1 %v3805_v25 }
 0x657   : > { %2086 = vmatprep.subr.mxu0 %v3809_v27  ;;  %2157 = vmatprep.subr.mxu1 %v3813_v28 }
 0x658   : > { %2087 = vmatpush1.msra.mxu0 %v3817_v29  ;;  %2158 = vmatpush1.msra.mxu1 %v3821_v30  ;;  %v1886_v29 = vld [vmem:[%s1882_s14 + $0x18] sm:$0xff] }
 0x659   : > { %2088 = vmatprep.subr.mxu0 %v3825_v32  ;;  %2159 = vmatprep.subr.mxu1 %v3829_v36  ;;  %v1885_v36 = vld [vmem:[%s1882_s14 + $0x10] sm:$0xff] }
 0x65a   : > { %2089 = vmatpush1.msra.mxu0 %v3833_v37  ;;  %2160 = vmatpush1.msra.mxu1 %v3837_v38 }
 0x65b   : > { %2090 = vmatprep.subr.mxu0 %v3841_v39  ;;  %2161 = vmatprep.subr.mxu1 %v3845_v40 }
 0x65c   : > { %2091 = vmatpush1.msra.mxu0 %v3849_v41  ;;  %2162 = vmatpush1.msra.mxu1 %v3853_v42 }
 0x65d   : > { %2092 = vmatprep.subr.mxu0 %v3857_v43  ;;  %2163 = vmatprep.subr.mxu1 %v3861_v45 }
 0x65e   : > { %2093 = vmatpush1.msra.mxu0 %v3865_v46  ;;  %2164 = vmatpush1.msra.mxu1 %v3869_v47 }
 0x65f   : > { %2094 = vmatprep.subr.mxu0 %v3873_v48  ;;  %2165 = vmatprep.subr.mxu1 %v3877_v49 }
 0x660   : > { %2095 = vmatpush1.msra.mxu0 %v3881_v50  ;;  %2166 = vmatpush1.msra.mxu1 %v4439_v19 }
 0x661   : > { %2096 = vmatprep.subr.mxu0 %v4440_v6  ;;  %2167 = vmatprep.subr.mxu1 %v4441_v7 }
 0x662   : > { %2097 = vmatpush1.msra.mxu0 %v4442_v4  ;;  %2168 = vmatpush1.msra.mxu1 %v4443_v14 }
 0x663   : > { %2098 = vmatprep.subr.mxu0 %v4444_v35  ;;  %2169 = vmatprep.subr.mxu1 %v4445_v0 }
 0x664   : > { %2099 = vmatpush1.msra.mxu0 %v4446_v9  ;;  %2170 = vmatpush1.msra.mxu1 %v4447_v2 }
 0x665   : > { %2100 = vmatprep.subr.mxu0 %v4448_v26  ;;  %2171 = vmatprep.subr.mxu1 %v4449_v44 }
 0x666   : > { %2101 = vmatpush1.msra.mxu0 %v4450_v11  ;;  %2172 = vmatpush1.msra.mxu1 %v4451_v10 }
 0x667   : > { %2102 = vmatprep.subr.mxu0 %v4452_v3  ;;  %2173 = vmatprep.subr.mxu1 %v4453_v12 }
 0x668   : > { %2103 = vmatpush1.msra.mxu0 %v4454_v13  ;;  %2136 = vmatprep.mubr.f32.mxu0 %v4455_v15 }
 0x669   : > { %2174 = vmatpush1.msra.mxu1 %v4456_v16  ;;  %2207 = vmatprep.mubr.f32.mxu1 %v4455_v15 }
 0x709   : > { %v1953_v18 = vpop.f32.mrf.mxu0  ;;  %v2024_v25 = vpop.f32.mrf.mxu1 }
 0x70a   : > { %v2029_v20 = vadd.f32 %v1953_v18, %v1883_v17  ;;  %v2031_v38 = vadd.f32 %v2024_v25, %v1885_v36 }
 0x70b   : > { %v1955_v22 = vpop.f32.mrf.mxu0  ;;  %v2026_v28 = vpop.f32.mrf.mxu1 }
 0x70c   : > { %v2558_v23 = vmul.f32 -1.442695, %v2029_v20  ;;  %v2030_v24 = vadd.f32 %v1955_v22, %v1884_v21  ;;  %v2032_v30 = vadd.f32 %v2026_v28, %v1886_v29 }
 0x70e   : > { %2741 = vpow2.f32 %v2558_v23  ;;  %v2559_v27 = vmul.f32 -1.442695, %v2030_v24  ;;  %v2560_v32 = vmul.f32 -1.442695, %v2032_v30 }
 0x710   : > { %2743 = vpow2.f32 %v2559_v27 }
 0x711   : > { %2745 = vpow2.f32 %v2560_v32 }
 0x71b   : > { %v2742_v37 = vpop.eup %2741 }
 0x71c   : > { %v2036_v39 = vadd.f32 1.0, %v2742_v37 }
 0x71d   : > { %v2744_v40 = vpop.eup %2743 }
 0x71e   : > { %2747 = vrcp.f32 %v2036_v39  ;;  %v2042_v41 = vadd.f32 1.0, %v2744_v40  ;;  %v2746_v42 = vpop.eup %2745 }
 0x71f   : > { %2749 = vtanh.f32 %v2031_v38  ;;  %v2049_v47 = vadd.f32 1.0, %v2746_v42 }
 0x720   : > { %2751 = vrcp.f32 %v2042_v41 }
 0x721   : > { %2753 = vrcp.f32 %v2049_v47 }
 0x72b   : > { %v2748_v43 = vpop.eup %2747 }
 0x72c   : > { %v2750_v45 = vpop.eup %2749 }
 0x72d   : > { %v2752_v46 = vpop.eup %2751  ;;  %v2054_v48 = vmul.f32 %v2750_v45, %v2748_v43 }
 0x72e   : > { %v2053_v49 = vmul.f32 %v2752_v46, %v4116_v54  ;;  %v2754_v60 = vpop.eup %2753 }
 0x730   : > { %v2055_v50 = vadd.f32 %v2054_v48, %v2053_v49 }
 0x732   : > { %2755 = vtanh.f32 %v2055_v50 }
 0x73f   : > { %v2756_v58 = vpop.eup %2755 }
 0x740   : > { %v2057_v53 = vmul.f32 %v2756_v58, %v2754_v60 }
 0x742   : > { %2062 = vst [vmem:[%s2061_s21] sm:$0xff] %v2057_v53  ;;  %2137 = vmatmul.mubr.f32.vlgmr.msra.gmra.mxu0 %v2057_v53  ;;  %2208 = vmatmul.mubr.f32.vlgmr.msra.gmra.mxu1 %v2057_v53 }
 0x802   : > { %v2138_v62 = vpop.f32.mrf.mxu0  ;;  %v2209_v8 = vpop.f32.mrf.mxu1 }
 0x803   : > { %v2214_v59 = vadd.f32 %v2138_v62, %v2068_v52  ;;  %v2216_v34 = vadd.f32 %v2209_v8, %v2070_v1 }
 0x804   : > { %v2140_v55 = vpop.f32.mrf.mxu0  ;;  %v2211_v63 = vpop.f32.mrf.mxu1 }
 0x805   : > { %v2564_v61 = vmul.f32 -1.442695, %v2214_v59  ;;  %v2215_v5 = vadd.f32 %v2140_v55, %v2069_v31  ;;  %v2217_v51 = vadd.f32 %v2211_v63, %v2071_v57 }
 0x807   : > { %2757 = vpow2.f32 %v2564_v61  ;;  %v2565_v33 = vmul.f32 -1.442695, %v2215_v5  ;;  %v2566_v54 = vmul.f32 -1.442695, %v2217_v51 }
 0x809   : > { %2759 = vpow2.f32 %v2565_v33 }
 0x80a   : > { %2761 = vpow2.f32 %v2566_v54 }
 0x814   : > { %v2758_v56 = vpop.eup %2757 }
 0x815   : > { %v2221_v19 = vadd.f32 1.0, %v2758_v56 }
 0x816   : > { %v2760_v6 = vpop.eup %2759 }
 0x817   : > { %2763 = vrcp.f32 %v2221_v19  ;;  %v2227_v7 = vadd.f32 1.0, %v2760_v6  ;;  %v2762_v4 = vpop.eup %2761 }
 0x818   : > { %2765 = vtanh.f32 %v2216_v34  ;;  %v2234_v9 = vadd.f32 1.0, %v2762_v4 }
 0x819   : > { %2767 = vrcp.f32 %v2227_v7 }
 0x81a   : > { %2769 = vrcp.f32 %v2234_v9 }
 0x824   : > { %v2764_v14 = vpop.eup %2763 }
 0x825   : > { %v2766_v35 = vpop.eup %2765 }
 0x826   : > { %v2768_v0 = vpop.eup %2767  ;;  %v2239_v2 = vmul.f32 %v2766_v35, %v2764_v14 }
 0x827   : > { %v2238_v26 = vmul.f32 %v2768_v0, %v2055_v50  ;;  %v2770_v11 = vpop.eup %2769 }
 0x829   : > { %v2240_v44 = vadd.f32 %v2239_v2, %v2238_v26 }
 0x82b   : > { %2771 = vtanh.f32 %v2240_v44 }
 0x837   : > { %2254 = sbr.rel (!%p3029_p9) target bundleno = 2120 (0x848), region = 52 }
 0x838   : > { %v2772_v10 = vpop.eup %2771 }
 0x839   : > { %v2242_v3 = vmul.f32 %v2772_v10, %v2770_v11 }
 0x83b   : > { %2247 = vst [vmem:[%s2246_s29] sm:$0xff] %v2242_v3 }
 0x842   : > { %v2309_v12 = vld [vmem:[%s3541_s12] sm:$0xff]  ;;  %v2311_v13 = vld [vmem:[%s3541_s12 + $0x8] sm:$0xff]  ;;  %v2313_v15 = vld [vmem:[%s3541_s12 + $0x10] sm:$0xff] }
 0x843   : > { %v2315_v16 = vld [vmem:[%s3541_s12 + $0x18] sm:$0xff]  ;;  %v2317_v17 = vld [vmem:[%s3541_s12 + $0x20] sm:$0xff]  ;;  %v2319_v18 = vld [vmem:[%s3541_s12 + $0x28] sm:$0xff]  ;;  %2310 = vst [vmem:[%s2266_s23] sm:$0xff] %v2309_v12 }
 0x844   : > { %2312 = vst [vmem:[%s2266_s23 + $0x10] sm:$0xff] %v2311_v13  ;;  %2314 = vst [vmem:[%s2266_s23 + $0x20] sm:$0xff] %v2313_v15  ;;  %v2321_v20 = vld [vmem:[%s3541_s12 + $0x30] sm:$0xff]  ;;  %v2323_v21 = vld [vmem:[%s3541_s12 + $0x38] sm:$0xff] }
 0x845   : > { %2316 = vst [vmem:[%s2266_s23 + $0x30] sm:$0xff] %v2315_v16  ;;  %2318 = vst [vmem:[%s2266_s23 + $0x40] sm:$0xff] %v2317_v17 }
 0x846   : > { %2320 = vst [vmem:[%s2266_s23 + $0x50] sm:$0xff] %v2319_v18  ;;  %2322 = vst [vmem:[%s2266_s23 + $0x60] sm:$0xff] %v2321_v20 }
 0x847   : > { %2324 = vst [vmem:[%s2266_s23 + $0x70] sm:$0xff] %v2323_v21 }
 0x848 PF: > { %s20_s20 = sadd.s32 1, %s2947_s20   ;;  %s4457_s15 = smov %s2931_s16 }
 0x849   : > { %p17_p9 = scmp.ge.s32.totalorder %s20_s20, 4   ;;  %s4458_s16 = smov %s2935_s17 }
 0x84a   : > { %s4459_s17 = smov %s3027_s27  ;;  %s4460_s18 = smov %s2943_s19 }
 0x84b   : > { %s4461_s19 = smov %s4463_s22  ;;  %19 = sbr.rel (!%p17_p9) target bundleno = 6 (0x6), region = 153 }
 0x850   :  { %2340 = vsyncpa [#allocation6], 1 }
 0x851   :  { %2342 = vsyncpa [#allocation6 + $0x1], 1 }
 0x852   :  { %2343 = vsyncpa [#allocation8], 1 }
 0x853   :  { %2345 = vsyncpa [#allocation8 + $0x1], 1 }

// kernel: _lambda_.3
= control target key start
LH: loop header
LB: loop body
LE: loop exit
PB: predicated region body
PF: predicated region fallthrough
CT: control target
= control target key end

     0   :  { %9 = vsyncpa [#allocation6], 0  ;;  %s4352_s0 = inlined_call_operand.vmem [shape: f32[8,8,256], index: 0, kind: input, shape index: {}]   ;;  %s4353_s1 = inlined_call_operand.hbm [shape: f32[2,256,512], index: 1, kind: input, shape index: {}]   ;;  %s4354_s2 = inlined_call_operand.vmem [shape: f32[2,128,512], index: 2, kind: input, shape index: {}]   ;;  %s4355_s3 = inlined_call_operand.vmem [shape: f32[2,1,512], index: 3, kind: input, shape index: {}]   ;;  %s4356_s4 = inlined_call_operand.vmem [shape: f32[8,8,256], index: 4, kind: output, shape index: {}]  }
   0x1   :  { %11 = vsyncpa [#allocation6 + $0x1], 0  ;;  %s3007_s15 = smov 0   ;;  %s3009_s16 = smov 0  }
   0x2   :  { %s3011_s17 = smov 0   ;;  %s3013_s18 = smov 0  }
   0x3   :  { %s3015_s19 = smov 0   ;;  %s3017_s20 = smov 0  }
   0x4 LB: > { %s2572_s21 = sadd.s32 4294967295, %s2976_s20   ;;  %s36_s22 = sadd.s32 1, %s2972_s19  ;;  %s2976_s20 = sphi %s3017_s20, %s17_s20   ;;  %s2972_s19 = sphi %s3015_s19, %s4580_s19   ;;  %s2968_s18 = sphi %s3013_s18, %s4579_s18   ;;  %s2964_s17 = sphi %s3011_s17, %s4578_s17   ;;  %s2960_s16 = sphi %s3009_s16, %s4577_s16   ;;  %s2956_s15 = sphi %s3007_s15, %s4576_s15  }
   0x5   : > { %p38_p0 = scmp.ge.s32.totalorder %s36_s22, 2  ;;  %s81_s23 = sadd.s32 1, %s2964_s17 }
   0x6   : > { %p88_p1 = scmp.ne.s32.totalorder %s2964_s17, %s2960_s16  ;;  %p89_p2 = scmp.eq.s32.totalorder %s2976_s20, 0 }
   0x7   : > { %s4582_s22 = smov (%p38_p0, %s36_s22), 0  ;;  %p94_p4 = scmp.ne.s32.totalorder %s2960_s16, %s2956_s15 }
   0x8   : > { %p3043_p3 = por %p89_p2, %p88_p1  ;;  %s78_s25 = ssub.s32 %s2972_s19, %s4582_s22 }
   0x9   : > { %p95_p5 = scmp.eq.s32.totalorder %s2572_s21, 0  ;;  %p79_p6 = scmp.eq.s32.totalorder %s78_s25, 0 }
   0xa   : > { %p184_p7 = scmp.eq.s32.totalorder %s2572_s21, 1  ;;  %p2654_p10 = scmp.lt.s32.totalorder %s2976_s20, 2 }
   0xb   : > { %p3050_p8 = por %p95_p5, %p94_p4  ;;  %s234_s29 = sand.u32 1, %s2964_s17  }
   0xc   : > { %s3055_s27 = scalar_select %p79_p6, %s2964_s17, %s81_s23  }
   0xd   : > { %p3057_p9 = por %p184_p7, %p88_p1  ;;  %s2638_s30 = sshll.u32 %s2972_s19, 14 }
   0xe   : > { %s2577_s5 = sshll.u32 %s234_s29, 10  ;;  %s244_s8 = scalar_lea.hbm %s4353_s1, %s2638_s30 }
   0xf   : > { %s238_s9 = scalar_lea.vmem [#allocation5], %s2577_s5  ;;  %p3069_p11 = pnand %p2654_p10, %p3043_p3 }
  0x10   : > { %s245_s10 = sshll.u32 %s238_s9, 4  ;;  %s235_s12 = scalar_lea.sflag [#allocation6], %s234_s29  ;;  %s246_s10 = int_to_ptr.vmem [resolvable:$true] %s245_s10 }
  0x11   : > { %p2900_p12 = pneg %p3069_p11  ;;  %s2911_s13 = scalar_lea.vmem %s246_s10, 16384 }
  0x12   : > { %p2912_p13 = scmp.ne.s32.totalorder %s246_s10, %s2911_s13  ;;  %s2978_s14 = smov [#allocation5]  }
  0x13   : > { %s2916_s15 = sshll.u32 %s2978_s14, 4  ;;  %s2917_s15 = int_to_ptr.vmem [resolvable:$false] %s2916_s15 }
  0x14   : > { %p2914_p0 = pnand %p2912_p13, %p2900_p12  ;;  %s2918_s21 = scalar_lea.vmem %s2917_s15, 32768 }
  0x15   : > { %p2919_p2 = scmp.lt.s32.totalorder %s246_s10, %s2917_s15  ;;  %p2920_p4 = scmp.lt.s32.totalorder %s2918_s21, %s2911_s13 }
  0x16   : > { %p2915_p1 = pneg %p2914_p0 }
  0x17   : > { %p2921_p5 = por %p2920_p4, %p2919_p2 }
  0x19   : > { %p2922_p3 = pnand %p2921_p5, %p2915_p1 }
  0x1b   : > { %2925 = shalt.err (!%p2922_p3)
}
  0x1c   : > { %s2979_s23 = smov 512   ;;  %s2980_s24 = smov 32  }
  0x1d   : > { %2653 = dma.hbm_to_vmem [thread:$0]  (!%p3069_p11), %s244_s8, 16384, %s246_s10, %s235_s12, %s2979_s23, %s2979_s23, %s2980_s24  }
  0x1e   : > { %p2580_p6 = scmp.ge.s32.totalorder %s2976_s20, 1  ;;  %p268_p7 = scmp.lt.s32.totalorder %s2976_s20, 3 }
  0x20   : > { %p269_p10 = pnand %p2580_p6, %p268_p7 }
  0x22   : > { %272 = sbr.rel (%p269_p10) target bundleno = 2163 (0x873), region = 36 }
  0x27   : > { %s3080_s25 = sand.u32 1, %s2960_s16  }
  0x28   : > { %s2581_s29 = sshll.u32 %s3080_s25, 10  ;;  %s275_s30 = scalar_lea.sflag [#allocation6], %s3080_s25 }
  0x29   : > { %s3084_s5 = scalar_lea.vmem [#allocation5], %s2581_s29 }
  0x2a   : > { %2951 = dma.done.wait (%p3050_p8), %s275_s30, 16384  }
  0x2b   : > { %2953 = vsyncadd (%p3050_p8), %s275_s30, 4294950912  ;;  %v430_v0 = vld [vmem:[%s3084_s5 + $0x1e8] sm:$0xff]  ;;  %v432_v1 = vld [vmem:[%s3084_s5 + $0x1f8] sm:$0xff]  ;;  %p347_p8 = scmp.lt.s32.totalorder %s2968_s18, 1  ;;  %p362_p11 = scmp.eq.s32.totalorder %s2968_s18, 1 }
  0x2c   : > { %v429_v2 = vld [vmem:[%s3084_s5 + $0x1e0] sm:$0xff]  ;;  %599 = vmatprep.subr.mxu0 %v430_v0  ;;  %712 = vmatprep.subr.mxu1 %v432_v1  ;;  %v431_v3 = vld [vmem:[%s3084_s5 + $0x1f0] sm:$0xff]  ;;  %v426_v4 = vld [vmem:[%s3084_s5 + $0x1c8] sm:$0xff]  ;;  %s2582_s24 = sshll.u32 %s3080_s25, 6 }
  0x2d   : > { %v428_v5 = vld [vmem:[%s3084_s5 + $0x1d8] sm:$0xff]  ;;  %600 = vmatpush1.msra.mxu0 %v429_v2  ;;  %713 = vmatpush1.msra.mxu1 %v431_v3  ;;  %v425_v6 = vld [vmem:[%s3084_s5 + $0x1c0] sm:$0xff]  ;;  %v427_v7 = vld [vmem:[%s3084_s5 + $0x1d0] sm:$0xff]  ;;  %s3210_s26 = scalar_select %p347_p8, %s2968_s18, 1 }
  0x2e   : > { %v422_v8 = vld [vmem:[%s3084_s5 + $0x1a8] sm:$0xff]  ;;  %601 = vmatprep.subr.mxu0 %v426_v4  ;;  %714 = vmatprep.subr.mxu1 %v428_v5  ;;  %v424_v9 = vld [vmem:[%s3084_s5 + $0x1b8] sm:$0xff]  ;;  %v421_v10 = vld [vmem:[%s3084_s5 + $0x1a0] sm:$0xff]  ;;  %s3661_s30 = scalar_lea.vmem [#allocation7], %s2582_s24 }
  0x2f   : > { %v423_v11 = vld [vmem:[%s3084_s5 + $0x1b0] sm:$0xff]  ;;  %602 = vmatpush1.msra.mxu0 %v425_v6  ;;  %715 = vmatpush1.msra.mxu1 %v427_v7  ;;  %v418_v12 = vld [vmem:[%s3084_s5 + $0x188] sm:$0xff]  ;;  %v420_v13 = vld [vmem:[%s3084_s5 + $0x198] sm:$0xff]  ;;  %s2639_s6 = sshll.u32 %s3210_s26, 9  ;;  %s2585_s12 = sshll.u32 %s3210_s26, 2 }
  0x30   : > { %603 = vmatprep.subr.mxu0 %v422_v8  ;;  %716 = vmatprep.subr.mxu1 %v424_v9  ;;  %v417_v14 = vld [vmem:[%s3084_s5 + $0x180] sm:$0xff]  ;;  %v419_v15 = vld [vmem:[%s3084_s5 + $0x190] sm:$0xff]  ;;  %v414_v16 = vld [vmem:[%s3084_s5 + $0x168] sm:$0xff]  ;;  %s3231_s11 = scalar_lea.vmem %s4354_s2, %s2639_s6  ;;  %s355_s15 = scalar_lea.vmem %s4355_s3, %s2585_s12 }
  0x31   : > { %604 = vmatpush1.msra.mxu0 %v421_v10  ;;  %717 = vmatpush1.msra.mxu1 %v423_v11  ;;  %v416_v17 = vld [vmem:[%s3084_s5 + $0x178] sm:$0xff]  ;;  %v413_v18 = vld [vmem:[%s3084_s5 + $0x160] sm:$0xff]  ;;  %v415_v19 = vld [vmem:[%s3084_s5 + $0x170] sm:$0xff]  ;;  %s3649_s26 = scalar_select %p362_p11, 7, 0 }
  0x32   : > { %605 = vmatprep.subr.mxu0 %v418_v12  ;;  %718 = vmatprep.subr.mxu1 %v420_v13  ;;  %v410_v20 = vld [vmem:[%s3084_s5 + $0x148] sm:$0xff]  ;;  %v412_v21 = vld [vmem:[%s3084_s5 + $0x158] sm:$0xff]  ;;  %v409_v22 = vld [vmem:[%s3084_s5 + $0x140] sm:$0xff]  ;;  %s3732_s25 = scalar_select %p362_p11, 6, 1 }
  0x33   : > { %606 = vmatpush1.msra.mxu0 %v417_v14  ;;  %719 = vmatpush1.msra.mxu1 %v419_v15  ;;  %v411_v23 = vld [vmem:[%s3084_s5 + $0x150] sm:$0xff]  ;;  %v406_v24 = vld [vmem:[%s3084_s5 + $0x128] sm:$0xff]  ;;  %v408_v25 = vld [vmem:[%s3084_s5 + $0x138] sm:$0xff]  ;;  %s2640_s21 = sshll.u32 %s3649_s26, 5  ;;  %s2591_s29 = sshll.u32 %s3649_s26, 3 }
  0x34   : > { %607 = vmatprep.subr.mxu0 %v414_v16  ;;  %720 = vmatprep.subr.mxu1 %v416_v17  ;;  %v405_v26 = vld [vmem:[%s3084_s5 + $0x120] sm:$0xff]  ;;  %v407_v27 = vld [vmem:[%s3084_s5 + $0x130] sm:$0xff]  ;;  %v402_v28 = vld [vmem:[%s3084_s5 + $0x108] sm:$0xff]  ;;  %s861_s23 = scalar_lea.vmem [#allocation2], %s2640_s21  ;;  %s2641_s6 = sshll.u32 %s3732_s25, 5 }
  0x35   : > { %608 = vmatpush1.msra.mxu0 %v413_v18  ;;  %721 = vmatpush1.msra.mxu1 %v415_v19  ;;  %v404_v29 = vld [vmem:[%s3084_s5 + $0x118] sm:$0xff]  ;;  %v401_v30 = vld [vmem:[%s3084_s5 + $0x100] sm:$0xff]  ;;  %v403_v31 = vld [vmem:[%s3084_s5 + $0x110] sm:$0xff]  ;;  %s1046_s7 = scalar_lea.vmem [#allocation2], %s2641_s6  ;;  %s2597_s8 = sshll.u32 %s3732_s25, 3 }
  0x36   : > { %609 = vmatprep.subr.mxu0 %v410_v20  ;;  %722 = vmatprep.subr.mxu1 %v412_v21  ;;  %v398_v32 = vld [vmem:[%s3084_s5 + $0xe8] sm:$0xff]  ;;  %v400_v33 = vld [vmem:[%s3084_s5 + $0xf8] sm:$0xff]  ;;  %v397_v34 = vld [vmem:[%s3084_s5 + $0xe0] sm:$0xff]  ;;  %s1225_s9 = scalar_lea.vmem %s3661_s30, %s2597_s8 [#allocation7] }
  0x37   : > { %610 = vmatpush1.msra.mxu0 %v409_v22  ;;  %723 = vmatpush1.msra.mxu1 %v411_v23  ;;  %v399_v35 = vld [vmem:[%s3084_s5 + $0xf0] sm:$0xff]  ;;  %v394_v36 = vld [vmem:[%s3084_s5 + $0xc8] sm:$0xff]  ;;  %v396_v37 = vld [vmem:[%s3084_s5 + $0xd8] sm:$0xff]  ;;  %s3815_s10 = scalar_select %p362_p11, 5, 2 }
  0x38   : > { %611 = vmatprep.subr.mxu0 %v406_v24  ;;  %724 = vmatprep.subr.mxu1 %v408_v25  ;;  %v393_v38 = vld [vmem:[%s3084_s5 + $0xc0] sm:$0xff]  ;;  %v395_v39 = vld [vmem:[%s3084_s5 + $0xd0] sm:$0xff]  ;;  %v390_v40 = vld [vmem:[%s3084_s5 + $0xa8] sm:$0xff]  ;;  %s4078_s26 = scalar_select %p362_p11, 4, 3 }
  0x39   : > { %612 = vmatpush1.msra.mxu0 %v405_v26  ;;  %725 = vmatpush1.msra.mxu1 %v407_v27  ;;  %v392_v41 = vld [vmem:[%s3084_s5 + $0xb8] sm:$0xff]  ;;  %v389_v42 = vld [vmem:[%s3084_s5 + $0xa0] sm:$0xff]  ;;  %v391_v43 = vld [vmem:[%s3084_s5 + $0xb0] sm:$0xff]  ;;  %s2642_s12 = sshll.u32 %s3815_s10, 5  ;;  %s2603_s14 = sshll.u32 %s3815_s10, 3 }
  0x3a   : > { %613 = vmatprep.subr.mxu0 %v402_v28  ;;  %726 = vmatprep.subr.mxu1 %v404_v29  ;;  %v386_v44 = vld [vmem:[%s3084_s5 + $0x88] sm:$0xff]  ;;  %v388_v45 = vld [vmem:[%s3084_s5 + $0x98] sm:$0xff]  ;;  %v385_v46 = vld [vmem:[%s3084_s5 + $0x80] sm:$0xff]  ;;  %s1231_s13 = scalar_lea.vmem [#allocation2], %s2642_s12  ;;  %s2643_s21 = sshll.u32 %s4078_s26, 5 }
  0x3b   : > { %614 = vmatpush1.msra.mxu0 %v401_v30  ;;  %727 = vmatpush1.msra.mxu1 %v403_v31  ;;  %v387_v47 = vld [vmem:[%s3084_s5 + $0x90] sm:$0xff]  ;;  %v382_v48 = vld [vmem:[%s3084_s5 + $0x68] sm:$0xff]  ;;  %v384_v49 = vld [vmem:[%s3084_s5 + $0x78] sm:$0xff]  ;;  %s4232_s8 = scalar_select %p362_p11, 2, 5 }
  0x3c   : > { %615 = vmatprep.subr.mxu0 %v398_v32  ;;  %728 = vmatprep.subr.mxu1 %v400_v33  ;;  %v381_v50 = vld [vmem:[%s3084_s5 + $0x60] sm:$0xff]  ;;  %v383_v51 = vld [vmem:[%s3084_s5 + $0x70] sm:$0xff]  ;;  %v378_v52 = vld [vmem:[%s3084_s5 + $0x48] sm:$0xff] }
  0x3d   : > { %616 = vmatpush1.msra.mxu0 %v397_v34  ;;  %729 = vmatpush1.msra.mxu1 %v399_v35  ;;  %v380_v53 = vld [vmem:[%s3084_s5 + $0x58] sm:$0xff]  ;;  %v377_v54 = vld [vmem:[%s3084_s5 + $0x40] sm:$0xff]  ;;  %v379_v55 = vld [vmem:[%s3084_s5 + $0x50] sm:$0xff]  ;;  %s2621_s12 = sshll.u32 %s4232_s8, 3 }
  0x3e   : > { %617 = vmatprep.subr.mxu0 %v394_v36  ;;  %730 = vmatprep.subr.mxu1 %v396_v37  ;;  %v374_v56 = vld [vmem:[%s3084_s5 + $0x28] sm:$0xff]  ;;  %v376_v57 = vld [vmem:[%s3084_s5 + $0x38] sm:$0xff]  ;;  %v373_v58 = vld [vmem:[%s3084_s5 + $0x20] sm:$0xff] }
  0x3f   : > { %618 = vmatpush1.msra.mxu0 %v393_v38  ;;  %731 = vmatpush1.msra.mxu1 %v395_v39  ;;  %v375_v59 = vld [vmem:[%s3084_s5 + $0x30] sm:$0xff]  ;;  %v370_v60 = vld [vmem:[%s3084_s5 + $0x8] sm:$0xff]  ;;  %v372_v61 = vld [vmem:[%s3084_s5 + $0x18] sm:$0xff] }
  0x40   : > { %619 = vmatprep.subr.mxu0 %v390_v40  ;;  %732 = vmatprep.subr.mxu1 %v392_v41  ;;  %v369_v62 = vld [vmem:[%s3084_s5] sm:$0xff]  ;;  %v371_v63 = vld [vmem:[%s3084_s5 + $0x10] sm:$0xff]  ;;  %v494_v0 = vld [vmem:[%s3084_s5 + $0x3e8] sm:$0xff] }
  0x41   : > { %620 = vmatpush1.msra.mxu0 %v389_v42  ;;  %733 = vmatpush1.msra.mxu1 %v391_v43  ;;  %v496_v1 = vld [vmem:[%s3084_s5 + $0x3f8] sm:$0xff]  ;;  %v493_v2 = vld [vmem:[%s3084_s5 + $0x3e0] sm:$0xff]  ;;  %v495_v3 = vld [vmem:[%s3084_s5 + $0x3f0] sm:$0xff] }
  0x42   : > { %621 = vmatprep.subr.mxu0 %v386_v44  ;;  %734 = vmatprep.subr.mxu1 %v388_v45  ;;  %v490_v4 = vld [vmem:[%s3084_s5 + $0x3c8] sm:$0xff]  ;;  %v492_v5 = vld [vmem:[%s3084_s5 + $0x3d8] sm:$0xff]  ;;  %v489_v6 = vld [vmem:[%s3084_s5 + $0x3c0] sm:$0xff] }
  0x43   : > { %622 = vmatpush1.msra.mxu0 %v385_v46  ;;  %735 = vmatpush1.msra.mxu1 %v387_v47  ;;  %v491_v7 = vld [vmem:[%s3084_s5 + $0x3d0] sm:$0xff]  ;;  %v486_v8 = vld [vmem:[%s3084_s5 + $0x3a8] sm:$0xff]  ;;  %v488_v9 = vld [vmem:[%s3084_s5 + $0x3b8] sm:$0xff] }
  0x44   : > { %623 = vmatprep.subr.mxu0 %v382_v48  ;;  %736 = vmatprep.subr.mxu1 %v384_v49  ;;  %v485_v10 = vld [vmem:[%s3084_s5 + $0x3a0] sm:$0xff]  ;;  %v487_v11 = vld [vmem:[%s3084_s5 + $0x3b0] sm:$0xff]  ;;  %v482_v12 = vld [vmem:[%s3084_s5 + $0x388] sm:$0xff] }
  0x45   : > { %624 = vmatpush1.msra.mxu0 %v381_v50  ;;  %737 = vmatpush1.msra.mxu1 %v383_v51  ;;  %v484_v13 = vld [vmem:[%s3084_s5 + $0x398] sm:$0xff]  ;;  %v481_v14 = vld [vmem:[%s3084_s5 + $0x380] sm:$0xff]  ;;  %v483_v15 = vld [vmem:[%s3084_s5 + $0x390] sm:$0xff] }
  0x46   : > { %625 = vmatprep.subr.mxu0 %v378_v52  ;;  %738 = vmatprep.subr.mxu1 %v380_v53  ;;  %v478_v16 = vld [vmem:[%s3084_s5 + $0x368] sm:$0xff]  ;;  %v480_v17 = vld [vmem:[%s3084_s5 + $0x378] sm:$0xff]  ;;  %v477_v18 = vld [vmem:[%s3084_s5 + $0x360] sm:$0xff] }
  0x47   : > { %626 = vmatpush1.msra.mxu0 %v377_v54  ;;  %739 = vmatpush1.msra.mxu1 %v379_v55  ;;  %v479_v19 = vld [vmem:[%s3084_s5 + $0x370] sm:$0xff]  ;;  %v474_v20 = vld [vmem:[%s3084_s5 + $0x348] sm:$0xff]  ;;  %v476_v21 = vld [vmem:[%s3084_s5 + $0x358] sm:$0xff] }
  0x48   : > { %627 = vmatprep.subr.mxu0 %v374_v56  ;;  %740 = vmatprep.subr.mxu1 %v376_v57  ;;  %v473_v22 = vld [vmem:[%s3084_s5 + $0x340] sm:$0xff]  ;;  %v475_v23 = vld [vmem:[%s3084_s5 + $0x350] sm:$0xff]  ;;  %v470_v24 = vld [vmem:[%s3084_s5 + $0x328] sm:$0xff] }
  0x49   : > { %628 = vmatpush1.msra.mxu0 %v373_v58  ;;  %741 = vmatpush1.msra.mxu1 %v375_v59  ;;  %v472_v25 = vld [vmem:[%s3084_s5 + $0x338] sm:$0xff]  ;;  %v469_v26 = vld [vmem:[%s3084_s5 + $0x320] sm:$0xff]  ;;  %v471_v27 = vld [vmem:[%s3084_s5 + $0x330] sm:$0xff] }
  0x4a   : > { %629 = vmatprep.subr.mxu0 %v370_v60  ;;  %742 = vmatprep.subr.mxu1 %v372_v61  ;;  %v466_v28 = vld [vmem:[%s3084_s5 + $0x308] sm:$0xff]  ;;  %v468_v29 = vld [vmem:[%s3084_s5 + $0x318] sm:$0xff]  ;;  %v465_v30 = vld [vmem:[%s3084_s5 + $0x300] sm:$0xff] }
  0x4b   : > { %630 = vmatpush1.msra.mxu0 %v369_v62  ;;  %743 = vmatpush1.msra.mxu1 %v371_v63  ;;  %v467_v31 = vld [vmem:[%s3084_s5 + $0x310] sm:$0xff]  ;;  %v462_v32 = vld [vmem:[%s3084_s5 + $0x2e8] sm:$0xff]  ;;  %v464_v33 = vld [vmem:[%s3084_s5 + $0x2f8] sm:$0xff] }
  0x4c   : > { %631 = vmatprep.subr.mxu0 %v494_v0  ;;  %744 = vmatprep.subr.mxu1 %v496_v1  ;;  %v461_v34 = vld [vmem:[%s3084_s5 + $0x2e0] sm:$0xff]  ;;  %v463_v35 = vld [vmem:[%s3084_s5 + $0x2f0] sm:$0xff]  ;;  %v458_v36 = vld [vmem:[%s3084_s5 + $0x2c8] sm:$0xff] }
  0x4d   : > { %632 = vmatpush2.msra.mxu0 %v493_v2  ;;  %745 = vmatpush2.msra.mxu1 %v495_v3  ;;  %v460_v37 = vld [vmem:[%s3084_s5 + $0x2d8] sm:$0xff]  ;;  %v457_v38 = vld [vmem:[%s3084_s5 + $0x2c0] sm:$0xff]  ;;  %v459_v39 = vld [vmem:[%s3084_s5 + $0x2d0] sm:$0xff] }
  0x4e   : > { %633 = vmatprep.subr.mxu0 %v490_v4  ;;  %746 = vmatprep.subr.mxu1 %v492_v5  ;;  %v454_v40 = vld [vmem:[%s3084_s5 + $0x2a8] sm:$0xff]  ;;  %v456_v41 = vld [vmem:[%s3084_s5 + $0x2b8] sm:$0xff]  ;;  %v453_v42 = vld [vmem:[%s3084_s5 + $0x2a0] sm:$0xff] }
  0x4f   : > { %634 = vmatpush2.msra.mxu0 %v489_v6  ;;  %747 = vmatpush2.msra.mxu1 %v491_v7  ;;  %v455_v43 = vld [vmem:[%s3084_s5 + $0x2b0] sm:$0xff]  ;;  %v450_v44 = vld [vmem:[%s3084_s5 + $0x288] sm:$0xff]  ;;  %v452_v45 = vld [vmem:[%s3084_s5 + $0x298] sm:$0xff] }
  0x50   : > { %635 = vmatprep.subr.mxu0 %v486_v8  ;;  %748 = vmatprep.subr.mxu1 %v488_v9  ;;  %v449_v46 = vld [vmem:[%s3084_s5 + $0x280] sm:$0xff]  ;;  %v451_v47 = vld [vmem:[%s3084_s5 + $0x290] sm:$0xff]  ;;  %v446_v48 = vld [vmem:[%s3084_s5 + $0x268] sm:$0xff] }
  0x51   : > { %636 = vmatpush2.msra.mxu0 %v485_v10  ;;  %749 = vmatpush2.msra.mxu1 %v487_v11  ;;  %v448_v49 = vld [vmem:[%s3084_s5 + $0x278] sm:$0xff]  ;;  %v445_v50 = vld [vmem:[%s3084_s5 + $0x260] sm:$0xff]  ;;  %v447_v51 = vld [vmem:[%s3084_s5 + $0x270] sm:$0xff] }
  0x52   : > { %637 = vmatprep.subr.mxu0 %v482_v12  ;;  %750 = vmatprep.subr.mxu1 %v484_v13  ;;  %v442_v52 = vld [vmem:[%s3084_s5 + $0x248] sm:$0xff]  ;;  %v444_v53 = vld [vmem:[%s3084_s5 + $0x258] sm:$0xff]  ;;  %v441_v54 = vld [vmem:[%s3084_s5 + $0x240] sm:$0xff] }
  0x53   : > { %638 = vmatpush2.msra.mxu0 %v481_v14  ;;  %751 = vmatpush2.msra.mxu1 %v483_v15  ;;  %v443_v55 = vld [vmem:[%s3084_s5 + $0x250] sm:$0xff]  ;;  %v438_v56 = vld [vmem:[%s3084_s5 + $0x228] sm:$0xff]  ;;  %v440_v57 = vld [vmem:[%s3084_s5 + $0x238] sm:$0xff] }
  0x54   : > { %639 = vmatprep.subr.mxu0 %v478_v16  ;;  %752 = vmatprep.subr.mxu1 %v480_v17  ;;  %v437_v58 = vld [vmem:[%s3084_s5 + $0x220] sm:$0xff]  ;;  %v439_v59 = vld [vmem:[%s3084_s5 + $0x230] sm:$0xff]  ;;  %v434_v60 = vld [vmem:[%s3084_s5 + $0x208] sm:$0xff] }
  0x55   : > { %640 = vmatpush2.msra.mxu0 %v477_v18  ;;  %753 = vmatpush2.msra.mxu1 %v479_v19  ;;  %v436_v61 = vld [vmem:[%s3084_s5 + $0x218] sm:$0xff]  ;;  %v433_v62 = vld [vmem:[%s3084_s5 + $0x200] sm:$0xff]  ;;  %v563_v63 = vld [vmem:[%s4352_s0 + $0x8] sm:$0xff] }
  0x56   : > { %641 = vmatprep.subr.mxu0 %v474_v20  ;;  %754 = vmatprep.subr.mxu1 %v476_v21  ;;  %v435_v0 = vld [vmem:[%s3084_s5 + $0x210] sm:$0xff]  ;;  %v562_v1 = vld [vmem:[%s4352_s0] sm:$0xff]  ;;  %v565_v2 = vld [vmem:[%s4352_s0 + $0x18] sm:$0xff]  ;;  %s1040_s5 = scalar_lea.vmem %s3661_s30, %s2591_s29 [#allocation7] }
  0x57   : > { %642 = vmatpush2.msra.mxu0 %v473_v22  ;;  %755 = vmatpush2.msra.mxu1 %v475_v23  ;;  %v3240_v3 = vld [vmem:[%s3231_s11 + $0x1e8] sm:$0xff]  ;;  %v3243_v4 = vld [vmem:[%s3231_s11 + $0x1f8] sm:$0xff]  ;;  %v3246_v5 = vld [vmem:[%s3231_s11 + $0x1e0] sm:$0xff]  ;;  %s4155_s29 = scalar_select %p362_p11, 3, 4 }
  0x58   : > { %643 = vmatprep.subr.mxu0 %v470_v24  ;;  %756 = vmatprep.subr.mxu1 %v472_v25  ;;  %4441 = vst [vmem:[#allocation9_spill] sm:$0xff] %v3240_v3  ;;  %4442 = vst [vmem:[#allocation10_spill] sm:$0xff] %v3243_v4  ;;  %v3249_v6 = vld [vmem:[%s3231_s11 + $0x1f0] sm:$0xff]  ;;  %v3256_v8 = vld [vmem:[%s3231_s11 + $0x1c8] sm:$0xff] }
  0x59   : > { %644 = vmatpush2.msra.mxu0 %v469_v26  ;;  %757 = vmatpush2.msra.mxu1 %v471_v27  ;;  %v564_v7 = vld [vmem:[%s4352_s0 + $0x10] sm:$0xff]  ;;  %v567_v9 = vld [vmem:[%s4352_s0 + $0x28] sm:$0xff]  ;;  %v3264_v10 = vld [vmem:[%s3231_s11 + $0x1c0] sm:$0xff]  ;;  %s2615_s6 = sshll.u32 %s4155_s29, 3 }
  0x5a   : > { %645 = vmatprep.subr.mxu0 %v466_v28  ;;  %758 = vmatprep.subr.mxu1 %v468_v29  ;;  %v3268_v11 = vld [vmem:[%s3231_s11 + $0x1a8] sm:$0xff]  ;;  %v3271_v12 = vld [vmem:[%s3231_s11 + $0x1d8] sm:$0xff]  ;;  %v566_v13 = vld [vmem:[%s4352_s0 + $0x20] sm:$0xff] }
  0x5b   : > { %646 = vmatpush2.msra.mxu0 %v465_v30  ;;  %759 = vmatpush2.msra.mxu1 %v467_v31  ;;  %v3279_v14 = vld [vmem:[%s3231_s11 + $0x1a0] sm:$0xff]  ;;  %v3282_v15 = vld [vmem:[%s3231_s11 + $0x1d0] sm:$0xff]  ;;  %v3287_v16 = vld [vmem:[%s3231_s11 + $0x188] sm:$0xff] }
  0x5c   : > { %647 = vmatprep.subr.mxu0 %v462_v32  ;;  %760 = vmatprep.subr.mxu1 %v464_v33  ;;  %v3290_v17 = vld [vmem:[%s3231_s11 + $0x1b8] sm:$0xff]  ;;  %v3298_v19 = vld [vmem:[%s3231_s11 + $0x180] sm:$0xff]  ;;  %v3301_v20 = vld [vmem:[%s3231_s11 + $0x1b0] sm:$0xff] }
  0x5d   : > { %648 = vmatpush2.msra.mxu0 %v461_v34  ;;  %761 = vmatpush2.msra.mxu1 %v463_v35  ;;  %v569_v18 = vld [vmem:[%s4352_s0 + $0x38] sm:$0xff]  ;;  %v568_v21 = vld [vmem:[%s4352_s0 + $0x30] sm:$0xff]  ;;  %v3309_v22 = vld [vmem:[%s3231_s11 + $0x168] sm:$0xff] }
  0x5e   : > { %649 = vmatprep.subr.mxu0 %v458_v36  ;;  %762 = vmatprep.subr.mxu1 %v460_v37  ;;  %v3312_v23 = vld [vmem:[%s3231_s11 + $0x198] sm:$0xff]  ;;  %v3317_v24 = vld [vmem:[%s3231_s11 + $0x160] sm:$0xff]  ;;  %v3320_v25 = vld [vmem:[%s3231_s11 + $0x190] sm:$0xff] }
  0x5f   : > { %650 = vmatpush2.msra.mxu0 %v457_v38  ;;  %763 = vmatpush2.msra.mxu1 %v459_v39  ;;  %v3323_v26 = vld [vmem:[%s3231_s11 + $0x148] sm:$0xff]  ;;  %v3326_v27 = vld [vmem:[%s3231_s11 + $0x178] sm:$0xff]  ;;  %v3336_v29 = vld [vmem:[%s3231_s11 + $0x140] sm:$0xff] }
  0x60   : > { %651 = vmatprep.subr.mxu0 %v454_v40  ;;  %764 = vmatprep.subr.mxu1 %v456_v41  ;;  %v571_v28 = vld [vmem:[%s4352_s0 + $0x48] sm:$0xff]  ;;  %v3339_v30 = vld [vmem:[%s3231_s11 + $0x170] sm:$0xff]  ;;  %v570_v31 = vld [vmem:[%s4352_s0 + $0x40] sm:$0xff] }
  0x61   : > { %652 = vmatpush2.msra.mxu0 %v453_v42  ;;  %765 = vmatpush2.msra.mxu1 %v455_v43  ;;  %v3347_v32 = vld [vmem:[%s3231_s11 + $0x128] sm:$0xff]  ;;  %v3350_v33 = vld [vmem:[%s3231_s11 + $0x158] sm:$0xff]  ;;  %v3355_v34 = vld [vmem:[%s3231_s11 + $0x120] sm:$0xff] }
  0x62   : > { %653 = vmatprep.subr.mxu0 %v450_v44  ;;  %766 = vmatprep.subr.mxu1 %v452_v45  ;;  %v3358_v35 = vld [vmem:[%s3231_s11 + $0x150] sm:$0xff]  ;;  %v3361_v36 = vld [vmem:[%s3231_s11 + $0x108] sm:$0xff]  ;;  %v3364_v37 = vld [vmem:[%s3231_s11 + $0x138] sm:$0xff] }
  0x63   : > { %654 = vmatpush2.msra.mxu0 %v449_v46  ;;  %767 = vmatpush2.msra.mxu1 %v451_v47  ;;  %v573_v38 = vld [vmem:[%s4352_s0 + $0x58] sm:$0xff]  ;;  %v3374_v39 = vld [vmem:[%s3231_s11 + $0x100] sm:$0xff]  ;;  %v3377_v40 = vld [vmem:[%s3231_s11 + $0x130] sm:$0xff] }
  0x64   : > { %655 = vmatprep.subr.mxu0 %v446_v48  ;;  %768 = vmatprep.subr.mxu1 %v448_v49  ;;  %v572_v41 = vld [vmem:[%s4352_s0 + $0x50] sm:$0xff]  ;;  %v3385_v42 = vld [vmem:[%s3231_s11 + $0xe8] sm:$0xff]  ;;  %v3388_v43 = vld [vmem:[%s3231_s11 + $0x118] sm:$0xff] }
  0x65   : > { %656 = vmatpush2.msra.mxu0 %v445_v50  ;;  %769 = vmatpush2.msra.mxu1 %v447_v51  ;;  %v3393_v44 = vld [vmem:[%s3231_s11 + $0xe0] sm:$0xff]  ;;  %v3396_v45 = vld [vmem:[%s3231_s11 + $0x110] sm:$0xff]  ;;  %v3399_v46 = vld [vmem:[%s3231_s11 + $0xc8] sm:$0xff] }
  0x66   : > { %657 = vmatprep.subr.mxu0 %v442_v52  ;;  %770 = vmatprep.subr.mxu1 %v444_v53  ;;  %v3402_v47 = vld [vmem:[%s3231_s11 + $0xf8] sm:$0xff]  ;;  %v575_v48 = vld [vmem:[%s4352_s0 + $0x68] sm:$0xff]  ;;  %v3412_v49 = vld [vmem:[%s3231_s11 + $0xc0] sm:$0xff] }
  0x67   : > { %658 = vmatpush2.msra.mxu0 %v441_v54  ;;  %771 = vmatpush2.msra.mxu1 %v443_v55  ;;  %v3415_v50 = vld [vmem:[%s3231_s11 + $0xf0] sm:$0xff]  ;;  %v574_v51 = vld [vmem:[%s4352_s0 + $0x60] sm:$0xff]  ;;  %v3423_v52 = vld [vmem:[%s3231_s11 + $0xa8] sm:$0xff] }
  0x68   : > { %659 = vmatprep.subr.mxu0 %v438_v56  ;;  %772 = vmatprep.subr.mxu1 %v440_v57  ;;  %v3426_v53 = vld [vmem:[%s3231_s11 + $0xd8] sm:$0xff]  ;;  %v3431_v54 = vld [vmem:[%s3231_s11 + $0xa0] sm:$0xff]  ;;  %v3434_v55 = vld [vmem:[%s3231_s11 + $0xd0] sm:$0xff] }
  0x69   : > { %660 = vmatpush2.msra.mxu0 %v437_v58  ;;  %773 = vmatpush2.msra.mxu1 %v439_v59  ;;  %v3437_v56 = vld [vmem:[%s3231_s11 + $0x88] sm:$0xff]  ;;  %v3440_v57 = vld [vmem:[%s3231_s11 + $0xb8] sm:$0xff]  ;;  %v3450_v59 = vld [vmem:[%s3231_s11 + $0x80] sm:$0xff] }
  0x6a   : > { %661 = vmatprep.subr.mxu0 %v434_v60  ;;  %774 = vmatprep.subr.mxu1 %v436_v61  ;;  %v577_v58 = vld [vmem:[%s4352_s0 + $0x78] sm:$0xff]  ;;  %v3453_v60 = vld [vmem:[%s3231_s11 + $0xb0] sm:$0xff] }
  0x6b   : > { %662 = vmatpush2.msra.mxu0 %v433_v62  ;;  %663 = vmatprep.mubr.f32.mxu0 %v563_v63  ;;  %v576_v61 = vld [vmem:[%s4352_s0 + $0x70] sm:$0xff]  ;;  %v3461_v62 = vld [vmem:[%s3231_s11 + $0x68] sm:$0xff] }
  0x6c   : > { %775 = vmatpush2.msra.mxu1 %v435_v0  ;;  %776 = vmatprep.mubr.f32.mxu1 %v563_v63  ;;  %4443 = vst [vmem:[#allocation11_spill] sm:$0xff] %v3461_v62  ;;  %v3464_v63 = vld [vmem:[%s3231_s11 + $0x98] sm:$0xff]  ;;  %v3469_v0 = vld [vmem:[%s3231_s11 + $0x60] sm:$0xff] }
  0x6d   : > { %664 = vmatmul.mubr.f32.vlgmr.msra.gmra.mxu0 %v562_v1  ;;  %777 = vmatmul.mubr.f32.vlgmr.msra.gmra.mxu1 %v562_v1  ;;  %4444 = vst [vmem:[#allocation12_spill] sm:$0xff] %v3469_v0  ;;  %v3472_v1 = vld [vmem:[%s3231_s11 + $0x90] sm:$0xff] }
  0x6e   : > { %669 = vmatprep.mubr.f32.mxu0 %v565_v2  ;;  %782 = vmatprep.mubr.f32.mxu1 %v565_v2  ;;  %4445 = vst [vmem:[#allocation13_spill] sm:$0xff] %v3472_v1  ;;  %v3475_v2 = vld [vmem:[%s3231_s11 + $0x48] sm:$0xff] }
  0x6f   : > { %866 = vmatprep.subr.mxu0 %v3240_v3  ;;  %937 = vmatprep.subr.mxu1 %v3243_v4  ;;  %4446 = vst [vmem:[#allocation14_spill] sm:$0xff] %v3475_v2 }
  0x70   : > { %867 = vmatpush1.msra.mxu0 %v3246_v5  ;;  %938 = vmatpush1.msra.mxu1 %v3249_v6 }
  0x71   : > { %670 = vmatmul.mubr.f32.gmra.mxu0 %v564_v7  ;;  %783 = vmatmul.mubr.f32.gmra.mxu1 %v564_v7  ;;  %v3478_v7 = vld [vmem:[%s3231_s11 + $0x78] sm:$0xff] }
  0x72   : > { %868 = vmatprep.subr.mxu0 %v3256_v8  ;;  %675 = vmatprep.mubr.f32.mxu0 %v567_v9  ;;  %4447 = vst [vmem:[#allocation15_spill] sm:$0xff] %v3478_v7 }
  0x73   : > { %788 = vmatprep.mubr.f32.mxu1 %v567_v9  ;;  %869 = vmatpush1.msra.mxu0 %v3264_v10  ;;  %v3483_v9 = vld [vmem:[%s3231_s11 + $0x40] sm:$0xff] }
  0x74   : > { %870 = vmatprep.subr.mxu0 %v3268_v11  ;;  %939 = vmatprep.subr.mxu1 %v3271_v12  ;;  %4448 = vst [vmem:[#allocation16_spill] sm:$0xff] %v3483_v9 }
  0x75   : > { %676 = vmatmul.mubr.f32.gmra.mxu0 %v566_v13  ;;  %789 = vmatmul.mubr.f32.gmra.mxu1 %v566_v13  ;;  %v3486_v13 = vld [vmem:[%s3231_s11 + $0x70] sm:$0xff] }
  0x76   : > { %871 = vmatpush1.msra.mxu0 %v3279_v14  ;;  %940 = vmatpush1.msra.mxu1 %v3282_v15  ;;  %4449 = vst [vmem:[#allocation17_spill] sm:$0xff] %v3486_v13 }
  0x77   : > { %872 = vmatprep.subr.mxu0 %v3287_v16  ;;  %941 = vmatprep.subr.mxu1 %v3290_v17 }
  0x78   : > { %681 = vmatprep.mubr.f32.mxu0 %v569_v18  ;;  %794 = vmatprep.mubr.f32.mxu1 %v569_v18  ;;  %v3491_v18 = vld [vmem:[%s3231_s11 + $0x28] sm:$0xff] }
  0x79   : > { %873 = vmatpush1.msra.mxu0 %v3298_v19  ;;  %942 = vmatpush1.msra.mxu1 %v3301_v20  ;;  %4450 = vst [vmem:[#allocation18_spill] sm:$0xff] %v3491_v18 }
  0x7a   : > { %682 = vmatmul.mubr.f32.gmra.mxu0 %v568_v21  ;;  %795 = vmatmul.mubr.f32.gmra.mxu1 %v568_v21  ;;  %v3494_v21 = vld [vmem:[%s3231_s11 + $0x58] sm:$0xff] }
  0x7b   : > { %874 = vmatprep.subr.mxu0 %v3309_v22  ;;  %943 = vmatprep.subr.mxu1 %v3312_v23  ;;  %4451 = vst [vmem:[#allocation19_spill] sm:$0xff] %v3494_v21 }
  0x7c   : > { %875 = vmatpush1.msra.mxu0 %v3317_v24  ;;  %944 = vmatpush1.msra.mxu1 %v3320_v25 }
  0x7d   : > { %876 = vmatprep.subr.mxu0 %v3323_v26  ;;  %945 = vmatprep.subr.mxu1 %v3326_v27 }
  0x7e   : > { %687 = vmatprep.mubr.f32.mxu0 %v571_v28  ;;  %800 = vmatprep.mubr.f32.mxu1 %v571_v28  ;;  %v3499_v28 = vld [vmem:[%s3231_s11 + $0x20] sm:$0xff] }
  0x7f   : > { %877 = vmatpush1.msra.mxu0 %v3336_v29  ;;  %946 = vmatpush1.msra.mxu1 %v3339_v30  ;;  %4452 = vst [vmem:[#allocation20_spill] sm:$0xff] %v3499_v28 }
  0x80   : > { %688 = vmatmul.mubr.f32.gmra.mxu0 %v570_v31  ;;  %801 = vmatmul.mubr.f32.gmra.mxu1 %v570_v31  ;;  %v3502_v31 = vld [vmem:[%s3231_s11 + $0x50] sm:$0xff] }
  0x81   : > { %878 = vmatprep.subr.mxu0 %v3347_v32  ;;  %947 = vmatprep.subr.mxu1 %v3350_v33  ;;  %4453 = vst [vmem:[#allocation21_spill] sm:$0xff] %v3502_v31 }
  0x82   : > { %879 = vmatpush1.msra.mxu0 %v3355_v34  ;;  %948 = vmatpush1.msra.mxu1 %v3358_v35 }
  0x83   : > { %880 = vmatprep.subr.mxu0 %v3361_v36  ;;  %949 = vmatprep.subr.mxu1 %v3364_v37 }
  0x84   : > { %693 = vmatprep.mubr.f32.mxu0 %v573_v38  ;;  %806 = vmatprep.mubr.f32.mxu1 %v573_v38  ;;  %v3507_v38 = vld [vmem:[%s3231_s11 + $0x8] sm:$0xff] }
  0x85   : > { %881 = vmatpush1.msra.mxu0 %v3374_v39  ;;  %950 = vmatpush1.msra.mxu1 %v3377_v40  ;;  %4454 = vst [vmem:[#allocation22_spill] sm:$0xff] %v3507_v38 }
  0x86   : > { %694 = vmatmul.mubr.f32.gmra.mxu0 %v572_v41  ;;  %807 = vmatmul.mubr.f32.gmra.mxu1 %v572_v41  ;;  %v3510_v41 = vld [vmem:[%s3231_s11 + $0x38] sm:$0xff] }
  0x87   : > { %882 = vmatprep.subr.mxu0 %v3385_v42  ;;  %951 = vmatprep.subr.mxu1 %v3388_v43  ;;  %4455 = vst [vmem:[#allocation23_spill] sm:$0xff] %v3510_v41 }
  0x88   : > { %883 = vmatpush1.msra.mxu0 %v3393_v44  ;;  %952 = vmatpush1.msra.mxu1 %v3396_v45 }
  0x89   : > { %884 = vmatprep.subr.mxu0 %v3399_v46  ;;  %953 = vmatprep.subr.mxu1 %v3402_v47 }
  0x8a   : > { %699 = vmatprep.mubr.f32.mxu0 %v575_v48  ;;  %812 = vmatprep.mubr.f32.mxu1 %v575_v48  ;;  %v3515_v48 = vld [vmem:[%s3231_s11] sm:$0xff] }
  0x8b   : > { %885 = vmatpush1.msra.mxu0 %v3412_v49  ;;  %954 = vmatpush1.msra.mxu1 %v3415_v50  ;;  %4456 = vst [vmem:[#allocation24_spill] sm:$0xff] %v3515_v48 }
  0x8c   : > { %700 = vmatmul.mubr.f32.gmra.mxu0 %v574_v51  ;;  %813 = vmatmul.mubr.f32.gmra.mxu1 %v574_v51  ;;  %v3520_v51 = vld [vmem:[%s3231_s11 + $0x30] sm:$0xff] }
  0x8d   : > { %886 = vmatprep.subr.mxu0 %v3423_v52  ;;  %955 = vmatprep.subr.mxu1 %v3426_v53  ;;  %4457 = vst [vmem:[#allocation25_spill] sm:$0xff] %v3520_v51 }
  0x8e   : > { %887 = vmatpush1.msra.mxu0 %v3431_v54  ;;  %956 = vmatpush1.msra.mxu1 %v3434_v55 }
  0x8f   : > { %888 = vmatprep.subr.mxu0 %v3437_v56  ;;  %957 = vmatprep.subr.mxu1 %v3440_v57 }
  0x90   : > { %705 = vmatprep.mubr.f32.mxu0 %v577_v58  ;;  %818 = vmatprep.mubr.f32.mxu1 %v577_v58  ;;  %v3525_v58 = vld [vmem:[%s3231_s11 + $0x18] sm:$0xff] }
  0x91   : > { %889 = vmatpush1.msra.mxu0 %v3450_v59  ;;  %958 = vmatpush1.msra.mxu1 %v3453_v60  ;;  %4458 = vst [vmem:[#allocation26_spill] sm:$0xff] %v3525_v58 }
  0x92   : > { %706 = vmatmul.mubr.f32.gmra.mxu0 %v576_v61  ;;  %819 = vmatmul.mubr.f32.gmra.mxu1 %v576_v61  ;;  %v4359_v61 = vmov 0.0  }
  0x93   : > { %890 = vmatprep.subr.mxu0 %v3461_v62  ;;  %959 = vmatprep.subr.mxu1 %v3464_v63 }
  0x94   : > { %891 = vmatpush1.msra.mxu0 %v3469_v0  ;;  %960 = vmatpush1.msra.mxu1 %v3472_v1 }
  0x95   : > { %892 = vmatprep.subr.mxu0 %v3475_v2  ;;  %961 = vmatprep.subr.mxu1 %v3478_v7 }
  0x96   : > { %893 = vmatpush1.msra.mxu0 %v3483_v9  ;;  %962 = vmatpush1.msra.mxu1 %v3486_v13 }
  0x97   : > { %894 = vmatprep.subr.mxu0 %v3491_v18  ;;  %963 = vmatprep.subr.mxu1 %v3494_v21  ;;  %v3530_v18 = vld [vmem:[%s3231_s11 + $0x10] sm:$0xff] }
  0x98   : > { %895 = vmatpush1.msra.mxu0 %v3499_v28  ;;  %964 = vmatpush1.msra.mxu1 %v3502_v31  ;;  %4459 = vst [vmem:[#allocation27_spill] sm:$0xff] %v3530_v18 }
  0x99   : > { %896 = vmatprep.subr.mxu0 %v3507_v38  ;;  %965 = vmatprep.subr.mxu1 %v3510_v41 }
  0x9a   : > { %897 = vmatpush1.msra.mxu0 %v3515_v48  ;;  %930 = vmatprep.mubr.f32.mxu0 %v4359_v61 }
  0x9b   : > { %966 = vmatpush1.msra.mxu1 %v3520_v51  ;;  %931 = vmatmul.mubr.f32.vlgmr.msra.gmra.mxu0 %v4359_v61 }
  0x9c   : > { %967 = vmatprep.subr.mxu1 %v3525_v58  ;;  %1001 = vmatprep.mubr.f32.mxu1 %v4359_v61 }
  0x9d   : > { %968 = vmatpush1.msra.mxu1 %v3530_v18  ;;  %1051 = vmatprep.subr.mxu0 %v3240_v3 }
  0x9e   : > { %1002 = vmatmul.mubr.f32.vlgmr.msra.gmra.mxu1 %v4359_v61  ;;  %1122 = vmatprep.subr.mxu1 %v3243_v4  ;;  %v4460_v61 = vld [vmem:[#allocation18_spill] sm:$0xff] }
  0x9f   : > { %1052 = vmatpush1.msra.mxu0 %v3246_v5  ;;  %1123 = vmatpush1.msra.mxu1 %v3249_v6 }
  0xa0   : > { %1053 = vmatprep.subr.mxu0 %v3256_v8  ;;  %1124 = vmatprep.subr.mxu1 %v3271_v12 }
  0xa1   : > { %1054 = vmatpush1.msra.mxu0 %v3264_v10  ;;  %1125 = vmatpush1.msra.mxu1 %v3282_v15 }
  0xa2   : > { %1055 = vmatprep.subr.mxu0 %v3268_v11  ;;  %1126 = vmatprep.subr.mxu1 %v3290_v17 }
  0xa3   : > { %1056 = vmatpush1.msra.mxu0 %v3279_v14  ;;  %1127 = vmatpush1.msra.mxu1 %v3301_v20 }
  0xa4   : > { %1057 = vmatprep.subr.mxu0 %v3287_v16  ;;  %1128 = vmatprep.subr.mxu1 %v3312_v23 }
  0xa5   : > { %1058 = vmatpush1.msra.mxu0 %v3298_v19  ;;  %1129 = vmatpush1.msra.mxu1 %v3320_v25 }
  0xa6   : > { %1059 = vmatprep.subr.mxu0 %v3309_v22  ;;  %1130 = vmatprep.subr.mxu1 %v3326_v27 }
  0xa7   : > { %1060 = vmatpush1.msra.mxu0 %v3317_v24  ;;  %1131 = vmatpush1.msra.mxu1 %v3339_v30 }
  0xa8   : > { %1061 = vmatprep.subr.mxu0 %v3323_v26  ;;  %1132 = vmatprep.subr.mxu1 %v3350_v33 }
  0xa9   : > { %1062 = vmatpush1.msra.mxu0 %v3336_v29  ;;  %1133 = vmatpush1.msra.mxu1 %v3358_v35 }
  0xaa   : > { %1063 = vmatprep.subr.mxu0 %v3347_v32  ;;  %1134 = vmatprep.subr.mxu1 %v3364_v37 }
  0xab   : > { %1064 = vmatpush1.msra.mxu0 %v3355_v34  ;;  %1135 = vmatpush1.msra.mxu1 %v3377_v40 }
  0xac   : > { %1065 = vmatprep.subr.mxu0 %v3361_v36  ;;  %1136 = vmatprep.subr.mxu1 %v3388_v43 }
  0xad   : > { %1066 = vmatpush1.msra.mxu0 %v3374_v39  ;;  %1137 = vmatpush1.msra.mxu1 %v3396_v45 }
  0xae   : > { %1067 = vmatprep.subr.mxu0 %v3385_v42  ;;  %1138 = vmatprep.subr.mxu1 %v3402_v47 }
  0xaf   : > { %1068 = vmatpush1.msra.mxu0 %v3393_v44  ;;  %1139 = vmatpush1.msra.mxu1 %v3415_v50 }
  0xb0   : > { %1069 = vmatprep.subr.mxu0 %v3399_v46  ;;  %1140 = vmatprep.subr.mxu1 %v3426_v53 }
  0xb1   : > { %1070 = vmatpush1.msra.mxu0 %v3412_v49  ;;  %1141 = vmatpush1.msra.mxu1 %v3434_v55 }
  0xb2   : > { %1071 = vmatprep.subr.mxu0 %v3423_v52  ;;  %1142 = vmatprep.subr.mxu1 %v3440_v57 }
  0xb3   : > { %1072 = vmatpush1.msra.mxu0 %v3431_v54  ;;  %1143 = vmatpush1.msra.mxu1 %v3453_v60 }
  0xb4   : > { %1073 = vmatprep.subr.mxu0 %v3437_v56  ;;  %1144 = vmatprep.subr.mxu1 %v3464_v63 }
  0xb5   : > { %1074 = vmatpush1.msra.mxu0 %v3450_v59  ;;  %1145 = vmatpush1.msra.mxu1 %v3472_v1 }
  0xb6   : > { %1075 = vmatprep.subr.mxu0 %v3461_v62  ;;  %1146 = vmatprep.subr.mxu1 %v3478_v7 }
  0xb7   : > { %1076 = vmatpush1.msra.mxu0 %v3469_v0  ;;  %1147 = vmatpush1.msra.mxu1 %v3486_v13 }
  0xb8   : > { %1077 = vmatprep.subr.mxu0 %v3475_v2  ;;  %1148 = vmatprep.subr.mxu1 %v3494_v21  ;;  %v4461_v21 = vmov 0.0  }
  0xb9   : > { %1078 = vmatpush1.msra.mxu0 %v3483_v9  ;;  %1149 = vmatpush1.msra.mxu1 %v3502_v31 }
  0xba   : > { %1079 = vmatprep.subr.mxu0 %v4460_v61  ;;  %1150 = vmatprep.subr.mxu1 %v3510_v41  ;;  %v579_v41 = vlaneseq }
  0xbb   : > { %1080 = vmatpush1.msra.mxu0 %v3499_v28  ;;  %1151 = vmatpush1.msra.mxu1 %v3520_v51 }
  0xbc   : > { %1081 = vmatprep.subr.mxu0 %v3507_v38  ;;  %1152 = vmatprep.subr.mxu1 %v3525_v58  ;;  %v580_v28 = vshrl.u32 %v579_v41, 7 }
  0xbd   : > { %1082 = vmatpush1.msra.mxu0 %v3515_v48  ;;  %1115 = vmatprep.mubr.f32.mxu0 %v4461_v21  ;;  %v561_v48 = vld [vmem:[%s355_s15] sm:$0xf]  ;;  %s1410_s15 = scalar_lea.vmem %s3661_s30, %s2603_s14 [#allocation7] }
  0xbe   : > { %1153 = vmatpush1.msra.mxu1 %v3530_v18  ;;  %1186 = vmatprep.mubr.f32.mxu1 %v4461_v21  ;;  %v581_v58 = vsub.s32 0, %v580_v28  ;;  %v589_v38 = vsub.s32 2, %v580_v28  ;;  %v585_v51 = vsub.s32 1, %v580_v28  ;;  %v593_v61 = vsub.s32 3, %v580_v28  ;;  %s4307_s14 = scalar_select %p362_p11, 1, 6 }
  0xbf   : > { %1236 = vmatprep.subr.mxu0 %v3240_v3  ;;  %1307 = vmatprep.subr.mxu1 %v3243_v4 }
  0xc0   : > { %v3610_v31 = vrot.slane %v561_v48, %v581_v58  ;;  %v3612_v18 = vrot.slane %v561_v48, %v589_v38  ;;  %v3614_v21 = vrot.slane %v561_v48, %v585_v51  ;;  %v3616_v3 = vrot.slane %v561_v48, %v593_v61 }
 0x12d   : > { %v665_v4 = vpop.f32.mrf.mxu0  ;;  %v778_v9 = vpop.f32.mrf.mxu1 }
 0x12e   : > { %v666_v41 = vadd.f32 %v665_v4, %v3610_v31  ;;  %v779_v2 = vadd.f32 %v778_v9, %v3612_v18 }
 0x12f   : > { %v667_v13 = vpop.f32.mrf.mxu0  ;;  %v780_v0 = vpop.f32.mrf.mxu1 }
 0x130   : > { %825 = vst [vmem:[#allocation2] sm:$0xff] %v666_v41  ;;  %827 = vst [vmem:[#allocation2 + $0x10] sm:$0xff] %v779_v2  ;;  %v668_v28 = vadd.f32 %v667_v13, %v3614_v21  ;;  %v781_v58 = vadd.f32 %v780_v0, %v3616_v3 }
 0x131   : > { %v671_v38 = vpop.f32.mrf.mxu0  ;;  %v784_v7 = vpop.f32.mrf.mxu1 }
 0x132   : > { %826 = vst [vmem:[#allocation2 + $0x8] sm:$0xff] %v668_v28  ;;  %828 = vst [vmem:[#allocation2 + $0x18] sm:$0xff] %v781_v58  ;;  %v672_v48 = vadd.f32 %v671_v38, %v3610_v31  ;;  %v785_v51 = vadd.f32 %v784_v7, %v3612_v18 }
 0x133   : > { %v673_v61 = vpop.f32.mrf.mxu0  ;;  %v786_v4 = vpop.f32.mrf.mxu1 }
 0x134   : > { %829 = vst [vmem:[#allocation2 + $0x20] sm:$0xff] %v672_v48  ;;  %831 = vst [vmem:[#allocation2 + $0x30] sm:$0xff] %v785_v51  ;;  %v674_v9 = vadd.f32 %v673_v61, %v3614_v21  ;;  %v787_v2 = vadd.f32 %v786_v4, %v3616_v3 }
 0x135   : > { %v677_v41 = vpop.f32.mrf.mxu0  ;;  %v790_v13 = vpop.f32.mrf.mxu1 }
 0x136   : > { %830 = vst [vmem:[#allocation2 + $0x28] sm:$0xff] %v674_v9  ;;  %832 = vst [vmem:[#allocation2 + $0x38] sm:$0xff] %v787_v2  ;;  %v678_v0 = vadd.f32 %v677_v41, %v3610_v31  ;;  %v791_v28 = vadd.f32 %v790_v13, %v3612_v18 }
 0x137   : > { %v679_v58 = vpop.f32.mrf.mxu0  ;;  %v792_v38 = vpop.f32.mrf.mxu1 }
 0x138   : > { %833 = vst [vmem:[#allocation2 + $0x40] sm:$0xff] %v678_v0  ;;  %835 = vst [vmem:[#allocation2 + $0x50] sm:$0xff] %v791_v28  ;;  %v680_v7 = vadd.f32 %v679_v58, %v3614_v21  ;;  %v793_v48 = vadd.f32 %v792_v38, %v3616_v3 }
 0x13a   : > { %834 = vst [vmem:[#allocation2 + $0x48] sm:$0xff] %v680_v7  ;;  %836 = vst [vmem:[#allocation2 + $0x58] sm:$0xff] %v793_v48  ;;  %v683_v51 = vpop.f32.mrf.mxu0  ;;  %v796_v61 = vpop.f32.mrf.mxu1 }
 0x13b   : > { %v684_v4 = vadd.f32 %v683_v51, %v3610_v31  ;;  %v797_v9 = vadd.f32 %v796_v61, %v3612_v18 }
 0x13c   : > { %v685_v2 = vpop.f32.mrf.mxu0  ;;  %v798_v41 = vpop.f32.mrf.mxu1 }
 0x13d   : > { %837 = vst [vmem:[#allocation2 + $0x60] sm:$0xff] %v684_v4  ;;  %839 = vst [vmem:[#allocation2 + $0x70] sm:$0xff] %v797_v9  ;;  %v686_v13 = vadd.f32 %v685_v2, %v3614_v21  ;;  %v799_v0 = vadd.f32 %v798_v41, %v3616_v3 }
 0x13f   : > { %838 = vst [vmem:[#allocation2 + $0x68] sm:$0xff] %v686_v13  ;;  %840 = vst [vmem:[#allocation2 + $0x78] sm:$0xff] %v799_v0 }
 0x140   : > { %v689_v28 = vpop.f32.mrf.mxu0  ;;  %v802_v58 = vpop.f32.mrf.mxu1 }
 0x141   : > { %v690_v38 = vadd.f32 %v689_v28, %v3610_v31  ;;  %v803_v7 = vadd.f32 %v802_v58, %v3612_v18 }
 0x142   : > { %v691_v48 = vpop.f32.mrf.mxu0  ;;  %v804_v51 = vpop.f32.mrf.mxu1 }
 0x143   : > { %841 = vst [vmem:[#allocation2 + $0x80] sm:$0xff] %v690_v38  ;;  %843 = vst [vmem:[#allocation2 + $0x90] sm:$0xff] %v803_v7  ;;  %v692_v61 = vadd.f32 %v691_v48, %v3614_v21  ;;  %v805_v4 = vadd.f32 %v804_v51, %v3616_v3 }
 0x145   : > { %842 = vst [vmem:[#allocation2 + $0x88] sm:$0xff] %v692_v61  ;;  %844 = vst [vmem:[#allocation2 + $0x98] sm:$0xff] %v805_v4 }
 0x146   : > { %v695_v9 = vpop.f32.mrf.mxu0  ;;  %v808_v2 = vpop.f32.mrf.mxu1 }
 0x147   : > { %v696_v41 = vadd.f32 %v695_v9, %v3610_v31  ;;  %v809_v13 = vadd.f32 %v808_v2, %v3612_v18 }
 0x148   : > { %v697_v0 = vpop.f32.mrf.mxu0  ;;  %v810_v28 = vpop.f32.mrf.mxu1 }
 0x149   : > { %845 = vst [vmem:[#allocation2 + $0xa0] sm:$0xff] %v696_v41  ;;  %847 = vst [vmem:[#allocation2 + $0xb0] sm:$0xff] %v809_v13  ;;  %v698_v58 = vadd.f32 %v697_v0, %v3614_v21  ;;  %v811_v38 = vadd.f32 %v810_v28, %v3616_v3 }
 0x14b   : > { %846 = vst [vmem:[#allocation2 + $0xa8] sm:$0xff] %v698_v58  ;;  %848 = vst [vmem:[#allocation2 + $0xb8] sm:$0xff] %v811_v38 }
 0x14c   : > { %v701_v7 = vpop.f32.mrf.mxu0  ;;  %v814_v48 = vpop.f32.mrf.mxu1 }
 0x14d   : > { %v702_v51 = vadd.f32 %v701_v7, %v3610_v31  ;;  %v815_v61 = vadd.f32 %v814_v48, %v3612_v18 }
 0x14e   : > { %v703_v4 = vpop.f32.mrf.mxu0  ;;  %v816_v9 = vpop.f32.mrf.mxu1 }
 0x14f   : > { %849 = vst [vmem:[#allocation2 + $0xc0] sm:$0xff] %v702_v51  ;;  %851 = vst [vmem:[#allocation2 + $0xd0] sm:$0xff] %v815_v61  ;;  %v704_v2 = vadd.f32 %v703_v4, %v3614_v21  ;;  %v817_v41 = vadd.f32 %v816_v9, %v3616_v3 }
 0x151   : > { %850 = vst [vmem:[#allocation2 + $0xc8] sm:$0xff] %v704_v2  ;;  %852 = vst [vmem:[#allocation2 + $0xd8] sm:$0xff] %v817_v41 }
 0x152   : > { %v707_v13 = vpop.f32.mrf.mxu0  ;;  %v820_v0 = vpop.f32.mrf.mxu1 }
 0x153   : > { %v708_v28 = vadd.f32 %v707_v13, %v3610_v31  ;;  %v821_v58 = vadd.f32 %v820_v0, %v3612_v18 }
 0x154   : > { %v709_v38 = vpop.f32.mrf.mxu0  ;;  %v822_v7 = vpop.f32.mrf.mxu1 }
 0x155   : > { %853 = vst [vmem:[#allocation2 + $0xe0] sm:$0xff] %v708_v28  ;;  %855 = vst [vmem:[#allocation2 + $0xf0] sm:$0xff] %v821_v58  ;;  %v710_v48 = vadd.f32 %v709_v38, %v3614_v21  ;;  %v823_v51 = vadd.f32 %v822_v7, %v3616_v3 }
 0x157   : > { %854 = vst [vmem:[#allocation2 + $0xe8] sm:$0xff] %v710_v48  ;;  %856 = vst [vmem:[#allocation2 + $0xf8] sm:$0xff] %v823_v51 }
 0x15b   : > { %v932_v61 = vpop.f32.mrf.mxu0 }
 0x15d   : > { %v934_v41 = vpop.f32.mrf.mxu0 }
 0x15e   : > { %v862_v4 = vld [vmem:[%s861_s23] sm:$0xff]  ;;  %v863_v2 = vld [vmem:[%s861_s23 + $0x8] sm:$0xff]  ;;  %v1003_v0 = vpop.f32.mrf.mxu1  ;;  %v865_v28 = vld [vmem:[%s861_s23 + $0x18] sm:$0xff] }
 0x15f   : > { %v1008_v9 = vadd.f32 %v932_v61, %v862_v4  ;;  %v1009_v13 = vadd.f32 %v934_v41, %v863_v2  ;;  %v864_v38 = vld [vmem:[%s861_s23 + $0x10] sm:$0xff]  ;;  %s1416_s23 = scalar_lea.vmem [#allocation2], %s2643_s21  ;;  %s2627_s21 = sshll.u32 %s4307_s14, 3 }
 0x160   : > { %v1005_v58 = vpop.f32.mrf.mxu1  ;;  %v1010_v48 = vadd.f32 %v1003_v0, %v864_v38  ;;  %v4463_v38 = vld [vmem:[#allocation15_spill] sm:$0xff] }
 0x161   : > { %v2588_v31 = vmul.f32 -1.442695, %v1008_v9  ;;  %v2589_v18 = vmul.f32 -1.442695, %v1009_v13  ;;  %v1011_v21 = vadd.f32 %v1005_v58, %v865_v28 }
 0x163   : > { %2706 = vpow2.f32 %v2588_v31  ;;  %v2590_v3 = vmul.f32 -1.442695, %v1011_v21  ;;  %v4462_v21 = vld [vmem:[#allocation11_spill] sm:$0xff] }
 0x164   : > { %2708 = vpow2.f32 %v2589_v18 }
 0x165   : > { %2710 = vpow2.f32 %v2590_v3  ;;  %v4464_v3 = vld [vmem:[#allocation12_spill] sm:$0xff] }
 0x170   : > { %v2707_v7 = vpop.eup %2706 }
 0x171   : > { %v1015_v51 = vadd.f32 1.0, %v2707_v7  ;;  %v2709_v62 = vpop.eup %2708  ;;  %v4465_v7 = vld [vmem:[#allocation17_spill] sm:$0xff] }
 0x172   : > { %v1021_v61 = vadd.f32 1.0, %v2709_v62  ;;  %v2711_v4 = vpop.eup %2710 }
 0x173   : > { %2712 = vrcp.f32 %v1015_v51  ;;  %v1028_v31 = vadd.f32 1.0, %v2711_v4  ;;  %v4467_v51 = vld [vmem:[#allocation19_spill] sm:$0xff]  ;;  %v4469_v4 = vld [vmem:[#allocation21_spill] sm:$0xff] }
 0x174   : > { %2714 = vtanh.f32 %v1010_v48  ;;  %v4466_v48 = vld [vmem:[#allocation14_spill] sm:$0xff] }
 0x175   : > { %2716 = vrcp.f32 %v1021_v61  ;;  %v4468_v61 = vld [vmem:[#allocation16_spill] sm:$0xff] }
 0x176   : > { %2718 = vrcp.f32 %v1028_v31  ;;  %v4473_v31 = vld [vmem:[#allocation25_spill] sm:$0xff] }
 0x180   : > { %v2713_v9 = vpop.eup %2712 }
 0x181   : > { %v2715_v2 = vpop.eup %2714 }
 0x182   : > { %v2717_v41 = vpop.eup %2716  ;;  %v1033_v18 = vmul.f32 %v2715_v2, %v2713_v9  ;;  %v4470_v9 = vld [vmem:[#allocation18_spill] sm:$0xff]  ;;  %v4471_v2 = vld [vmem:[#allocation23_spill] sm:$0xff] }
 0x183   : > { %v1032_v13 = vmul.f32 0.0, %v2717_v41  ;;  %v2719_v0 = vpop.eup %2718  ;;  %v4472_v41 = vld [vmem:[#allocation20_spill] sm:$0xff] }
 0x185   : > { %v3656_v28 = vadd.f32 %v1033_v18, %v1032_v13  ;;  %v4474_v13 = vld [vmem:[#allocation22_spill] sm:$0xff] }
 0x186   : > { %v4475_v18 = vld [vmem:[#allocation26_spill] sm:$0xff] }
 0x187   : > { %2720 = vtanh.f32 %v3656_v28 }
 0x194   : > { %v2721_v58 = vpop.eup %2720 }
 0x195   : > { %v1036_v62 = vmul.f32 %v2721_v58, %v2719_v0  ;;  %v4476_v0 = vld [vmem:[#allocation24_spill] sm:$0xff]  ;;  %v4477_v58 = vmov 0.0  }
 0x197   : > { %1041 = vst [vmem:[%s1040_s5] sm:$0xff] %v1036_v62  ;;  %1116 = vmatmul.mubr.f32.vlgmr.msra.gmra.mxu0 %v1036_v62  ;;  %1187 = vmatmul.mubr.f32.vlgmr.msra.gmra.mxu1 %v1036_v62  ;;  %v4478_v62 = vld [vmem:[#allocation27_spill] sm:$0xff]  ;;  %s2644_s5 = sshll.u32 %s4155_s29, 5 }
 0x198   : > { %1237 = vmatpush1.msra.mxu0 %v3246_v5  ;;  %1308 = vmatpush1.msra.mxu1 %v3249_v6  ;;  %s1601_s25 = scalar_lea.vmem [#allocation2], %s2644_s5 }
 0x199   : > { %1238 = vmatprep.subr.mxu0 %v3256_v8  ;;  %1309 = vmatprep.subr.mxu1 %v3271_v12 }
 0x19a   : > { %1239 = vmatpush1.msra.mxu0 %v3264_v10  ;;  %1310 = vmatpush1.msra.mxu1 %v3282_v15 }
 0x19b   : > { %1240 = vmatprep.subr.mxu0 %v3268_v11  ;;  %1311 = vmatprep.subr.mxu1 %v3290_v17 }
 0x19c   : > { %1241 = vmatpush1.msra.mxu0 %v3279_v14  ;;  %1312 = vmatpush1.msra.mxu1 %v3301_v20 }
 0x19d   : > { %1242 = vmatprep.subr.mxu0 %v3287_v16  ;;  %1313 = vmatprep.subr.mxu1 %v3312_v23 }
 0x19e   : > { %1243 = vmatpush1.msra.mxu0 %v3298_v19  ;;  %1314 = vmatpush1.msra.mxu1 %v3320_v25 }
 0x19f   : > { %1244 = vmatprep.subr.mxu0 %v3309_v22  ;;  %1315 = vmatprep.subr.mxu1 %v3326_v27 }
 0x1a0   : > { %1245 = vmatpush1.msra.mxu0 %v3317_v24  ;;  %1316 = vmatpush1.msra.mxu1 %v3339_v30 }
 0x1a1   : > { %1246 = vmatprep.subr.mxu0 %v3323_v26  ;;  %1317 = vmatprep.subr.mxu1 %v3350_v33 }
 0x1a2   : > { %1247 = vmatpush1.msra.mxu0 %v3336_v29  ;;  %1318 = vmatpush1.msra.mxu1 %v3358_v35 }
 0x1a3   : > { %1248 = vmatprep.subr.mxu0 %v3347_v32  ;;  %1319 = vmatprep.subr.mxu1 %v3364_v37 }
 0x1a4   : > { %1249 = vmatpush1.msra.mxu0 %v3355_v34  ;;  %1320 = vmatpush1.msra.mxu1 %v3377_v40 }
 0x1a5   : > { %1250 = vmatprep.subr.mxu0 %v3361_v36  ;;  %1321 = vmatprep.subr.mxu1 %v3388_v43 }
 0x1a6   : > { %1251 = vmatpush1.msra.mxu0 %v3374_v39  ;;  %1322 = vmatpush1.msra.mxu1 %v3396_v45 }
 0x1a7   : > { %1252 = vmatprep.subr.mxu0 %v3385_v42  ;;  %1323 = vmatprep.subr.mxu1 %v3402_v47 }
 0x1a8   : > { %1253 = vmatpush1.msra.mxu0 %v3393_v44  ;;  %1324 = vmatpush1.msra.mxu1 %v3415_v50 }
 0x1a9   : > { %1254 = vmatprep.subr.mxu0 %v3399_v46  ;;  %1325 = vmatprep.subr.mxu1 %v3426_v53 }
 0x1aa   : > { %1255 = vmatpush1.msra.mxu0 %v3412_v49  ;;  %1326 = vmatpush1.msra.mxu1 %v3434_v55 }
 0x1ab   : > { %1256 = vmatprep.subr.mxu0 %v3423_v52  ;;  %1327 = vmatprep.subr.mxu1 %v3440_v57 }
 0x1ac   : > { %1257 = vmatpush1.msra.mxu0 %v3431_v54  ;;  %1328 = vmatpush1.msra.mxu1 %v3453_v60 }
 0x1ad   : > { %1258 = vmatprep.subr.mxu0 %v3437_v56  ;;  %1329 = vmatprep.subr.mxu1 %v3464_v63 }
 0x1ae   : > { %1259 = vmatpush1.msra.mxu0 %v3450_v59  ;;  %1330 = vmatpush1.msra.mxu1 %v3472_v1 }
 0x1af   : > { %1260 = vmatprep.subr.mxu0 %v4462_v21  ;;  %1331 = vmatprep.subr.mxu1 %v4463_v38 }
 0x1b0   : > { %1261 = vmatpush1.msra.mxu0 %v4464_v3  ;;  %1332 = vmatpush1.msra.mxu1 %v4465_v7  ;;  %v1049_v7 = vld [vmem:[%s1046_s7 + $0x10] sm:$0xff] }
 0x1b1   : > { %1262 = vmatprep.subr.mxu0 %v4466_v48  ;;  %1333 = vmatprep.subr.mxu1 %v4467_v51  ;;  %v1050_v51 = vld [vmem:[%s1046_s7 + $0x18] sm:$0xff] }
 0x1b2   : > { %1263 = vmatpush1.msra.mxu0 %v4468_v61  ;;  %1334 = vmatpush1.msra.mxu1 %v4469_v4  ;;  %v4479_v4 = vld [vmem:[#allocation9_spill] sm:$0xff] }
 0x1b3   : > { %1264 = vmatprep.subr.mxu0 %v4470_v9  ;;  %1335 = vmatprep.subr.mxu1 %v4471_v2  ;;  %v4480_v9 = vld [vmem:[#allocation10_spill] sm:$0xff] }
 0x1b4   : > { %1265 = vmatpush1.msra.mxu0 %v4472_v41  ;;  %1336 = vmatpush1.msra.mxu1 %v4473_v31 }
 0x1b5   : > { %1266 = vmatprep.subr.mxu0 %v4474_v13  ;;  %1337 = vmatprep.subr.mxu1 %v4475_v18  ;;  %v1047_v13 = vld [vmem:[%s1046_s7] sm:$0xff] }
 0x1b6   : > { %1267 = vmatpush1.msra.mxu0 %v4476_v0  ;;  %1300 = vmatprep.mubr.f32.mxu0 %v4477_v58  ;;  %v1048_v0 = vld [vmem:[%s1046_s7 + $0x8] sm:$0xff]  ;;  %s1780_s7 = scalar_lea.vmem %s3661_s30, %s2615_s6 [#allocation7]  ;;  %s2635_s6 = sshll.u32 (%p3057_p9), %s2968_s18, 3 }
 0x1b7   : > { %1338 = vmatpush1.msra.mxu1 %v4478_v62  ;;  %1371 = vmatprep.mubr.f32.mxu1 %v4477_v58 }
 0x1b8   : > { %1421 = vmatprep.subr.mxu0 %v4479_v4  ;;  %1492 = vmatprep.subr.mxu1 %v4480_v9 }
 0x257   : > { %v1117_v18 = vpop.f32.mrf.mxu0  ;;  %v1188_v62 = vpop.f32.mrf.mxu1 }
 0x258   : > { %v1193_v31 = vadd.f32 %v1117_v18, %v1047_v13  ;;  %v1195_v38 = vadd.f32 %v1188_v62, %v1049_v7 }
 0x259   : > { %v1119_v41 = vpop.f32.mrf.mxu0  ;;  %v1190_v4 = vpop.f32.mrf.mxu1 }
 0x25a   : > { %v2594_v2 = vmul.f32 -1.442695, %v1193_v31  ;;  %v1194_v61 = vadd.f32 %v1119_v41, %v1048_v0  ;;  %v1196_v9 = vadd.f32 %v1190_v4, %v1050_v51  ;;  %v3825_v4 = vld [vmem:[%s3231_s11 + $0x1e0] sm:$0xff] }
 0x25c   : > { %2722 = vpow2.f32 %v2594_v2  ;;  %v2595_v58 = vmul.f32 -1.442695, %v1194_v61  ;;  %v2596_v48 = vmul.f32 -1.442695, %v1196_v9  ;;  %v3829_v9 = vld [vmem:[%s3231_s11 + $0x1f0] sm:$0xff] }
 0x25e   : > { %2724 = vpow2.f32 %v2595_v58 }
 0x25f   : > { %2726 = vpow2.f32 %v2596_v48 }
 0x269   : > { %v2723_v3 = vpop.eup %2722 }
 0x26a   : > { %v1200_v21 = vadd.f32 1.0, %v2723_v3 }
 0x26b   : > { %v2725_v1 = vpop.eup %2724 }
 0x26c   : > { %2728 = vrcp.f32 %v1200_v21  ;;  %v1206_v13 = vadd.f32 1.0, %v2725_v1  ;;  %v2727_v2 = vpop.eup %2726 }
 0x26d   : > { %2730 = vtanh.f32 %v1195_v38  ;;  %v1213_v18 = vadd.f32 1.0, %v2727_v2  ;;  %v3837_v2 = vld [vmem:[%s3231_s11 + $0x1d8] sm:$0xff] }
 0x26e   : > { %2732 = vrcp.f32 %v1206_v13  ;;  %v3833_v13 = vld [vmem:[%s3231_s11 + $0x1c8] sm:$0xff] }
 0x26f   : > { %2734 = vrcp.f32 %v1213_v18  ;;  %v3853_v18 = vld [vmem:[%s3231_s11 + $0x1b8] sm:$0xff] }
 0x279   : > { %v2729_v41 = vpop.eup %2728 }
 0x27a   : > { %v2731_v61 = vpop.eup %2730 }
 0x27b   : > { %v2733_v31 = vpop.eup %2732  ;;  %v1218_v0 = vmul.f32 %v2731_v61, %v2729_v41  ;;  %v3841_v41 = vld [vmem:[%s3231_s11 + $0x1c0] sm:$0xff]  ;;  %v3845_v61 = vld [vmem:[%s3231_s11 + $0x1d0] sm:$0xff] }
 0x27c   : > { %v1217_v51 = vmul.f32 %v2733_v31, %v3656_v28  ;;  %v2735_v3 = vpop.eup %2734  ;;  %v3849_v31 = vld [vmem:[%s3231_s11 + $0x1a8] sm:$0xff] }
 0x27e   : > { %v3736_v58 = vadd.f32 %v1218_v0, %v1217_v51  ;;  %v3857_v0 = vld [vmem:[%s3231_s11 + $0x1a0] sm:$0xff]  ;;  %v3861_v51 = vld [vmem:[%s3231_s11 + $0x1b0] sm:$0xff] }
 0x280   : > { %2736 = vtanh.f32 %v3736_v58 }
 0x28d   : > { %v2737_v21 = vpop.eup %2736 }
 0x28e   : > { %v1221_v1 = vmul.f32 %v2737_v21, %v2735_v3  ;;  %v3869_v3 = vld [vmem:[%s3231_s11 + $0x198] sm:$0xff]  ;;  %v3873_v21 = vld [vmem:[%s3231_s11 + $0x180] sm:$0xff] }
 0x290   : > { %1226 = vst [vmem:[%s1225_s9] sm:$0xff] %v1221_v1  ;;  %1301 = vmatmul.mubr.f32.vlgmr.msra.gmra.mxu0 %v1221_v1  ;;  %1372 = vmatmul.mubr.f32.vlgmr.msra.gmra.mxu1 %v1221_v1  ;;  %v3877_v1 = vld [vmem:[%s3231_s11 + $0x190] sm:$0xff]  ;;  %s2645_s9 = sshll.u32 %s4232_s8, 5 }
 0x291   : > { %1422 = vmatpush1.msra.mxu0 %v3246_v5  ;;  %1493 = vmatpush1.msra.mxu1 %v3249_v6  ;;  %v4481_v5 = vld [vmem:[#allocation13_spill] sm:$0xff]  ;;  %v4482_v6 = vld [vmem:[#allocation11_spill] sm:$0xff]  ;;  %s1786_s10 = scalar_lea.vmem [#allocation2], %s2645_s9  ;;  %s2355_s9 = scalar_lea.vmem (%p3057_p9), %s4356_s4, %s2635_s6 }
 0x292   : > { %1423 = vmatprep.subr.mxu0 %v3256_v8  ;;  %1494 = vmatprep.subr.mxu1 %v3271_v12  ;;  %v4483_v8 = vld [vmem:[#allocation15_spill] sm:$0xff]  ;;  %v4486_v12 = vld [vmem:[#allocation14_spill] sm:$0xff] }
 0x293   : > { %1424 = vmatpush1.msra.mxu0 %v3264_v10  ;;  %1495 = vmatpush1.msra.mxu1 %v3282_v15  ;;  %v4484_v10 = vld [vmem:[#allocation12_spill] sm:$0xff] }
 0x294   : > { %1425 = vmatprep.subr.mxu0 %v3268_v11  ;;  %1496 = vmatprep.subr.mxu1 %v3290_v17  ;;  %v4485_v11 = vld [vmem:[#allocation17_spill] sm:$0xff]  ;;  %v4488_v15 = vld [vmem:[#allocation16_spill] sm:$0xff]  ;;  %v4490_v17 = vld [vmem:[#allocation18_spill] sm:$0xff] }
 0x295   : > { %1426 = vmatpush1.msra.mxu0 %v3279_v14  ;;  %1497 = vmatpush1.msra.mxu1 %v3301_v20  ;;  %v4487_v14 = vld [vmem:[#allocation19_spill] sm:$0xff]  ;;  %v4492_v20 = vld [vmem:[#allocation20_spill] sm:$0xff] }
 0x296   : > { %1427 = vmatprep.subr.mxu0 %v3287_v16  ;;  %1498 = vmatprep.subr.mxu1 %v3312_v23  ;;  %v4489_v16 = vld [vmem:[#allocation21_spill] sm:$0xff]  ;;  %v4494_v23 = vld [vmem:[#allocation22_spill] sm:$0xff] }
 0x297   : > { %1428 = vmatpush1.msra.mxu0 %v3298_v19  ;;  %1499 = vmatpush1.msra.mxu1 %v3320_v25  ;;  %v4491_v19 = vld [vmem:[#allocation23_spill] sm:$0xff]  ;;  %v4496_v25 = vld [vmem:[#allocation24_spill] sm:$0xff] }
 0x298   : > { %1429 = vmatprep.subr.mxu0 %v3309_v22  ;;  %1500 = vmatprep.subr.mxu1 %v3326_v27  ;;  %v4493_v22 = vld [vmem:[#allocation25_spill] sm:$0xff]  ;;  %v4498_v27 = vld [vmem:[#allocation27_spill] sm:$0xff] }
 0x299   : > { %1430 = vmatpush1.msra.mxu0 %v3317_v24  ;;  %1501 = vmatpush1.msra.mxu1 %v3339_v30  ;;  %v4495_v24 = vld [vmem:[#allocation26_spill] sm:$0xff]  ;;  %v3810_v30 = vld [vmem:[%s3231_s11 + $0x1f8] sm:$0xff] }
 0x29a   : > { %1431 = vmatprep.subr.mxu0 %v3323_v26  ;;  %1502 = vmatprep.subr.mxu1 %v3350_v33  ;;  %v4497_v26 = vmov 0.0   ;;  %4500 = vst [vmem:[#allocation10_spill] sm:$0xff] %v3810_v30 }
 0x29b   : > { %1432 = vmatpush1.msra.mxu0 %v3336_v29  ;;  %1503 = vmatpush1.msra.mxu1 %v3358_v35  ;;  %v3806_v29 = vld [vmem:[%s3231_s11 + $0x1e8] sm:$0xff] }
 0x29c   : > { %1433 = vmatprep.subr.mxu0 %v3347_v32  ;;  %1504 = vmatprep.subr.mxu1 %v3364_v37  ;;  %4499 = vst [vmem:[#allocation9_spill] sm:$0xff] %v3806_v29  ;;  %v1232_v32 = vld [vmem:[%s1231_s13] sm:$0xff]  ;;  %v1233_v35 = vld [vmem:[%s1231_s13 + $0x8] sm:$0xff] }
 0x29d   : > { %1434 = vmatpush1.msra.mxu0 %v3355_v34  ;;  %1505 = vmatpush1.msra.mxu1 %v3377_v40 }
 0x29e   : > { %1435 = vmatprep.subr.mxu0 %v3361_v36  ;;  %1506 = vmatprep.subr.mxu1 %v3388_v43 }
 0x29f   : > { %1436 = vmatpush1.msra.mxu0 %v3374_v39  ;;  %1507 = vmatpush1.msra.mxu1 %v3396_v45 }
 0x2a0   : > { %1437 = vmatprep.subr.mxu0 %v3385_v42  ;;  %1508 = vmatprep.subr.mxu1 %v3402_v47  ;;  %v1234_v47 = vld [vmem:[%s1231_s13 + $0x10] sm:$0xff] }
 0x2a1   : > { %1438 = vmatpush1.msra.mxu0 %v3393_v44  ;;  %1509 = vmatpush1.msra.mxu1 %v3415_v50  ;;  %v1235_v44 = vld [vmem:[%s1231_s13 + $0x18] sm:$0xff]  ;;  %s1965_s13 = scalar_lea.vmem %s3661_s30, %s2621_s12 [#allocation7] }
 0x2a2   : > { %1439 = vmatprep.subr.mxu0 %v3399_v46  ;;  %1510 = vmatprep.subr.mxu1 %v3426_v53 }
 0x2a3   : > { %1440 = vmatpush1.msra.mxu0 %v3412_v49  ;;  %1511 = vmatpush1.msra.mxu1 %v3434_v55 }
 0x2a4   : > { %1441 = vmatprep.subr.mxu0 %v3423_v52  ;;  %1512 = vmatprep.subr.mxu1 %v3440_v57 }
 0x2a5   : > { %1442 = vmatpush1.msra.mxu0 %v3431_v54  ;;  %1513 = vmatpush1.msra.mxu1 %v3453_v60 }
 0x2a6   : > { %1443 = vmatprep.subr.mxu0 %v3437_v56  ;;  %1514 = vmatprep.subr.mxu1 %v3464_v63 }
 0x2a7   : > { %1444 = vmatpush1.msra.mxu0 %v3450_v59  ;;  %1515 = vmatpush1.msra.mxu1 %v4481_v5  ;;  %v3881_v5 = vld [vmem:[%s3231_s11 + $0x168] sm:$0xff] }
 0x2a8   : > { %1445 = vmatprep.subr.mxu0 %v4482_v6  ;;  %1516 = vmatprep.subr.mxu1 %v4483_v8  ;;  %v3885_v6 = vld [vmem:[%s3231_s11 + $0x178] sm:$0xff]  ;;  %v3889_v8 = vld [vmem:[%s3231_s11 + $0x160] sm:$0xff] }
 0x2a9   : > { %1446 = vmatpush1.msra.mxu0 %v4484_v10  ;;  %1517 = vmatpush1.msra.mxu1 %v4485_v11  ;;  %v3893_v10 = vld [vmem:[%s3231_s11 + $0x170] sm:$0xff]  ;;  %v3897_v11 = vld [vmem:[%s3231_s11 + $0x148] sm:$0xff] }
 0x2aa   : > { %1447 = vmatprep.subr.mxu0 %v4486_v12  ;;  %1518 = vmatprep.subr.mxu1 %v4487_v14  ;;  %v3901_v12 = vld [vmem:[%s3231_s11 + $0x158] sm:$0xff]  ;;  %v3905_v14 = vld [vmem:[%s3231_s11 + $0x140] sm:$0xff] }
 0x2ab   : > { %1448 = vmatpush1.msra.mxu0 %v4488_v15  ;;  %1519 = vmatpush1.msra.mxu1 %v4489_v16  ;;  %v3909_v15 = vld [vmem:[%s3231_s11 + $0x150] sm:$0xff]  ;;  %v3913_v16 = vld [vmem:[%s3231_s11 + $0x128] sm:$0xff] }
 0x2ac   : > { %1449 = vmatprep.subr.mxu0 %v4490_v17  ;;  %1520 = vmatprep.subr.mxu1 %v4491_v19  ;;  %v3917_v17 = vld [vmem:[%s3231_s11 + $0x138] sm:$0xff]  ;;  %v3921_v19 = vld [vmem:[%s3231_s11 + $0x120] sm:$0xff] }
 0x2ad   : > { %1450 = vmatpush1.msra.mxu0 %v4492_v20  ;;  %1521 = vmatpush1.msra.mxu1 %v4493_v22  ;;  %v3925_v20 = vld [vmem:[%s3231_s11 + $0x130] sm:$0xff]  ;;  %v3929_v22 = vld [vmem:[%s3231_s11 + $0x108] sm:$0xff] }
 0x2ae   : > { %1451 = vmatprep.subr.mxu0 %v4494_v23  ;;  %1522 = vmatprep.subr.mxu1 %v4495_v24  ;;  %v3933_v23 = vld [vmem:[%s3231_s11 + $0x118] sm:$0xff]  ;;  %v3937_v24 = vld [vmem:[%s3231_s11 + $0x100] sm:$0xff] }
 0x2af   : > { %1452 = vmatpush1.msra.mxu0 %v4496_v25  ;;  %1485 = vmatprep.mubr.f32.mxu0 %v4497_v26  ;;  %v3941_v25 = vld [vmem:[%s3231_s11 + $0x110] sm:$0xff] }
 0x2b0   : > { %1523 = vmatpush1.msra.mxu1 %v4498_v27  ;;  %1556 = vmatprep.mubr.f32.mxu1 %v4497_v26  ;;  %v3945_v27 = vld [vmem:[%s3231_s11 + $0xe8] sm:$0xff] }
 0x2b1   : > { %1606 = vmatprep.subr.mxu0 %v3806_v29  ;;  %1677 = vmatprep.subr.mxu1 %v3810_v30 }
 0x350   : > { %v1302_v33 = vpop.f32.mrf.mxu0  ;;  %v1373_v40 = vpop.f32.mrf.mxu1 }
 0x351   : > { %v1378_v34 = vadd.f32 %v1302_v33, %v1232_v32  ;;  %v1380_v50 = vadd.f32 %v1373_v40, %v1234_v47  ;;  %v3949_v32 = vld [vmem:[%s3231_s11 + $0xf8] sm:$0xff]  ;;  %v3953_v33 = vld [vmem:[%s3231_s11 + $0xe0] sm:$0xff]  ;;  %v3977_v40 = vld [vmem:[%s3231_s11 + $0xa8] sm:$0xff] }
 0x352   : > { %v1304_v36 = vpop.f32.mrf.mxu0  ;;  %v1375_v43 = vpop.f32.mrf.mxu1  ;;  %v4001_v47 = vld [vmem:[%s3231_s11 + $0x80] sm:$0xff] }
 0x353   : > { %v2600_v37 = vmul.f32 -1.442695, %v1378_v34  ;;  %v1379_v39 = vadd.f32 %v1304_v36, %v1233_v35  ;;  %v1381_v45 = vadd.f32 %v1375_v43, %v1235_v44  ;;  %v3957_v34 = vld [vmem:[%s3231_s11 + $0xf0] sm:$0xff]  ;;  %v3961_v35 = vld [vmem:[%s3231_s11 + $0xc8] sm:$0xff]  ;;  %v3965_v36 = vld [vmem:[%s3231_s11 + $0xd8] sm:$0xff] }
 0x354   : > { %v3985_v43 = vld [vmem:[%s3231_s11 + $0xa0] sm:$0xff]  ;;  %v3989_v44 = vld [vmem:[%s3231_s11 + $0xb0] sm:$0xff] }
 0x355   : > { %2738 = vpow2.f32 %v2600_v37  ;;  %v2601_v42 = vmul.f32 -1.442695, %v1379_v39  ;;  %v2602_v46 = vmul.f32 -1.442695, %v1381_v45  ;;  %v3969_v37 = vld [vmem:[%s3231_s11 + $0xc0] sm:$0xff]  ;;  %v3973_v39 = vld [vmem:[%s3231_s11 + $0xd0] sm:$0xff] }
 0x356   : > { %v3993_v45 = vld [vmem:[%s3231_s11 + $0x88] sm:$0xff] }
 0x357   : > { %2740 = vpow2.f32 %v2601_v42  ;;  %v3981_v42 = vld [vmem:[%s3231_s11 + $0xb8] sm:$0xff] }
 0x358   : > { %2742 = vpow2.f32 %v2602_v46  ;;  %v3997_v46 = vld [vmem:[%s3231_s11 + $0x98] sm:$0xff] }
 0x362   : > { %v2739_v49 = vpop.eup %2738 }
 0x363   : > { %v1385_v52 = vadd.f32 1.0, %v2739_v49  ;;  %v4005_v49 = vld [vmem:[%s3231_s11 + $0x90] sm:$0xff] }
 0x364   : > { %v2741_v53 = vpop.eup %2740  ;;  %4501 = vst [vmem:[#allocation13_spill] sm:$0xff] %v4005_v49 }
 0x365   : > { %2744 = vrcp.f32 %v1385_v52  ;;  %v1391_v54 = vadd.f32 1.0, %v2741_v53  ;;  %v2743_v55 = vpop.eup %2742  ;;  %v4013_v52 = vld [vmem:[%s3231_s11 + $0x78] sm:$0xff]  ;;  %v4017_v53 = vld [vmem:[%s3231_s11 + $0x60] sm:$0xff] }
 0x366   : > { %2746 = vtanh.f32 %v1380_v50  ;;  %v1398_v60 = vadd.f32 1.0, %v2743_v55  ;;  %v4009_v50 = vld [vmem:[%s3231_s11 + $0x68] sm:$0xff]  ;;  %4503 = vst [vmem:[#allocation15_spill] sm:$0xff] %v4013_v52  ;;  %4504 = vst [vmem:[#allocation12_spill] sm:$0xff] %v4017_v53 }
 0x367   : > { %2748 = vrcp.f32 %v1391_v54  ;;  %4502 = vst [vmem:[#allocation11_spill] sm:$0xff] %v4009_v50  ;;  %v4021_v54 = vld [vmem:[%s3231_s11 + $0x70] sm:$0xff]  ;;  %v4025_v55 = vld [vmem:[%s3231_s11 + $0x48] sm:$0xff] }
 0x368   : > { %2750 = vrcp.f32 %v1398_v60  ;;  %4505 = vst [vmem:[#allocation17_spill] sm:$0xff] %v4021_v54  ;;  %4506 = vst [vmem:[#allocation14_spill] sm:$0xff] %v4025_v55  ;;  %v4041_v60 = vld [vmem:[%s3231_s11 + $0x28] sm:$0xff] }
 0x369   : > { %4510 = vst [vmem:[#allocation18_spill] sm:$0xff] %v4041_v60 }
 0x372   : > { %v2745_v56 = vpop.eup %2744 }
 0x373   : > { %v2747_v57 = vpop.eup %2746 }
 0x374   : > { %v2749_v59 = vpop.eup %2748  ;;  %v1403_v63 = vmul.f32 %v2747_v57, %v2745_v56  ;;  %v4029_v56 = vld [vmem:[%s3231_s11 + $0x58] sm:$0xff]  ;;  %v4033_v57 = vld [vmem:[%s3231_s11 + $0x40] sm:$0xff] }
 0x375   : > { %v1402_v28 = vmul.f32 %v2749_v59, %v3736_v58  ;;  %v2751_v7 = vpop.eup %2750  ;;  %v3865_v58 = vld [vmem:[%s3231_s11 + $0x188] sm:$0xff]  ;;  %4507 = vst [vmem:[#allocation19_spill] sm:$0xff] %v4029_v56  ;;  %4508 = vst [vmem:[#allocation16_spill] sm:$0xff] %v4033_v57  ;;  %v4037_v59 = vld [vmem:[%s3231_s11 + $0x50] sm:$0xff] }
 0x376   : > { %4509 = vst [vmem:[#allocation21_spill] sm:$0xff] %v4037_v59 }
 0x377   : > { %v3819_v38 = vadd.f32 %v1403_v63, %v1402_v28  ;;  %v4045_v63 = vld [vmem:[%s3231_s11 + $0x38] sm:$0xff]  ;;  %v4049_v28 = vld [vmem:[%s3231_s11 + $0x20] sm:$0xff] }
 0x378   : > { %4511 = vst [vmem:[#allocation23_spill] sm:$0xff] %v4045_v63  ;;  %4512 = vst [vmem:[#allocation20_spill] sm:$0xff] %v4049_v28 }
 0x379   : > { %2752 = vtanh.f32 %v3819_v38 }
 0x386   : > { %v2753_v48 = vpop.eup %2752 }
 0x387   : > { %v1406_v62 = vmul.f32 %v2753_v48, %v2751_v7  ;;  %v4053_v7 = vld [vmem:[%s3231_s11 + $0x30] sm:$0xff]  ;;  %v4057_v48 = vld [vmem:[%s3231_s11 + $0x8] sm:$0xff] }
 0x388   : > { %4513 = vst [vmem:[#allocation25_spill] sm:$0xff] %v4053_v7  ;;  %4514 = vst [vmem:[#allocation22_spill] sm:$0xff] %v4057_v48 }
 0x389   : > { %1411 = vst [vmem:[%s1410_s15] sm:$0xff] %v1406_v62  ;;  %1486 = vmatmul.mubr.f32.vlgmr.msra.gmra.mxu0 %v1406_v62  ;;  %1557 = vmatmul.mubr.f32.vlgmr.msra.gmra.mxu1 %v1406_v62  ;;  %v4061_v62 = vld [vmem:[%s3231_s11 + $0x18] sm:$0xff]  ;;  %s2646_s15 = sshll.u32 %s4307_s14, 5 }
 0x38a   : > { %1607 = vmatpush1.msra.mxu0 %v3825_v4  ;;  %1678 = vmatpush1.msra.mxu1 %v3829_v9  ;;  %4515 = vst [vmem:[#allocation26_spill] sm:$0xff] %v4061_v62 }
 0x38b   : > { %1608 = vmatprep.subr.mxu0 %v3833_v13  ;;  %1679 = vmatprep.subr.mxu1 %v3837_v2 }
 0x38c   : > { %1609 = vmatpush1.msra.mxu0 %v3841_v41  ;;  %1680 = vmatpush1.msra.mxu1 %v3845_v61 }
 0x38d   : > { %1610 = vmatprep.subr.mxu0 %v3849_v31  ;;  %1681 = vmatprep.subr.mxu1 %v3853_v18 }
 0x38e   : > { %1611 = vmatpush1.msra.mxu0 %v3857_v0  ;;  %1682 = vmatpush1.msra.mxu1 %v3861_v51 }
 0x38f   : > { %1612 = vmatprep.subr.mxu0 %v3865_v58  ;;  %1683 = vmatprep.subr.mxu1 %v3869_v3 }
 0x390   : > { %1613 = vmatpush1.msra.mxu0 %v3873_v21  ;;  %1684 = vmatpush1.msra.mxu1 %v3877_v1 }
 0x391   : > { %1614 = vmatprep.subr.mxu0 %v3881_v5  ;;  %1685 = vmatprep.subr.mxu1 %v3885_v6 }
 0x392   : > { %1615 = vmatpush1.msra.mxu0 %v3889_v8  ;;  %1686 = vmatpush1.msra.mxu1 %v3893_v10 }
 0x393   : > { %1616 = vmatprep.subr.mxu0 %v3897_v11  ;;  %1687 = vmatprep.subr.mxu1 %v3901_v12 }
 0x394   : > { %1617 = vmatpush1.msra.mxu0 %v3905_v14  ;;  %1688 = vmatpush1.msra.mxu1 %v3909_v15 }
 0x395   : > { %1618 = vmatprep.subr.mxu0 %v3913_v16  ;;  %1689 = vmatprep.subr.mxu1 %v3917_v17 }
 0x396   : > { %1619 = vmatpush1.msra.mxu0 %v3921_v19  ;;  %1690 = vmatpush1.msra.mxu1 %v3925_v20 }
 0x397   : > { %1620 = vmatprep.subr.mxu0 %v3929_v22  ;;  %1691 = vmatprep.subr.mxu1 %v3933_v23 }
 0x398   : > { %1621 = vmatpush1.msra.mxu0 %v3937_v24  ;;  %1692 = vmatpush1.msra.mxu1 %v3941_v25 }
 0x399   : > { %1622 = vmatprep.subr.mxu0 %v3945_v27  ;;  %1693 = vmatprep.subr.mxu1 %v3949_v32 }
 0x39a   : > { %1623 = vmatpush1.msra.mxu0 %v3953_v33  ;;  %1694 = vmatpush1.msra.mxu1 %v3957_v34 }
 0x39b   : > { %1624 = vmatprep.subr.mxu0 %v3961_v35  ;;  %1695 = vmatprep.subr.mxu1 %v3965_v36 }
 0x39c   : > { %1625 = vmatpush1.msra.mxu0 %v3969_v37  ;;  %1696 = vmatpush1.msra.mxu1 %v3973_v39 }
 0x39d   : > { %1626 = vmatprep.subr.mxu0 %v3977_v40  ;;  %1697 = vmatprep.subr.mxu1 %v3981_v42 }
 0x39e   : > { %1627 = vmatpush1.msra.mxu0 %v3985_v43  ;;  %1698 = vmatpush1.msra.mxu1 %v3989_v44 }
 0x39f   : > { %1628 = vmatprep.subr.mxu0 %v3993_v45  ;;  %1699 = vmatprep.subr.mxu1 %v3997_v46 }
 0x3a0   : > { %1629 = vmatpush1.msra.mxu0 %v4001_v47  ;;  %1700 = vmatpush1.msra.mxu1 %v4005_v49 }
 0x3a1   : > { %1630 = vmatprep.subr.mxu0 %v4009_v50  ;;  %1701 = vmatprep.subr.mxu1 %v4013_v52 }
 0x3a2   : > { %1631 = vmatpush1.msra.mxu0 %v4017_v53  ;;  %1702 = vmatpush1.msra.mxu1 %v4021_v54  ;;  %v1419_v54 = vld [vmem:[%s1416_s23 + $0x10] sm:$0xff] }
 0x3a3   : > { %1632 = vmatprep.subr.mxu0 %v4025_v55  ;;  %1703 = vmatprep.subr.mxu1 %v4029_v56  ;;  %v1420_v56 = vld [vmem:[%s1416_s23 + $0x18] sm:$0xff] }
 0x3a4   : > { %1633 = vmatpush1.msra.mxu0 %v4033_v57  ;;  %1704 = vmatpush1.msra.mxu1 %v4037_v59 }
 0x3a5   : > { %1634 = vmatprep.subr.mxu0 %v4041_v60  ;;  %1705 = vmatprep.subr.mxu1 %v4045_v63  ;;  %v4065_v60 = vld [vmem:[%s3231_s11] sm:$0xff]  ;;  %v4070_v63 = vld [vmem:[%s3231_s11 + $0x10] sm:$0xff]  ;;  %s2609_s11 = sshll.u32 %s4078_s26, 3  ;;  %s1971_s26 = scalar_lea.vmem [#allocation2], %s2646_s15 }
 0x3a6   : > { %1635 = vmatpush1.msra.mxu0 %v4049_v28  ;;  %1706 = vmatpush1.msra.mxu1 %v4053_v7  ;;  %4516 = vst [vmem:[#allocation24_spill] sm:$0xff] %v4065_v60  ;;  %4517 = vst [vmem:[#allocation27_spill] sm:$0xff] %v4070_v63  ;;  %v1418_v7 = vld [vmem:[%s1416_s23 + $0x8] sm:$0xff]  ;;  %s1595_s24 = scalar_lea.vmem %s3661_s30, %s2609_s11 [#allocation7] }
 0x3a7   : > { %1636 = vmatprep.subr.mxu0 %v4057_v48  ;;  %1707 = vmatprep.subr.mxu1 %v4061_v62  ;;  %v1417_v62 = vld [vmem:[%s1416_s23] sm:$0xff]  ;;  %s2150_s23 = scalar_lea.vmem %s3661_s30, %s2627_s21 [#allocation7] }
 0x3a8   : > { %1637 = vmatpush1.msra.mxu0 %v4065_v60  ;;  %1670 = vmatprep.mubr.f32.mxu0 %v4497_v26  ;;  %s4315_s11 = scalar_select %p362_p11, 0, 7 }
 0x3a9   : > { %1708 = vmatpush1.msra.mxu1 %v4070_v63  ;;  %1741 = vmatprep.mubr.f32.mxu1 %v4497_v26 }
 0x3aa   : > { %1791 = vmatprep.subr.mxu0 %v3806_v29  ;;  %1862 = vmatprep.subr.mxu1 %v3810_v30  ;;  %s2633_s5 = sshll.u32 %s4315_s11, 3 }
 0x449   : > { %v1487_v60 = vpop.f32.mrf.mxu0  ;;  %v1558_v63 = vpop.f32.mrf.mxu1 }
 0x44a   : > { %v1563_v48 = vadd.f32 %v1487_v60, %v1417_v62  ;;  %v1565_v52 = vadd.f32 %v1558_v63, %v1419_v54  ;;  %v4520_v54 = vld [vmem:[#allocation15_spill] sm:$0xff]  ;;  %v4523_v63 = vld [vmem:[#allocation14_spill] sm:$0xff] }
 0x44b   : > { %v1489_v28 = vpop.f32.mrf.mxu0  ;;  %v1560_v29 = vpop.f32.mrf.mxu1  ;;  %v4524_v62 = vld [vmem:[#allocation19_spill] sm:$0xff] }
 0x44c   : > { %v2606_v59 = vmul.f32 -1.442695, %v1563_v48  ;;  %v1564_v57 = vadd.f32 %v1489_v28, %v1418_v7  ;;  %v1566_v30 = vadd.f32 %v1560_v29, %v1420_v56  ;;  %v4522_v56 = vld [vmem:[#allocation17_spill] sm:$0xff] }
 0x44e   : > { %2754 = vpow2.f32 %v2606_v59  ;;  %v2607_v26 = vmul.f32 -1.442695, %v1564_v57  ;;  %v2608_v55 = vmul.f32 -1.442695, %v1566_v30 }
 0x450   : > { %2756 = vpow2.f32 %v2607_v26 }
 0x451   : > { %2758 = vpow2.f32 %v2608_v55  ;;  %v4521_v55 = vld [vmem:[#allocation12_spill] sm:$0xff] }
 0x45b   : > { %v2755_v53 = vpop.eup %2754 }
 0x45c   : > { %v1570_v50 = vadd.f32 1.0, %v2755_v53 }
 0x45d   : > { %v2757_v49 = vpop.eup %2756 }
 0x45e   : > { %2760 = vrcp.f32 %v1570_v50  ;;  %v1576_v60 = vadd.f32 1.0, %v2757_v49  ;;  %v2759_v59 = vpop.eup %2758 }
 0x45f   : > { %2762 = vtanh.f32 %v1565_v52  ;;  %v1583_v7 = vadd.f32 1.0, %v2759_v59  ;;  %v4519_v52 = vld [vmem:[#allocation11_spill] sm:$0xff]  ;;  %v4526_v59 = vld [vmem:[#allocation21_spill] sm:$0xff] }
 0x460   : > { %2764 = vrcp.f32 %v1576_v60  ;;  %v4525_v60 = vld [vmem:[#allocation16_spill] sm:$0xff] }
 0x461   : > { %2766 = vrcp.f32 %v1583_v7  ;;  %v4530_v7 = vld [vmem:[#allocation25_spill] sm:$0xff] }
 0x46b   : > { %v2761_v28 = vpop.eup %2760 }
 0x46c   : > { %v2763_v57 = vpop.eup %2762 }
 0x46d   : > { %v2765_v26 = vpop.eup %2764  ;;  %v1588_v48 = vmul.f32 %v2763_v57, %v2761_v28  ;;  %v4527_v28 = vld [vmem:[#allocation18_spill] sm:$0xff]  ;;  %v4528_v57 = vld [vmem:[#allocation23_spill] sm:$0xff] }
 0x46e   : > { %v1587_v29 = vmul.f32 %v2765_v26, %v3819_v38  ;;  %v2767_v53 = vpop.eup %2766  ;;  %v4518_v38 = vld [vmem:[#allocation13_spill] sm:$0xff]  ;;  %v4529_v26 = vld [vmem:[#allocation20_spill] sm:$0xff] }
 0x470   : > { %v4082_v30 = vadd.f32 %v1588_v48, %v1587_v29  ;;  %v4531_v48 = vld [vmem:[#allocation22_spill] sm:$0xff] }
 0x471   : > { %v4532_v29 = vld [vmem:[#allocation26_spill] sm:$0xff] }
 0x472   : > { %2768 = vtanh.f32 %v4082_v30 }
 0x47f   : > { %v2769_v50 = vpop.eup %2768 }
 0x480   : > { %v1591_v49 = vmul.f32 %v2769_v50, %v2767_v53  ;;  %v4533_v53 = vld [vmem:[#allocation24_spill] sm:$0xff]  ;;  %v4534_v50 = vmov 0.0  }
 0x482   : > { %1596 = vst [vmem:[%s1595_s24] sm:$0xff] %v1591_v49  ;;  %1671 = vmatmul.mubr.f32.vlgmr.msra.gmra.mxu0 %v1591_v49  ;;  %1742 = vmatmul.mubr.f32.vlgmr.msra.gmra.mxu1 %v1591_v49  ;;  %v4535_v49 = vld [vmem:[#allocation27_spill] sm:$0xff]  ;;  %s2647_s24 = sshll.u32 %s4315_s11, 5 }
 0x483   : > { %1792 = vmatpush1.msra.mxu0 %v3825_v4  ;;  %1863 = vmatpush1.msra.mxu1 %v3829_v9  ;;  %s2156_s29 = scalar_lea.vmem [#allocation2], %s2647_s24 }
 0x484   : > { %1793 = vmatprep.subr.mxu0 %v3833_v13  ;;  %1864 = vmatprep.subr.mxu1 %v3837_v2 }
 0x485   : > { %1794 = vmatpush1.msra.mxu0 %v3841_v41  ;;  %1865 = vmatpush1.msra.mxu1 %v3845_v61 }
 0x486   : > { %1795 = vmatprep.subr.mxu0 %v3849_v31  ;;  %1866 = vmatprep.subr.mxu1 %v3853_v18 }
 0x487   : > { %1796 = vmatpush1.msra.mxu0 %v3857_v0  ;;  %1867 = vmatpush1.msra.mxu1 %v3861_v51 }
 0x488   : > { %1797 = vmatprep.subr.mxu0 %v3865_v58  ;;  %1868 = vmatprep.subr.mxu1 %v3869_v3 }
 0x489   : > { %1798 = vmatpush1.msra.mxu0 %v3873_v21  ;;  %1869 = vmatpush1.msra.mxu1 %v3877_v1 }
 0x48a   : > { %1799 = vmatprep.subr.mxu0 %v3881_v5  ;;  %1870 = vmatprep.subr.mxu1 %v3885_v6 }
 0x48b   : > { %1800 = vmatpush1.msra.mxu0 %v3889_v8  ;;  %1871 = vmatpush1.msra.mxu1 %v3893_v10 }
 0x48c   : > { %1801 = vmatprep.subr.mxu0 %v3897_v11  ;;  %1872 = vmatprep.subr.mxu1 %v3901_v12 }
 0x48d   : > { %1802 = vmatpush1.msra.mxu0 %v3905_v14  ;;  %1873 = vmatpush1.msra.mxu1 %v3909_v15 }
 0x48e   : > { %1803 = vmatprep.subr.mxu0 %v3913_v16  ;;  %1874 = vmatprep.subr.mxu1 %v3917_v17 }
 0x48f   : > { %1804 = vmatpush1.msra.mxu0 %v3921_v19  ;;  %1875 = vmatpush1.msra.mxu1 %v3925_v20 }
 0x490   : > { %1805 = vmatprep.subr.mxu0 %v3929_v22  ;;  %1876 = vmatprep.subr.mxu1 %v3933_v23 }
 0x491   : > { %1806 = vmatpush1.msra.mxu0 %v3937_v24  ;;  %1877 = vmatpush1.msra.mxu1 %v3941_v25 }
 0x492   : > { %1807 = vmatprep.subr.mxu0 %v3945_v27  ;;  %1878 = vmatprep.subr.mxu1 %v3949_v32 }
 0x493   : > { %1808 = vmatpush1.msra.mxu0 %v3953_v33  ;;  %1879 = vmatpush1.msra.mxu1 %v3957_v34 }
 0x494   : > { %1809 = vmatprep.subr.mxu0 %v3961_v35  ;;  %1880 = vmatprep.subr.mxu1 %v3965_v36 }
 0x495   : > { %1810 = vmatpush1.msra.mxu0 %v3969_v37  ;;  %1881 = vmatpush1.msra.mxu1 %v3973_v39 }
 0x496   : > { %1811 = vmatprep.subr.mxu0 %v3977_v40  ;;  %1882 = vmatprep.subr.mxu1 %v3981_v42 }
 0x497   : > { %1812 = vmatpush1.msra.mxu0 %v3985_v43  ;;  %1883 = vmatpush1.msra.mxu1 %v3989_v44 }
 0x498   : > { %1813 = vmatprep.subr.mxu0 %v3993_v45  ;;  %1884 = vmatprep.subr.mxu1 %v3997_v46 }
 0x499   : > { %1814 = vmatpush1.msra.mxu0 %v4001_v47  ;;  %1885 = vmatpush1.msra.mxu1 %v4518_v38 }
 0x49a   : > { %1815 = vmatprep.subr.mxu0 %v4519_v52  ;;  %1886 = vmatprep.subr.mxu1 %v4520_v54 }
 0x49b   : > { %1816 = vmatpush1.msra.mxu0 %v4521_v55  ;;  %1887 = vmatpush1.msra.mxu1 %v4522_v56  ;;  %v1604_v56 = vld [vmem:[%s1601_s25 + $0x10] sm:$0xff] }
 0x49c   : > { %1817 = vmatprep.subr.mxu0 %v4523_v63  ;;  %1888 = vmatprep.subr.mxu1 %v4524_v62  ;;  %v1605_v62 = vld [vmem:[%s1601_s25 + $0x18] sm:$0xff] }
 0x49d   : > { %1818 = vmatpush1.msra.mxu0 %v4525_v60  ;;  %1889 = vmatpush1.msra.mxu1 %v4526_v59  ;;  %v4536_v59 = vld [vmem:[#allocation9_spill] sm:$0xff] }
 0x49e   : > { %1819 = vmatprep.subr.mxu0 %v4527_v28  ;;  %1890 = vmatprep.subr.mxu1 %v4528_v57  ;;  %v4537_v28 = vld [vmem:[#allocation10_spill] sm:$0xff] }
 0x49f   : > { %1820 = vmatpush1.msra.mxu0 %v4529_v26  ;;  %1891 = vmatpush1.msra.mxu1 %v4530_v7 }
 0x4a0   : > { %1821 = vmatprep.subr.mxu0 %v4531_v48  ;;  %1892 = vmatprep.subr.mxu1 %v4532_v29  ;;  %v1602_v48 = vld [vmem:[%s1601_s25] sm:$0xff] }
 0x4a1   : > { %1822 = vmatpush1.msra.mxu0 %v4533_v53  ;;  %1855 = vmatprep.mubr.f32.mxu0 %v4534_v50  ;;  %v1603_v53 = vld [vmem:[%s1601_s25 + $0x8] sm:$0xff]  ;;  %s2335_s25 = scalar_lea.vmem %s3661_s30, %s2633_s5 [#allocation7] }
 0x4a2   : > { %1893 = vmatpush1.msra.mxu1 %v4535_v49  ;;  %1926 = vmatprep.mubr.f32.mxu1 %v4534_v50 }
 0x4a3   : > { %1976 = vmatprep.subr.mxu0 %v4536_v59  ;;  %2047 = vmatprep.subr.mxu1 %v4537_v28 }
 0x542   : > { %v1672_v29 = vpop.f32.mrf.mxu0  ;;  %v1743_v49 = vpop.f32.mrf.mxu1 }
 0x543   : > { %v1748_v7 = vadd.f32 %v1672_v29, %v1602_v48  ;;  %v1750_v54 = vadd.f32 %v1743_v49, %v1604_v56  ;;  %v4540_v56 = vld [vmem:[#allocation15_spill] sm:$0xff] }
 0x544   : > { %v1674_v26 = vpop.f32.mrf.mxu0  ;;  %v1745_v59 = vpop.f32.mrf.mxu1  ;;  %v4544_v49 = vld [vmem:[#allocation19_spill] sm:$0xff] }
 0x545   : > { %v2612_v57 = vmul.f32 -1.442695, %v1748_v7  ;;  %v1749_v60 = vadd.f32 %v1674_v26, %v1603_v53  ;;  %v1751_v28 = vadd.f32 %v1745_v59, %v1605_v62 }
 0x547   : > { %2770 = vpow2.f32 %v2612_v57  ;;  %v2613_v50 = vmul.f32 -1.442695, %v1749_v60  ;;  %v2614_v63 = vmul.f32 -1.442695, %v1751_v28  ;;  %v4542_v28 = vld [vmem:[#allocation17_spill] sm:$0xff] }
 0x549   : > { %2772 = vpow2.f32 %v2613_v50  ;;  %v4543_v50 = vld [vmem:[#allocation14_spill] sm:$0xff] }
 0x54a   : > { %2774 = vpow2.f32 %v2614_v63  ;;  %v4541_v63 = vld [vmem:[#allocation12_spill] sm:$0xff] }
 0x554   : > { %v2771_v55 = vpop.eup %2770 }
 0x555   : > { %v1755_v52 = vadd.f32 1.0, %v2771_v55 }
 0x556   : > { %v2773_v38 = vpop.eup %2772 }
 0x557   : > { %2776 = vrcp.f32 %v1755_v52  ;;  %v1761_v48 = vadd.f32 1.0, %v2773_v38  ;;  %v2775_v57 = vpop.eup %2774 }
 0x558   : > { %2778 = vtanh.f32 %v1750_v54  ;;  %v1768_v29 = vadd.f32 1.0, %v2775_v57  ;;  %v4539_v54 = vld [vmem:[#allocation11_spill] sm:$0xff]  ;;  %v4546_v57 = vld [vmem:[#allocation21_spill] sm:$0xff] }
 0x559   : > { %2780 = vrcp.f32 %v1761_v48  ;;  %v4545_v48 = vld [vmem:[#allocation16_spill] sm:$0xff] }
 0x55a   : > { %2782 = vrcp.f32 %v1768_v29  ;;  %v4550_v29 = vld [vmem:[#allocation25_spill] sm:$0xff] }
 0x564   : > { %v2777_v26 = vpop.eup %2776 }
 0x565   : > { %v2779_v60 = vpop.eup %2778 }
 0x566   : > { %v2781_v7 = vpop.eup %2780  ;;  %v1773_v53 = vmul.f32 %v2779_v60, %v2777_v26  ;;  %v4547_v26 = vld [vmem:[#allocation18_spill] sm:$0xff]  ;;  %v4548_v60 = vld [vmem:[#allocation23_spill] sm:$0xff] }
 0x567   : > { %v1772_v62 = vmul.f32 %v2781_v7, %v4082_v30  ;;  %v2783_v55 = vpop.eup %2782  ;;  %v4538_v30 = vld [vmem:[#allocation13_spill] sm:$0xff]  ;;  %v4549_v7 = vld [vmem:[#allocation20_spill] sm:$0xff] }
 0x569   : > { %v4159_v59 = vadd.f32 %v1773_v53, %v1772_v62  ;;  %v4551_v53 = vld [vmem:[#allocation22_spill] sm:$0xff] }
 0x56a   : > { %v4552_v62 = vld [vmem:[#allocation26_spill] sm:$0xff] }
 0x56b   : > { %2784 = vtanh.f32 %v4159_v59 }
 0x578   : > { %v2785_v52 = vpop.eup %2784 }
 0x579   : > { %v1776_v38 = vmul.f32 %v2785_v52, %v2783_v55  ;;  %v4553_v55 = vld [vmem:[#allocation24_spill] sm:$0xff]  ;;  %v4554_v52 = vmov 0.0  }
 0x57b   : > { %1781 = vst [vmem:[%s1780_s7] sm:$0xff] %v1776_v38  ;;  %1856 = vmatmul.mubr.f32.vlgmr.msra.gmra.mxu0 %v1776_v38  ;;  %1927 = vmatmul.mubr.f32.vlgmr.msra.gmra.mxu1 %v1776_v38  ;;  %v4555_v38 = vld [vmem:[#allocation27_spill] sm:$0xff] }
 0x57c   : > { %1977 = vmatpush1.msra.mxu0 %v3825_v4  ;;  %2048 = vmatpush1.msra.mxu1 %v3829_v9 }
 0x57d   : > { %1978 = vmatprep.subr.mxu0 %v3833_v13  ;;  %2049 = vmatprep.subr.mxu1 %v3837_v2 }
 0x57e   : > { %1979 = vmatpush1.msra.mxu0 %v3841_v41  ;;  %2050 = vmatpush1.msra.mxu1 %v3845_v61 }
 0x57f   : > { %1980 = vmatprep.subr.mxu0 %v3849_v31  ;;  %2051 = vmatprep.subr.mxu1 %v3853_v18 }
 0x580   : > { %1981 = vmatpush1.msra.mxu0 %v3857_v0  ;;  %2052 = vmatpush1.msra.mxu1 %v3861_v51 }
 0x581   : > { %1982 = vmatprep.subr.mxu0 %v3865_v58  ;;  %2053 = vmatprep.subr.mxu1 %v3869_v3 }
 0x582   : > { %1983 = vmatpush1.msra.mxu0 %v3873_v21  ;;  %2054 = vmatpush1.msra.mxu1 %v3877_v1 }
 0x583   : > { %1984 = vmatprep.subr.mxu0 %v3881_v5  ;;  %2055 = vmatprep.subr.mxu1 %v3885_v6 }
 0x584   : > { %1985 = vmatpush1.msra.mxu0 %v3889_v8  ;;  %2056 = vmatpush1.msra.mxu1 %v3893_v10 }
 0x585   : > { %1986 = vmatprep.subr.mxu0 %v3897_v11  ;;  %2057 = vmatprep.subr.mxu1 %v3901_v12 }
 0x586   : > { %1987 = vmatpush1.msra.mxu0 %v3905_v14  ;;  %2058 = vmatpush1.msra.mxu1 %v3909_v15 }
 0x587   : > { %1988 = vmatprep.subr.mxu0 %v3913_v16  ;;  %2059 = vmatprep.subr.mxu1 %v3917_v17 }
 0x588   : > { %1989 = vmatpush1.msra.mxu0 %v3921_v19  ;;  %2060 = vmatpush1.msra.mxu1 %v3925_v20 }
 0x589   : > { %1990 = vmatprep.subr.mxu0 %v3929_v22  ;;  %2061 = vmatprep.subr.mxu1 %v3933_v23 }
 0x58a   : > { %1991 = vmatpush1.msra.mxu0 %v3937_v24  ;;  %2062 = vmatpush1.msra.mxu1 %v3941_v25 }
 0x58b   : > { %1992 = vmatprep.subr.mxu0 %v3945_v27  ;;  %2063 = vmatprep.subr.mxu1 %v3949_v32 }
 0x58c   : > { %1993 = vmatpush1.msra.mxu0 %v3953_v33  ;;  %2064 = vmatpush1.msra.mxu1 %v3957_v34 }
 0x58d   : > { %1994 = vmatprep.subr.mxu0 %v3961_v35  ;;  %2065 = vmatprep.subr.mxu1 %v3965_v36 }
 0x58e   : > { %1995 = vmatpush1.msra.mxu0 %v3969_v37  ;;  %2066 = vmatpush1.msra.mxu1 %v3973_v39 }
 0x58f   : > { %1996 = vmatprep.subr.mxu0 %v3977_v40  ;;  %2067 = vmatprep.subr.mxu1 %v3981_v42 }
 0x590   : > { %1997 = vmatpush1.msra.mxu0 %v3985_v43  ;;  %2068 = vmatpush1.msra.mxu1 %v3989_v44 }
 0x591   : > { %1998 = vmatprep.subr.mxu0 %v3993_v45  ;;  %2069 = vmatprep.subr.mxu1 %v3997_v46 }
 0x592   : > { %1999 = vmatpush1.msra.mxu0 %v4001_v47  ;;  %2070 = vmatpush1.msra.mxu1 %v4538_v30 }
 0x593   : > { %2000 = vmatprep.subr.mxu0 %v4539_v54  ;;  %2071 = vmatprep.subr.mxu1 %v4540_v56 }
 0x594   : > { %2001 = vmatpush1.msra.mxu0 %v4541_v63  ;;  %2072 = vmatpush1.msra.mxu1 %v4542_v28  ;;  %v1789_v28 = vld [vmem:[%s1786_s10 + $0x10] sm:$0xff] }
 0x595   : > { %2002 = vmatprep.subr.mxu0 %v4543_v50  ;;  %2073 = vmatprep.subr.mxu1 %v4544_v49  ;;  %v1790_v49 = vld [vmem:[%s1786_s10 + $0x18] sm:$0xff] }
 0x596   : > { %2003 = vmatpush1.msra.mxu0 %v4545_v48  ;;  %2074 = vmatpush1.msra.mxu1 %v4546_v57  ;;  %v4556_v57 = vld [vmem:[#allocation9_spill] sm:$0xff] }
 0x597   : > { %2004 = vmatprep.subr.mxu0 %v4547_v26  ;;  %2075 = vmatprep.subr.mxu1 %v4548_v60  ;;  %v4557_v26 = vld [vmem:[#allocation10_spill] sm:$0xff] }
 0x598   : > { %2005 = vmatpush1.msra.mxu0 %v4549_v7  ;;  %2076 = vmatpush1.msra.mxu1 %v4550_v29 }
 0x599   : > { %2006 = vmatprep.subr.mxu0 %v4551_v53  ;;  %2077 = vmatprep.subr.mxu1 %v4552_v62  ;;  %v1787_v53 = vld [vmem:[%s1786_s10] sm:$0xff] }
 0x59a   : > { %2007 = vmatpush1.msra.mxu0 %v4553_v55  ;;  %2040 = vmatprep.mubr.f32.mxu0 %v4554_v52  ;;  %v1788_v55 = vld [vmem:[%s1786_s10 + $0x8] sm:$0xff] }
 0x59b   : > { %2078 = vmatpush1.msra.mxu1 %v4555_v38  ;;  %2111 = vmatprep.mubr.f32.mxu1 %v4554_v52 }
 0x59c   : > { %2161 = vmatprep.subr.mxu0 %v4556_v57  ;;  %2232 = vmatprep.subr.mxu1 %v4557_v26 }
 0x63b   : > { %v1857_v62 = vpop.f32.mrf.mxu0  ;;  %v1928_v38 = vpop.f32.mrf.mxu1 }
 0x63c   : > { %v1933_v29 = vadd.f32 %v1857_v62, %v1787_v53  ;;  %v1935_v56 = vadd.f32 %v1928_v38, %v1789_v28 }
 0x63d   : > { %v1859_v7 = vpop.f32.mrf.mxu0  ;;  %v1930_v57 = vpop.f32.mrf.mxu1 }
 0x63e   : > { %v2618_v60 = vmul.f32 -1.442695, %v1933_v29  ;;  %v1934_v48 = vadd.f32 %v1859_v7, %v1788_v55  ;;  %v1936_v26 = vadd.f32 %v1930_v57, %v1790_v49 }
 0x640   : > { %2786 = vpow2.f32 %v2618_v60  ;;  %v2619_v52 = vmul.f32 -1.442695, %v1934_v48  ;;  %v2620_v50 = vmul.f32 -1.442695, %v1936_v26  ;;  %v2158_v26 = vld [vmem:[%s2156_s29 + $0x8] sm:$0xff] }
 0x642   : > { %2788 = vpow2.f32 %v2619_v52 }
 0x643   : > { %2790 = vpow2.f32 %v2620_v50  ;;  %v2157_v50 = vld [vmem:[%s2156_s29] sm:$0xff] }
 0x64d   : > { %v2787_v63 = vpop.eup %2786 }
 0x64e   : > { %v1940_v54 = vadd.f32 1.0, %v2787_v63 }
 0x64f   : > { %v2789_v30 = vpop.eup %2788 }
 0x650   : > { %2792 = vrcp.f32 %v1940_v54  ;;  %v1946_v53 = vadd.f32 1.0, %v2789_v30  ;;  %v2791_v60 = vpop.eup %2790 }
 0x651   : > { %2794 = vtanh.f32 %v1935_v56  ;;  %v1953_v62 = vadd.f32 1.0, %v2791_v60 }
 0x652   : > { %2796 = vrcp.f32 %v1946_v53 }
 0x653   : > { %2798 = vrcp.f32 %v1953_v62 }
 0x65d   : > { %v2793_v7 = vpop.eup %2792 }
 0x65e   : > { %v2795_v48 = vpop.eup %2794 }
 0x65f   : > { %v2797_v29 = vpop.eup %2796  ;;  %v1958_v55 = vmul.f32 %v2795_v48, %v2793_v7 }
 0x660   : > { %v1957_v49 = vmul.f32 %v2797_v29, %v4159_v59  ;;  %v2799_v63 = vpop.eup %2798 }
 0x662   : > { %v4236_v52 = vadd.f32 %v1958_v55, %v1957_v49  ;;  %v2160_v55 = vld [vmem:[%s2156_s29 + $0x18] sm:$0xff] }
 0x664   : > { %2800 = vtanh.f32 %v4236_v52 }
 0x671   : > { %v2801_v54 = vpop.eup %2800 }
 0x672   : > { %v1961_v30 = vmul.f32 %v2801_v54, %v2799_v63  ;;  %v2159_v63 = vld [vmem:[%s2156_s29 + $0x10] sm:$0xff] }
 0x674   : > { %1966 = vst [vmem:[%s1965_s13] sm:$0xff] %v1961_v30  ;;  %2041 = vmatmul.mubr.f32.vlgmr.msra.gmra.mxu0 %v1961_v30  ;;  %2112 = vmatmul.mubr.f32.vlgmr.msra.gmra.mxu1 %v1961_v30 }
 0x675   : > { %2162 = vmatpush1.msra.mxu0 %v3825_v4  ;;  %2233 = vmatpush1.msra.mxu1 %v3829_v9  ;;  %v4558_v4 = vld [vmem:[#allocation13_spill] sm:$0xff]  ;;  %v4559_v9 = vld [vmem:[#allocation11_spill] sm:$0xff] }
 0x676   : > { %2163 = vmatprep.subr.mxu0 %v3833_v13  ;;  %2234 = vmatprep.subr.mxu1 %v3837_v2  ;;  %v4560_v13 = vld [vmem:[#allocation15_spill] sm:$0xff]  ;;  %v4561_v2 = vld [vmem:[#allocation12_spill] sm:$0xff] }
 0x677   : > { %2164 = vmatpush1.msra.mxu0 %v3841_v41  ;;  %2235 = vmatpush1.msra.mxu1 %v3845_v61  ;;  %v4562_v41 = vld [vmem:[#allocation17_spill] sm:$0xff]  ;;  %v4563_v61 = vld [vmem:[#allocation14_spill] sm:$0xff] }
 0x678   : > { %2165 = vmatprep.subr.mxu0 %v3849_v31  ;;  %2236 = vmatprep.subr.mxu1 %v3853_v18  ;;  %v4564_v31 = vld [vmem:[#allocation19_spill] sm:$0xff]  ;;  %v4565_v18 = vld [vmem:[#allocation16_spill] sm:$0xff] }
 0x679   : > { %2166 = vmatpush1.msra.mxu0 %v3857_v0  ;;  %2237 = vmatpush1.msra.mxu1 %v3861_v51  ;;  %v4566_v0 = vld [vmem:[#allocation21_spill] sm:$0xff]  ;;  %v4567_v51 = vld [vmem:[#allocation18_spill] sm:$0xff] }
 0x67a   : > { %2167 = vmatprep.subr.mxu0 %v3865_v58  ;;  %2238 = vmatprep.subr.mxu1 %v3869_v3  ;;  %v4568_v58 = vld [vmem:[#allocation23_spill] sm:$0xff]  ;;  %v4569_v3 = vld [vmem:[#allocation20_spill] sm:$0xff] }
 0x67b   : > { %2168 = vmatpush1.msra.mxu0 %v3873_v21  ;;  %2239 = vmatpush1.msra.mxu1 %v3877_v1  ;;  %v4570_v21 = vld [vmem:[#allocation25_spill] sm:$0xff]  ;;  %v4571_v1 = vld [vmem:[#allocation22_spill] sm:$0xff] }
 0x67c   : > { %2169 = vmatprep.subr.mxu0 %v3881_v5  ;;  %2240 = vmatprep.subr.mxu1 %v3885_v6  ;;  %v4572_v5 = vld [vmem:[#allocation26_spill] sm:$0xff]  ;;  %v4573_v6 = vld [vmem:[#allocation24_spill] sm:$0xff] }
 0x67d   : > { %2170 = vmatpush1.msra.mxu0 %v3889_v8  ;;  %2241 = vmatpush1.msra.mxu1 %v3893_v10  ;;  %v4574_v8 = vmov 0.0   ;;  %v4575_v10 = vld [vmem:[#allocation27_spill] sm:$0xff] }
 0x67e   : > { %2171 = vmatprep.subr.mxu0 %v3897_v11  ;;  %2242 = vmatprep.subr.mxu1 %v3901_v12  ;;  %v1972_v11 = vld [vmem:[%s1971_s26] sm:$0xff] }
 0x67f   : > { %2172 = vmatpush1.msra.mxu0 %v3905_v14  ;;  %2243 = vmatpush1.msra.mxu1 %v3909_v15  ;;  %v1973_v15 = vld [vmem:[%s1971_s26 + $0x8] sm:$0xff] }
 0x680   : > { %2173 = vmatprep.subr.mxu0 %v3913_v16  ;;  %2244 = vmatprep.subr.mxu1 %v3917_v17 }
 0x681   : > { %2174 = vmatpush1.msra.mxu0 %v3921_v19  ;;  %2245 = vmatpush1.msra.mxu1 %v3925_v20 }
 0x682   : > { %2175 = vmatprep.subr.mxu0 %v3929_v22  ;;  %2246 = vmatprep.subr.mxu1 %v3933_v23 }
 0x683   : > { %2176 = vmatpush1.msra.mxu0 %v3937_v24  ;;  %2247 = vmatpush1.msra.mxu1 %v3941_v25  ;;  %v1975_v24 = vld [vmem:[%s1971_s26 + $0x18] sm:$0xff] }
 0x684   : > { %2177 = vmatprep.subr.mxu0 %v3945_v27  ;;  %2248 = vmatprep.subr.mxu1 %v3949_v32  ;;  %v1974_v32 = vld [vmem:[%s1971_s26 + $0x10] sm:$0xff] }
 0x685   : > { %2178 = vmatpush1.msra.mxu0 %v3953_v33  ;;  %2249 = vmatpush1.msra.mxu1 %v3957_v34 }
 0x686   : > { %2179 = vmatprep.subr.mxu0 %v3961_v35  ;;  %2250 = vmatprep.subr.mxu1 %v3965_v36 }
 0x687   : > { %2180 = vmatpush1.msra.mxu0 %v3969_v37  ;;  %2251 = vmatpush1.msra.mxu1 %v3973_v39 }
 0x688   : > { %2181 = vmatprep.subr.mxu0 %v3977_v40  ;;  %2252 = vmatprep.subr.mxu1 %v3981_v42 }
 0x689   : > { %2182 = vmatpush1.msra.mxu0 %v3985_v43  ;;  %2253 = vmatpush1.msra.mxu1 %v3989_v44 }
 0x68a   : > { %2183 = vmatprep.subr.mxu0 %v3993_v45  ;;  %2254 = vmatprep.subr.mxu1 %v3997_v46 }
 0x68b   : > { %2184 = vmatpush1.msra.mxu0 %v4001_v47  ;;  %2255 = vmatpush1.msra.mxu1 %v4558_v4 }
 0x68c   : > { %2185 = vmatprep.subr.mxu0 %v4559_v9  ;;  %2256 = vmatprep.subr.mxu1 %v4560_v13 }
 0x68d   : > { %2186 = vmatpush1.msra.mxu0 %v4561_v2  ;;  %2257 = vmatpush1.msra.mxu1 %v4562_v41 }
 0x68e   : > { %2187 = vmatprep.subr.mxu0 %v4563_v61  ;;  %2258 = vmatprep.subr.mxu1 %v4564_v31 }
 0x68f   : > { %2188 = vmatpush1.msra.mxu0 %v4565_v18  ;;  %2259 = vmatpush1.msra.mxu1 %v4566_v0 }
 0x690   : > { %2189 = vmatprep.subr.mxu0 %v4567_v51  ;;  %2260 = vmatprep.subr.mxu1 %v4568_v58 }
 0x691   : > { %2190 = vmatpush1.msra.mxu0 %v4569_v3  ;;  %2261 = vmatpush1.msra.mxu1 %v4570_v21 }
 0x692   : > { %2191 = vmatprep.subr.mxu0 %v4571_v1  ;;  %2262 = vmatprep.subr.mxu1 %v4572_v5 }
 0x693   : > { %2192 = vmatpush1.msra.mxu0 %v4573_v6  ;;  %2225 = vmatprep.mubr.f32.mxu0 %v4574_v8 }
 0x694   : > { %2263 = vmatpush1.msra.mxu1 %v4575_v10  ;;  %2296 = vmatprep.mubr.f32.mxu1 %v4574_v8 }
 0x734   : > { %v2042_v12 = vpop.f32.mrf.mxu0  ;;  %v2113_v20 = vpop.f32.mrf.mxu1 }
 0x735   : > { %v2118_v14 = vadd.f32 %v2042_v12, %v1972_v11  ;;  %v2120_v34 = vadd.f32 %v2113_v20, %v1974_v32 }
 0x736   : > { %v2044_v16 = vpop.f32.mrf.mxu0  ;;  %v2115_v23 = vpop.f32.mrf.mxu1 }
 0x737   : > { %v2624_v17 = vmul.f32 -1.442695, %v2118_v14  ;;  %v2119_v19 = vadd.f32 %v2044_v16, %v1973_v15  ;;  %v2121_v25 = vadd.f32 %v2115_v23, %v1975_v24 }
 0x739   : > { %2802 = vpow2.f32 %v2624_v17  ;;  %v2625_v22 = vmul.f32 -1.442695, %v2119_v19  ;;  %v2626_v27 = vmul.f32 -1.442695, %v2121_v25 }
 0x73b   : > { %2804 = vpow2.f32 %v2625_v22 }
 0x73c   : > { %2806 = vpow2.f32 %v2626_v27 }
 0x746   : > { %v2803_v33 = vpop.eup %2802 }
 0x747   : > { %v2125_v35 = vadd.f32 1.0, %v2803_v33 }
 0x748   : > { %v2805_v36 = vpop.eup %2804 }
 0x749   : > { %2808 = vrcp.f32 %v2125_v35  ;;  %v2131_v37 = vadd.f32 1.0, %v2805_v36  ;;  %v2807_v39 = vpop.eup %2806 }
 0x74a   : > { %2810 = vtanh.f32 %v2120_v34  ;;  %v2138_v44 = vadd.f32 1.0, %v2807_v39 }
 0x74b   : > { %2812 = vrcp.f32 %v2131_v37 }
 0x74c   : > { %2814 = vrcp.f32 %v2138_v44 }
 0x756   : > { %v2809_v40 = vpop.eup %2808 }
 0x757   : > { %v2811_v42 = vpop.eup %2810 }
 0x758   : > { %v2813_v43 = vpop.eup %2812  ;;  %v2143_v45 = vmul.f32 %v2811_v42, %v2809_v40 }
 0x759   : > { %v2142_v46 = vmul.f32 %v2813_v43, %v4236_v52  ;;  %v2815_v59 = vpop.eup %2814 }
 0x75b   : > { %v2144_v47 = vadd.f32 %v2143_v45, %v2142_v46 }
 0x75d   : > { %2816 = vtanh.f32 %v2144_v47 }
 0x76a   : > { %v2817_v56 = vpop.eup %2816 }
 0x76b   : > { %v2146_v28 = vmul.f32 %v2817_v56, %v2815_v59 }
 0x76d   : > { %2151 = vst [vmem:[%s2150_s23] sm:$0xff] %v2146_v28  ;;  %2226 = vmatmul.mubr.f32.vlgmr.msra.gmra.mxu0 %v2146_v28  ;;  %2297 = vmatmul.mubr.f32.vlgmr.msra.gmra.mxu1 %v2146_v28 }
 0x82d   : > { %v2227_v38 = vpop.f32.mrf.mxu0  ;;  %v2298_v48 = vpop.f32.mrf.mxu1 }
 0x82e   : > { %v2303_v57 = vadd.f32 %v2227_v38, %v2157_v50  ;;  %v2305_v30 = vadd.f32 %v2298_v48, %v2159_v63 }
 0x82f   : > { %v2229_v53 = vpop.f32.mrf.mxu0  ;;  %v2300_v62 = vpop.f32.mrf.mxu1 }
 0x830   : > { %v2630_v60 = vmul.f32 -1.442695, %v2303_v57  ;;  %v2304_v7 = vadd.f32 %v2229_v53, %v2158_v26  ;;  %v2306_v49 = vadd.f32 %v2300_v62, %v2160_v55 }
 0x832   : > { %2818 = vpow2.f32 %v2630_v60  ;;  %v2631_v29 = vmul.f32 -1.442695, %v2304_v7  ;;  %v2632_v52 = vmul.f32 -1.442695, %v2306_v49 }
 0x834   : > { %2820 = vpow2.f32 %v2631_v29 }
 0x835   : > { %2822 = vpow2.f32 %v2632_v52 }
 0x83f   : > { %v2819_v54 = vpop.eup %2818 }
 0x840   : > { %v2310_v4 = vadd.f32 1.0, %v2819_v54 }
 0x841   : > { %v2821_v9 = vpop.eup %2820 }
 0x842   : > { %2824 = vrcp.f32 %v2310_v4  ;;  %v2316_v13 = vadd.f32 1.0, %v2821_v9  ;;  %v2823_v2 = vpop.eup %2822 }
 0x843   : > { %2826 = vtanh.f32 %v2305_v30  ;;  %v2323_v18 = vadd.f32 1.0, %v2823_v2 }
 0x844   : > { %2828 = vrcp.f32 %v2316_v13 }
 0x845   : > { %2830 = vrcp.f32 %v2323_v18 }
 0x84f   : > { %v2825_v41 = vpop.eup %2824 }
 0x850   : > { %v2827_v61 = vpop.eup %2826 }
 0x851   : > { %v2829_v31 = vpop.eup %2828  ;;  %v2328_v0 = vmul.f32 %v2827_v61, %v2825_v41 }
 0x852   : > { %v2327_v51 = vmul.f32 %v2829_v31, %v2144_v47  ;;  %v2831_v3 = vpop.eup %2830 }
 0x854   : > { %v2329_v58 = vadd.f32 %v2328_v0, %v2327_v51 }
 0x856   : > { %2832 = vtanh.f32 %v2329_v58 }
 0x862   : > { %2343 = sbr.rel (!%p3057_p9) target bundleno = 2163 (0x873), region = 48 }
 0x863   : > { %v2833_v21 = vpop.eup %2832 }
 0x864   : > { %v2331_v1 = vmul.f32 %v2833_v21, %v2831_v3 }
 0x866   : > { %2336 = vst [vmem:[%s2335_s25] sm:$0xff] %v2331_v1 }
 0x86d   : > { %v2398_v5 = vld [vmem:[%s3661_s30] sm:$0xff]  ;;  %v2400_v6 = vld [vmem:[%s3661_s30 + $0x8] sm:$0xff]  ;;  %v2402_v8 = vld [vmem:[%s3661_s30 + $0x10] sm:$0xff] }
 0x86e   : > { %v2404_v10 = vld [vmem:[%s3661_s30 + $0x18] sm:$0xff]  ;;  %v2406_v11 = vld [vmem:[%s3661_s30 + $0x20] sm:$0xff]  ;;  %v2408_v12 = vld [vmem:[%s3661_s30 + $0x28] sm:$0xff]  ;;  %2399 = vst [vmem:[%s2355_s9] sm:$0xff] %v2398_v5 }
 0x86f   : > { %2401 = vst [vmem:[%s2355_s9 + $0x10] sm:$0xff] %v2400_v6  ;;  %2403 = vst [vmem:[%s2355_s9 + $0x20] sm:$0xff] %v2402_v8  ;;  %v2410_v14 = vld [vmem:[%s3661_s30 + $0x30] sm:$0xff]  ;;  %v2412_v15 = vld [vmem:[%s3661_s30 + $0x38] sm:$0xff] }
 0x870   : > { %2405 = vst [vmem:[%s2355_s9 + $0x30] sm:$0xff] %v2404_v10  ;;  %2407 = vst [vmem:[%s2355_s9 + $0x40] sm:$0xff] %v2406_v11 }
 0x871   : > { %2409 = vst [vmem:[%s2355_s9 + $0x50] sm:$0xff] %v2408_v12  ;;  %2411 = vst [vmem:[%s2355_s9 + $0x60] sm:$0xff] %v2410_v14 }
 0x872   : > { %2413 = vst [vmem:[%s2355_s9 + $0x70] sm:$0xff] %v2412_v15 }
 0x873 PF: > { %s17_s20 = sadd.s32 1, %s2976_s20   ;;  %s4576_s15 = smov %s2960_s16 }
 0x874   : > { %p14_p9 = scmp.ge.s32.totalorder %s17_s20, 4   ;;  %s4577_s16 = smov %s2964_s17 }
 0x875   : > { %s4578_s17 = smov %s3055_s27  ;;  %s4579_s18 = smov %s2972_s19 }
 0x876   : > { %s4580_s19 = smov %s4582_s22  ;;  %16 = sbr.rel (!%p14_p9) target bundleno = 4 (0x4), region = 143 }
 0x87b   :  { %2429 = vsyncpa [#allocation6], 1 }
 0x87c   :  { %2431 = vsyncpa [#allocation6 + $0x1], 1 }

</bundles_post_ra>
